<compile_context>
chip_gen: v7x
topology: tpu7x:2x2x1
jax: 0.10.0
libtpu: 0.0.40
codegen_flags: <defaults>
</compile_context>

<pallas_src>
import functools

import jax
import jax.numpy as jnp
from jax.experimental import pallas as pl
from jax.experimental.pallas import tpu as pltpu


def _round_up(x, m):
    return ((x + m - 1) // m) * m


def _cdiv(a, b):
    return (a + b - 1) // b


# ----------------------------- kernels --------------------------------------


def _im2col_tile(x_ref, halo_ref, slab_ref, patch_ref, *, cin, offsets):
    """Assemble the (TM, K*K*Cin) im2col patch tile for this grid step.

    x_ref:    (TM, Cin) rows [i*TM, (i+1)*TM) of the row-flattened padded input
    halo_ref: (HB, Cin) the next HB rows (overlap needed by the lower taps)
    """
    tm = x_ref.shape[0]
    # f32 (unpacked) slab keeps the statically-shifted, sublane-unaligned row
    # loads below on the simplest relayout path; casts are value-exact.
    slab_ref[0:tm, :] = x_ref[...].astype(slab_ref.dtype)
    slab_ref[tm:, :] = halo_ref[...].astype(slab_ref.dtype)
    for j, off in enumerate(offsets):
        patch_ref[:, j * cin:(j + 1) * cin] = (
            slab_ref[pl.ds(off, tm), :].astype(patch_ref.dtype))


def _conv_stats_kernel(x_ref, halo_ref, w_ref, mask_ref, stats_ref,
                       slab_ref, patch_ref, *, cin, offsets):
    """Pass 1: im2col matmul + per-tile masked BN partial statistics only."""
    _im2col_tile(x_ref, halo_ref, slab_ref, patch_ref, cin=cin, offsets=offsets)
    acc = jnp.dot(patch_ref[...], w_ref[...], preferred_element_type=jnp.float32)
    mask = mask_ref[...]                               # (TM, 1), 0/1 in f32
    cnt = jnp.maximum(jnp.sum(mask), 1.0)              # valid rows in this tile
    ssum = jnp.sum(acc * mask, axis=0, keepdims=True)  # (1, CPAD)
    mean = ssum / cnt
    diff = (acc - mean) * mask
    # Two row stores; remaining rows of the (8, CPAD) slab are left untouched
    # and ignored by the wrapper.
    stats_ref[0:1, :] = ssum
    stats_ref[1:2, :] = jnp.sum(diff * diff, axis=0, keepdims=True)


def _conv_bn_relu_kernel(x_ref, halo_ref, w_ref, scale_ref, shift_ref, o_ref,
                         slab_ref, patch_ref, *, cin, offsets):
    """Pass 2: recompute the conv matmul and fuse BN affine + ReLU into the store."""
    _im2col_tile(x_ref, halo_ref, slab_ref, patch_ref, cin=cin, offsets=offsets)
    acc = jnp.dot(patch_ref[...], w_ref[...], preferred_element_type=jnp.float32)
    y = jnp.maximum(acc * scale_ref[...] + shift_ref[...], 0.0)
    # Store only the real Cout lanes; the HBM output array is channel-unpadded.
    o_ref[...] = y[:, :o_ref.shape[1]].astype(o_ref.dtype)


# ----------------------------- tiling ---------------------------------------


def _derive_tiling(m_full, halo, cin, cout, cpad, kk, compute_bytes, block_m):
    """Generation-aware block_m / halo-block / VMEM-limit derivation."""
    hb = _round_up(max(halo, 1), 32)            # halo rows, sublane/pack aligned
    try:
        vmem_bytes = int(pltpu.get_tpu_info().vmem_capacity_bytes)
        if vmem_bytes <= 0:
            raise ValueError(vmem_bytes)
    except Exception:                            # conservative: v7x = 64 MiB/TC
        vmem_bytes = 64 * 1024 * 1024
    if block_m is None:
        block_m = 2048 if vmem_bytes >= (96 << 20) else 1024

    # Rough per-grid-step footprint (double-buffered streams + scratch + temps).
    fixed = (2 * kk * cin * cpad * compute_bytes      # resident weight (x2 buf)
             + 2 * hb * cin * compute_bytes           # halo blocks (x2 buf)
             + 4 * cpad * 4 + 2 * 8 * cpad * 4)       # scale/shift + stats blocks
    per_row = (2 * cin * compute_bytes                # main input block (x2 buf)
               + cin * 4                              # f32 slab scratch
               + kk * cin * compute_bytes             # im2col patch scratch
               + 2 * 4                                # mask block (x2, pass 1)
               + 2 * cout * 4                         # output block (x2, pass 2)
               + 3 * cpad * 4)                        # f32 accumulator / BN temps
    budget = vmem_bytes // 2
    cap = max((budget - fixed) // per_row, hb)
    cap = max((cap // hb) * hb, hb)
    tm = max(hb, min(_round_up(block_m, hb), _round_up(m_full, hb), cap))
    num_tiles = _cdiv(m_full, tm)

    # Prefer an even tile count so a two-TensorCore chip (v7x) load-balances
    # the "parallel" grid axis.
    if num_tiles % 2 == 1 and _round_up(m_full, hb) > hb:
        tm_even = _round_up(_cdiv(m_full, num_tiles + 1), hb)
        if tm_even >= hb and _cdiv(m_full, tm_even) % 2 == 0:
            tm = tm_even
            num_tiles = _cdiv(m_full, tm)

    need = fixed + per_row * tm + (4 << 20)
    vmem_limit = int(min(max(need, 32 << 20), 100 << 20, int(vmem_bytes * 0.9)))
    return tm, hb, num_tiles, vmem_limit


# ----------------------------- wrapper --------------------------------------


def conv3x3_forward(x_nchw, weight_oihw, gamma, beta, *,
                    n_kern=3, n_stride=1, n_pad=1, pad_mode="constant",
                    eps=1e-5, block_m=None, compute_dtype=jnp.bfloat16):
    """Forward pass of Conv3x3 (use_bn=True). Input/output are NCHW (PyTorch)."""
    assert pad_mode in ("constant", "reflect")
    n, cin, h, w_sp = x_nchw.shape
    cout = weight_oihw.shape[0]
    k, s = n_kern, n_stride
    kk = k * k

    # --- layout glue: cast first, then one pass of transpose + spatial pad ---
    x = jnp.transpose(x_nchw.astype(compute_dtype), (0, 2, 3, 1))     # NHWC
    if n_pad > 0:
        mode = "constant" if pad_mode == "constant" else "reflect"
        x = jnp.pad(x, ((0, 0), (n_pad, n_pad), (n_pad, n_pad), (0, 0)),
                    mode=mode)
    hp, wp = h + 2 * n_pad, w_sp + 2 * n_pad
    ho = (hp - k) // s + 1
    wo = (wp - k) // s + 1

    m_full = n * hp * wp                          # conv evaluated at every padded
    halo = (k - 1) * wp + (k - 1)                 # position; invalid rows masked/
    offsets = tuple(kh * wp + kw                  # cropped (stride handled there)
                    for kh in range(k) for kw in range(k))
    cpad = _round_up(cout, 128)                   # lane-dense compute width
    cb = jnp.dtype(compute_dtype).itemsize

    tm, hb, num_tiles, vmem_limit = _derive_tiling(
        m_full, halo, cin, cout, cpad, kk, cb, block_m)
    m_pad = num_tiles * tm

    # Row-flattened padded input: rows ordered (n, h, w), channels on lanes.
    x_flat = x.reshape(m_full, cin)
    x_flat = jnp.pad(x_flat, ((0, m_pad + hb - m_full), (0, 0)))

    # Row-validity mask (real strided output positions) — BN statistics only.
    h_valid = (jnp.arange(hp) % s == 0) & (jnp.arange(hp) < ho * s)
    w_valid = (jnp.arange(wp) % s == 0) & (jnp.arange(wp) < wo * s)
    mask = (h_valid[:, None] & w_valid[None, :]).astype(jnp.float32)
    mask = jnp.broadcast_to(mask[None], (n, hp, wp)).reshape(m_full)
    mask = jnp.pad(mask, (0, m_pad - m_full))
    counts = mask.reshape(num_tiles, tm).sum(axis=1)        # per-tile valid rows
    mask = mask.reshape(m_pad, 1)

    # Weight as an im2col matrix; only this tiny tensor is lane-padded in HBM.
    w_mat = jnp.transpose(weight_oihw, (2, 3, 1, 0)).reshape(kk * cin, cout)
    w_mat = jnp.pad(w_mat, ((0, 0), (0, cpad - cout))).astype(compute_dtype)

    cparams = pltpu.CompilerParams(
        dimension_semantics=("parallel",),
        vmem_limit_bytes=vmem_limit,
    )
    scratch = [pltpu.VMEM((tm + hb, cin), jnp.float32),     # main + halo slab
               pltpu.VMEM((tm, kk * cin), compute_dtype)]   # im2col patch tile
    x_spec = pl.BlockSpec((tm, cin), lambda i: (i, 0))
    halo_spec = pl.BlockSpec((hb, cin), lambda i: ((i + 1) * (tm // hb), 0))
    w_spec = pl.BlockSpec((kk * cin, cpad), lambda i: (0, 0))

    # --- pass 1: stats only (no conv output ever round-trips through HBM) ---
    stats = pl.pallas_call(
        functools.partial(_conv_stats_kernel, cin=cin, offsets=offsets),
        out_shape=jax.ShapeDtypeStruct((num_tiles * 8, cpad), jnp.float32),
        grid=(num_tiles,),
        in_specs=[x_spec, halo_spec, w_spec,
                  pl.BlockSpec((tm, 1), lambda i: (i, 0))],
        out_specs=pl.BlockSpec((8, cpad), lambda i: (i, 0)),
        scratch_shapes=scratch,
        compiler_params=cparams,
    )(x_flat, x_flat, w_mat, mask)

    # --- finalize BN statistics (Chan's parallel combine, tiny per-channel) ---
    stats = stats.reshape(num_tiles, 8, cpad)
    sums, m2s = stats[:, 0, :], stats[:, 1, :]
    m_valid = float(n * ho * wo)
    mean = jnp.sum(sums, axis=0) / m_valid
    tile_mean = sums / jnp.maximum(counts, 1.0)[:, None]
    m2 = jnp.sum(m2s, axis=0) + jnp.sum(
        counts[:, None] * (tile_mean - mean[None, :]) ** 2, axis=0)
    var = jnp.maximum(m2 / m_valid, 0.0)                    # biased (train-mode)
    gamma_pad = jnp.pad(gamma.astype(jnp.float32).reshape(-1), (0, cpad - cout))
    beta_pad = jnp.pad(beta.astype(jnp.float32).reshape(-1), (0, cpad - cout))
    scale = gamma_pad * jax.lax.rsqrt(var + eps)
    shift = beta_pad - mean * scale

    # --- pass 2: recompute conv, fuse BN affine + ReLU, store unpadded Cout ---
    out_flat = pl.pallas_call(
        functools.partial(_conv_bn_relu_kernel, cin=cin, offsets=offsets),
        out_shape=jax.ShapeDtypeStruct((m_pad, cout), jnp.float32),
        grid=(num_tiles,),
        in_specs=[x_spec, halo_spec, w_spec,
                  pl.BlockSpec((1, cpad), lambda i: (0, 0)),
                  pl.BlockSpec((1, cpad), lambda i: (0, 0))],
        out_specs=pl.BlockSpec((tm, cout), lambda i: (i, 0)),
        scratch_shapes=scratch,
        compiler_params=cparams,
    )(x_flat, x_flat, w_mat, scale.reshape(1, cpad), shift.reshape(1, cpad))

    # Crop to the valid (strided) output positions and return NCHW (module
    # semantics); consumers that accept NHWC can skip the final transpose.
    out = out_flat[:m_full].reshape(n, hp, wp, cout)
    out = out[:, 0:(ho - 1) * s + 1:s, 0:(wo - 1) * s + 1:s, :]
    return jnp.transpose(out, (0, 3, 1, 2))


# ----------------------------- reference ------------------------------------


def _reference_forward(x_nchw, weight_oihw, gamma, beta, *,
                       n_kern=3, n_stride=1, n_pad=1, pad_mode="constant",
                       eps=1e-5, compute_dtype=jnp.float32):
    """Pure-JAX reference with the same conv compute dtype (f32 accumulation)."""
    x = jnp.transpose(x_nchw, (0, 2, 3, 1)).astype(jnp.float32)
    if n_pad > 0:
        mode = "constant" if pad_mode == "constant" else "reflect"
        x = jnp.pad(x, ((0, 0), (n_pad, n_pad), (n_pad, n_pad), (0, 0)), mode=mode)
    w_hwio = jnp.transpose(weight_oihw, (2, 3, 1, 0)).astype(jnp.float32)
    y = jax.lax.conv_general_dilated(
        x.astype(compute_dtype), w_hwio.astype(compute_dtype),
        window_strides=(n_stride, n_stride), padding="VALID",
        dimension_numbers=("NHWC", "HWIO", "NHWC"),
        preferred_element_type=jnp.float32,
        precision=jax.lax.Precision.HIGHEST)
    mean = jnp.mean(y, axis=(0, 1, 2), keepdims=True)
    var = jnp.mean((y - mean) ** 2, axis=(0, 1, 2), keepdims=True)
    y = (y - mean) * jax.lax.rsqrt(var + eps)
    y = y * gamma.reshape(1, 1, 1, -1) + beta.reshape(1, 1, 1, -1)
    y = jnp.maximum(y, 0.0)
    return jnp.transpose(y, (0, 3, 1, 2))


# ----------------------------- demo / check ---------------------------------


if __name__ == "__main__":
    # Module config: Conv3x3(n_in=4, n_out=8, n_kern=3, n_stride=1, n_pad=1,
    #                        use_bn=True, pad_mode='constant')
    N, C_IN, H, W = 2, 4, 16, 16
    C_OUT, K, STRIDE, PAD = 8, 3, 1, 1

    key = jax.random.PRNGKey(0)
    kx, kw = jax.random.split(key)

    x = jax.random.normal(kx, (N, C_IN, H, W), dtype=jnp.float32)

    # Conv2d default init: kaiming_uniform(a=sqrt(5)) -> U(-1/sqrt(fan_in), +)
    fan_in = C_IN * K * K
    bound = 1.0 / (fan_in ** 0.5)
    weight = jax.random.uniform(kw, (C_OUT, C_IN, K, K),
                                minval=-bound, maxval=bound, dtype=jnp.float32)
    # BatchNorm2d affine init: weight=1, bias=0
    gamma = jnp.ones((C_OUT,), jnp.float32)
    beta = jnp.zeros((C_OUT,), jnp.float32)

    # (1) f32 compute path: exact semantics of the f32 PyTorch module.
    out_f32 = conv3x3_forward(x, weight, gamma, beta,
                              n_kern=K, n_stride=STRIDE, n_pad=PAD,
                              pad_mode="constant", compute_dtype=jnp.float32)
    out_f32 = jax.block_until_ready(out_f32)
    ref_f32 = _reference_forward(x, weight, gamma, beta,
                                 n_kern=K, n_stride=STRIDE, n_pad=PAD,
                                 compute_dtype=jnp.float32)
    assert out_f32.shape == (N, C_OUT, H, W)
    assert jnp.allclose(out_f32, ref_f32, atol=1e-4, rtol=1e-4), "f32 mismatch"

    # (2) default bf16 MXU path (bf16 operands, f32 accumulation + f32 BN/ReLU),
    #     compared against a reference that feeds the conv the same bf16 inputs.
    out_bf16 = conv3x3_forward(x, weight, gamma, beta,
                               n_kern=K, n_stride=STRIDE, n_pad=PAD,
                               pad_mode="constant", compute_dtype=jnp.bfloat16)
    out_bf16 = jax.block_until_ready(out_bf16)
    ref_bf16 = _reference_forward(x, weight, gamma, beta,
                                  n_kern=K, n_stride=STRIDE, n_pad=PAD,
                                  compute_dtype=jnp.bfloat16)
    assert jnp.allclose(out_bf16, ref_bf16, atol=1e-3, rtol=1e-3), "bf16 mismatch"

    print("KERNEL_OK")
</pallas_src>

<mosaic_0001>
module attributes {stable_mosaic.version = 11 : i64} {
  func.func @_conv_stats_kernel(%arg0: i32, %arg1: memref<384x4xf32, #tpu.memory_space<vmem>>, %arg2: memref<64x4xf32, #tpu.memory_space<vmem>>, %arg3: memref<36x128xf32, #tpu.memory_space<vmem>>, %arg4: memref<384x1xf32, #tpu.memory_space<vmem>>, %arg5: memref<8x128xf32, #tpu.memory_space<vmem>>, %arg6: memref<448x4xf32, #tpu.memory_space<vmem>>, %arg7: memref<384x36xf32, #tpu.memory_space<vmem>>) attributes {dimension_semantics = [#tpu.dimension_semantics<parallel>], iteration_bounds = array<i64: 2>, scalar_prefetch = 0 : i64, scratch_operands = 2 : i64, tpu.core_type = #tpu.core_type<tc>, window_params = [{transform_indices = @transform_0, window_bounds = array<i64: 384, 4>}, {transform_indices = @transform_1, window_bounds = array<i64: 64, 4>}, {pipeline_mode = #tpu.pipeline_mode<synchronous>, transform_indices = @transform_2, window_bounds = array<i64: 36, 128>}, {transform_indices = @transform_3, window_bounds = array<i64: 384, 1>}, {transform_indices = @transform_4, window_bounds = array<i64: 8, 128>}]} {
    %c0 = arith.constant 0 : index
    %c0_0 = arith.constant 0 : index
    %0 = vector.load %arg1[%c0, %c0_0] : memref<384x4xf32, #tpu.memory_space<vmem>>, vector<384x4xf32>
    %c0_1 = arith.constant 0 : index
    %c0_2 = arith.constant 0 : index
    %1 = vector.load %arg6[%c0_1, %c0_2] : memref<448x4xf32, #tpu.memory_space<vmem>>, vector<384x4xf32>
    tpu.vector_store %arg6[%c0_1, %c0_2], %0 {strides = array<i32>} : memref<448x4xf32, #tpu.memory_space<vmem>>, vector<384x4xf32>,
    %c0_3 = arith.constant 0 : index
    %c0_4 = arith.constant 0 : index
    %2 = vector.load %arg2[%c0_3, %c0_4] : memref<64x4xf32, #tpu.memory_space<vmem>>, vector<64x4xf32>
    %c384 = arith.constant 384 : index
    %c0_5 = arith.constant 0 : index
    %3 = vector.load %arg6[%c384, %c0_5] : memref<448x4xf32, #tpu.memory_space<vmem>>, vector<64x4xf32>
    tpu.vector_store %arg6[%c384, %c0_5], %2 {strides = array<i32>} : memref<448x4xf32, #tpu.memory_space<vmem>>, vector<64x4xf32>,
    %c0_6 = arith.constant 0 : index
    %c0_7 = arith.constant 0 : index
    %4 = vector.load %arg6[%c0_6, %c0_7] : memref<448x4xf32, #tpu.memory_space<vmem>>, vector<384x4xf32>
    %c0_8 = arith.constant 0 : index
    %c0_9 = arith.constant 0 : index
    %5 = vector.load %arg7[%c0_8, %c0_9] : memref<384x36xf32, #tpu.memory_space<vmem>>, vector<384x4xf32>
    tpu.vector_store %arg7[%c0_8, %c0_9], %4 {strides = array<i32>} : memref<384x36xf32, #tpu.memory_space<vmem>>, vector<384x4xf32>,
    %c1 = arith.constant 1 : index
    %c0_10 = arith.constant 0 : index
    %6 = vector.load %arg6[%c1, %c0_10] : memref<448x4xf32, #tpu.memory_space<vmem>>, vector<384x4xf32>
    %c0_11 = arith.constant 0 : index
    %c4 = arith.constant 4 : index
    %7 = vector.load %arg7[%c0_11, %c4] : memref<384x36xf32, #tpu.memory_space<vmem>>, vector<384x4xf32>
    tpu.vector_store %arg7[%c0_11, %c4], %6 {strides = array<i32>} : memref<384x36xf32, #tpu.memory_space<vmem>>, vector<384x4xf32>,
    %c2 = arith.constant 2 : index
    %c0_12 = arith.constant 0 : index
    %8 = vector.load %arg6[%c2, %c0_12] : memref<448x4xf32, #tpu.memory_space<vmem>>, vector<384x4xf32>
    %c0_13 = arith.constant 0 : index
    %c8 = arith.constant 8 : index
    %9 = vector.load %arg7[%c0_13, %c8] : memref<384x36xf32, #tpu.memory_space<vmem>>, vector<384x4xf32>
    tpu.vector_store %arg7[%c0_13, %c8], %8 {strides = array<i32>} : memref<384x36xf32, #tpu.memory_space<vmem>>, vector<384x4xf32>,
    %c18 = arith.constant 18 : index
    %c0_14 = arith.constant 0 : index
    %10 = vector.load %arg6[%c18, %c0_14] : memref<448x4xf32, #tpu.memory_space<vmem>>, vector<384x4xf32>
    %c0_15 = arith.constant 0 : index
    %c12 = arith.constant 12 : index
    %11 = vector.load %arg7[%c0_15, %c12] : memref<384x36xf32, #tpu.memory_space<vmem>>, vector<384x4xf32>
    tpu.vector_store %arg7[%c0_15, %c12], %10 {strides = array<i32>} : memref<384x36xf32, #tpu.memory_space<vmem>>, vector<384x4xf32>,
    %c19 = arith.constant 19 : index
    %c0_16 = arith.constant 0 : index
    %12 = vector.load %arg6[%c19, %c0_16] : memref<448x4xf32, #tpu.memory_space<vmem>>, vector<384x4xf32>
    %c0_17 = arith.constant 0 : index
    %c16 = arith.constant 16 : index
    %13 = vector.load %arg7[%c0_17, %c16] : memref<384x36xf32, #tpu.memory_space<vmem>>, vector<384x4xf32>
    tpu.vector_store %arg7[%c0_17, %c16], %12 {strides = array<i32>} : memref<384x36xf32, #tpu.memory_space<vmem>>, vector<384x4xf32>,
    %c20 = arith.constant 20 : index
    %c0_18 = arith.constant 0 : index
    %14 = vector.load %arg6[%c20, %c0_18] : memref<448x4xf32, #tpu.memory_space<vmem>>, vector<384x4xf32>
    %c0_19 = arith.constant 0 : index
    %c20_20 = arith.constant 20 : index
    %15 = vector.load %arg7[%c0_19, %c20_20] : memref<384x36xf32, #tpu.memory_space<vmem>>, vector<384x4xf32>
    tpu.vector_store %arg7[%c0_19, %c20_20], %14 {strides = array<i32>} : memref<384x36xf32, #tpu.memory_space<vmem>>, vector<384x4xf32>,
    %c36 = arith.constant 36 : index
    %c0_21 = arith.constant 0 : index
    %16 = vector.load %arg6[%c36, %c0_21] : memref<448x4xf32, #tpu.memory_space<vmem>>, vector<384x4xf32>
    %c0_22 = arith.constant 0 : index
    %c24 = arith.constant 24 : index
    %17 = vector.load %arg7[%c0_22, %c24] : memref<384x36xf32, #tpu.memory_space<vmem>>, vector<384x4xf32>
    tpu.vector_store %arg7[%c0_22, %c24], %16 {strides = array<i32>} : memref<384x36xf32, #tpu.memory_space<vmem>>, vector<384x4xf32>,
    %c37 = arith.constant 37 : index
    %c0_23 = arith.constant 0 : index
    %18 = vector.load %arg6[%c37, %c0_23] : memref<448x4xf32, #tpu.memory_space<vmem>>, vector<384x4xf32>
    %c0_24 = arith.constant 0 : index
    %c28 = arith.constant 28 : index
    %19 = vector.load %arg7[%c0_24, %c28] : memref<384x36xf32, #tpu.memory_space<vmem>>, vector<384x4xf32>
    tpu.vector_store %arg7[%c0_24, %c28], %18 {strides = array<i32>} : memref<384x36xf32, #tpu.memory_space<vmem>>, vector<384x4xf32>,
    %c38 = arith.constant 38 : index
    %c0_25 = arith.constant 0 : index
    %20 = vector.load %arg6[%c38, %c0_25] : memref<448x4xf32, #tpu.memory_space<vmem>>, vector<384x4xf32>
    %c0_26 = arith.constant 0 : index
    %c32 = arith.constant 32 : index
    %21 = vector.load %arg7[%c0_26, %c32] : memref<384x36xf32, #tpu.memory_space<vmem>>, vector<384x4xf32>
    tpu.vector_store %arg7[%c0_26, %c32], %20 {strides = array<i32>} : memref<384x36xf32, #tpu.memory_space<vmem>>, vector<384x4xf32>,
    %c0_27 = arith.constant 0 : index
    %c0_28 = arith.constant 0 : index
    %22 = vector.load %arg7[%c0_27, %c0_28] : memref<384x36xf32, #tpu.memory_space<vmem>>, vector<384x36xf32>
    %c0_29 = arith.constant 0 : index
    %c0_30 = arith.constant 0 : index
    %23 = vector.load %arg3[%c0_29, %c0_30] : memref<36x128xf32, #tpu.memory_space<vmem>>, vector<36x128xf32>
    %cst = arith.constant dense<0.000000e+00> : vector<384x128xf32>
    %24 = tpu.matmul %22, %23, %cst {dimension_numbers = #tpu.dot_dimension_numbers<[1], [0], [0], [1], [0, 0, 1, 1], [], []>} : vector<384x36xf32>, vector<36x128xf32>, vector<384x128xf32> -> vector<384x128xf32>
    %c0_31 = arith.constant 0 : index
    %c0_32 = arith.constant 0 : index
    %25 = vector.load %arg4[%c0_31, %c0_32] : memref<384x1xf32, #tpu.memory_space<vmem>>, vector<384x1xf32>
    %26 = vector.shape_cast %25 : vector<384x1xf32> to vector<1x384x1xf32>
    %cst_33 = arith.constant dense<0.000000e+00> : vector<1xf32>
    %27 = vector.multi_reduction <add>, %26, %cst_33 [1, 2] : vector<1x384x1xf32> to vector<1xf32>
    %28 = vector.shape_cast %27 : vector<1xf32> to vector<1x1x1xf32>
    %29 = vector.extract %28[0, 0, 0] : f32 from vector<1x1x1xf32>
    %cst_34 = arith.constant 1.000000e+00 : f32
    %30 = arith.maximumf %29, %cst_34 : f32
    %31 = vector.broadcast %25 : vector<384x1xf32> to vector<384x128xf32>
    %32 = arith.mulf %24, %31 : vector<384x128xf32>
    %cst_35 = arith.constant dense<0.000000e+00> : vector<128xf32>
    %33 = vector.multi_reduction <add>, %32, %cst_35 [0] : vector<384x128xf32> to vector<128xf32>
    %34 = vector.shape_cast %33 : vector<128xf32> to vector<1x128xf32>
    %35 = vector.broadcast %30 : f32 to vector<1x128xf32>
    %36 = arith.divf %34, %35 : vector<1x128xf32>
    %37 = vector.broadcast %36 : vector<1x128xf32> to vector<384x128xf32>
    %38 = arith.subf %24, %37 : vector<384x128xf32>
    %39 = vector.broadcast %25 : vector<384x1xf32> to vector<384x128xf32>
    %40 = arith.mulf %38, %39 : vector<384x128xf32>
    %c0_36 = arith.constant 0 : index
    %c0_37 = arith.constant 0 : index
    %41 = vector.load %arg5[%c0_36, %c0_37] : memref<8x128xf32, #tpu.memory_space<vmem>>, vector<1x128xf32>
    tpu.vector_store %arg5[%c0_36, %c0_37], %34 {strides = array<i32>} : memref<8x128xf32, #tpu.memory_space<vmem>>, vector<1x128xf32>,
    %42 = arith.mulf %40, %40 : vector<384x128xf32>
    %cst_38 = arith.constant dense<0.000000e+00> : vector<128xf32>
    %43 = vector.multi_reduction <add>, %42, %cst_38 [0] : vector<384x128xf32> to vector<128xf32>
    %44 = vector.shape_cast %43 : vector<128xf32> to vector<1x128xf32>
    %c1_39 = arith.constant 1 : index
    %c0_40 = arith.constant 0 : index
    %45 = vector.load %arg5[%c1_39, %c0_40] : memref<8x128xf32, #tpu.memory_space<vmem>>, vector<1x128xf32>
    tpu.vector_store %arg5[%c1_39, %c0_40], %44 {strides = array<i32>} : memref<8x128xf32, #tpu.memory_space<vmem>>, vector<1x128xf32>,
    return
  }
  func.func @transform_0(%arg0: i32) -> (i32, i32) {
    %c0_i32 = arith.constant 0 : i32
    %c0_i32_0 = arith.constant 0 : i32
    return %arg0, %c0_i32 : i32, i32
  }
  func.func @transform_1(%arg0: i32) -> (i32, i32) {
    %c1_i32 = arith.constant 1 : i32
    %0 = arith.addi %arg0, %c1_i32 : i32
    %c6_i32 = arith.constant 6 : i32
    %1 = arith.muli %0, %c6_i32 : i32
    %c0_i32 = arith.constant 0 : i32
    %c0_i32_0 = arith.constant 0 : i32
    return %1, %c0_i32 : i32, i32
  }
  func.func @transform_2(%arg0: i32) -> (i32, i32) {
    %c0_i32 = arith.constant 0 : i32
    %c0_i32_0 = arith.constant 0 : i32
    %c0_i32_1 = arith.constant 0 : i32
    return %c0_i32, %c0_i32_0 : i32, i32
  }
  func.func @transform_3(%arg0: i32) -> (i32, i32) {
    %c0_i32 = arith.constant 0 : i32
    %c0_i32_0 = arith.constant 0 : i32
    return %arg0, %c0_i32 : i32, i32
  }
  func.func @transform_4(%arg0: i32) -> (i32, i32) {
    %c0_i32 = arith.constant 0 : i32
    %c0_i32_0 = arith.constant 0 : i32
    return %arg0, %c0_i32 : i32, i32
  }
}

</mosaic_0001>

<bundles_post_ra>
// kernel: tpu_custom_call.1
= control target key start
LH: loop header
LB: loop body
LE: loop exit
PB: predicated region body
PF: predicated region fallthrough
CT: control target
= control target key end

     0   :  { %9 = vsyncpa [#allocation5], 0  ;;  %s6743_s0 = inlined_call_operand.vmem [shape: f32[832,4], index: 0, kind: input, shape index: {}]   ;;  %s6744_s1 = inlined_call_operand.vmem [shape: f32[832,4], index: 1, kind: input, shape index: {}]   ;;  %s6745_s2 = inlined_call_operand.vmem [shape: f32[36,128], index: 2, kind: input, shape index: {}]   ;;  %s6746_s3 = inlined_call_operand.vmem [shape: f32[768,1], index: 3, kind: input, shape index: {}]   ;;  %s6747_s4 = inlined_call_operand.hbm [shape: f32[16,128], index: 4, kind: output, shape index: {}]  }
   0x1   :  { %11 = vsyncpa [#allocation5 + $0x1], 0  ;;  %s4466_s15 = smov 0   ;;  %s4468_s16 = smov 0  }
   0x2   :  { %s4470_s17 = smov 0   ;;  %s4472_s18 = smov 0  }
   0x3 LB: > { %s4487_s19 = sadd.s32 4294967295, %s4428_s18   ;;  %s4098_s20 = sadd.s32 4294967294, %s4428_s18   ;;  %s4428_s18 = sphi %s4472_s18, %s6943_s18   ;;  %s4424_s17 = sphi %s4470_s17, %s6942_s17   ;;  %s4420_s16 = sphi %s4468_s16, %s6941_s16   ;;  %s4416_s15 = sphi %s4466_s15, %s6940_s15  }
   0x4   : > { %s4491_s21 = sadd.s32 1, %s4428_s18   ;;  %s127_s22 = sadd.s32 1, %s4424_s17 }
   0x5   : > { %s124_s23 = ssub.s32 %s4428_s18, %s4491_s21  ;;  %p137_p0 = scmp.ne.s32.totalorder %s4424_s17, %s4420_s16 }
   0x6   : > { %p125_p1 = scmp.eq.s32.totalorder %s124_s23, 0  ;;  %p138_p2 = scmp.eq.s32.totalorder %s4487_s19, 1 }
   0x7   : > { %p143_p3 = scmp.ne.s32.totalorder %s4420_s16, %s4416_s15  ;;  %p144_p4 = scmp.eq.s32.totalorder %s4098_s20, 1 }
   0x8   : > { %s4502_s24 = scalar_select %p125_p1, %s4424_s17, %s127_s22  }
   0x9   : > { %p4504_p5 = por %p138_p2, %p137_p0  ;;  %p4508_p6 = por %p144_p4, %p143_p3 }
   0xa   : > { %p4101_p7 = scmp.ge.s32.totalorder %s4428_s18, 1  ;;  %p204_p8 = scmp.lt.s32.totalorder %s4428_s18, 3 }
   0xc   : > { %p205_p9 = pnand %p4101_p7, %p204_p8 }
   0xe   : > { %208 = sbr.rel (%p205_p9) target bundleno = 1291 (0x50b), region = 36 }
  0x15   : > { %s4515_s27 = smul.u32 48, %s4487_s19  ;;  %vm324_vm0 = vcmask 31744   ;;  %s260_s7 = sadd.s32 1, %s4487_s19  ;;  %vm725_vm1 = vcmask 64544   ;;  %vm1014_vm2 = vcmask 97344   ;;  %vm1303_vm3 = vcmask 130144  }
  0x16   : > { %s4104_s8 = smul.u32 48, %s260_s7  ;;  %s4430_s9 = smov 4   ;;  %vm1592_vm4 = vcmask 162944   ;;  %vm2995_vm5 = vcmask 1043456   ;;  %vm1881_vm6 = vcmask 195744   ;;  %vm2170_vm7 = vcmask 228544  }
  0x17   : > { %p251_p10 = scmp.lt.s32.totalorder %s4515_s27, 103  ;;  %s4431_s14 = smov 8   ;;  %vm2459_vm8 = vcmask 261344   ;;  %vm2748_vm9 = vcmask 294144   ;;  %vm2850_vm10 = vcmask 293888   ;;  %vm3352_vm11 = vcmask 7168  }
  0x18   : > { %p263_p11 = scmp.lt.s32.totalorder %s4104_s8, 103  ;;  %s4432_s20 = smov 12  }
  0x19   : > { %s252_s28 = scalar_select %p251_p10, %s4515_s27, 103 }
  0x1a   : > { %s6945_s8 = smov (!%p263_p11, %s4104_s8), 103  ;;  %s4433_s22 = smov 16  }
  0x1b   : > { %s4103_s29 = sshll.u32 %s252_s28, 3  ;;  %s4105_s10 = sshll.u32 %s6945_s8, 3 }
  0x1c   : > { %s4522_s6 = scalar_lea.vmem %s6743_s0, %s4103_s29  ;;  %s4617_s13 = scalar_lea.vmem %s6744_s1, %s4105_s10 }
  0x1d   : > { %v278_v0 = vld [vmem:[%s4522_s6 + $0x10] sm:$0xff]  ;;  %v279_v1 = vld [vmem:[%s4522_s6 + $0x18] sm:$0xff]  ;;  %v276_v2 = vld [vmem:[%s4522_s6] sm:$0xff]  ;;  %s4434_s23 = smov 20   ;;  %p271_p12 = scmp.lt.s32.totalorder %s4515_s27, 95 }
  0x1e   : > { %327 = vst.msk [vmem:[#allocation2 + $0x10] sm:$0xff] %vm324_vm0, %v278_v0  ;;  %328 = vst.msk [vmem:[#allocation2 + $0x18] sm:$0xff] %vm324_vm0, %v279_v1  ;;  %v277_v3 = vld [vmem:[%s4522_s6 + $0x8] sm:$0xff]  ;;  %v280_v4 = vld [vmem:[%s4522_s6 + $0x20] sm:$0xff]  ;;  %s4439_s29 = smov 1.0   ;;  %s243_s5 = sand.u32 1, %s4420_s16  }
  0x1f   : > { %325 = vst.msk [vmem:[#allocation2] sm:$0xff] %vm324_vm0, %v276_v2  ;;  %v281_v5 = vld [vmem:[%s4522_s6 + $0x28] sm:$0xff]  ;;  %326 = vst.msk [vmem:[#allocation2 + $0x8] sm:$0xff] %vm324_vm0, %v277_v3  ;;  %v282_v6 = vld [vmem:[%s4522_s6 + $0x30] sm:$0xff]  ;;  %s6947_s27 = smov (!%p271_p12, %s4515_s27), 95  ;;  %s4157_s8 = sshll.u32 %s4487_s19, 7 }
  0x20   : > { %329 = vst.msk [vmem:[#allocation2 + $0x20] sm:$0xff] %vm324_vm0, %v280_v4  ;;  %330 = vst.msk [vmem:[#allocation2 + $0x28] sm:$0xff] %vm324_vm0, %v281_v5  ;;  %v283_v7 = vld [vmem:[%s4522_s6 + $0x38] sm:$0xff]  ;;  %v284_v8 = vld [vmem:[%s4522_s6 + $0x40] sm:$0xff]  ;;  %s6698_s12 = scalar_lea.hbm %s6747_s4, %s4157_s8  ;;  %s4440_s19 = smov [#allocation4]  }
  0x21   : > { %331 = vst.msk [vmem:[#allocation2 + $0x30] sm:$0xff] %vm324_vm0, %v282_v6  ;;  %332 = vst.msk [vmem:[#allocation2 + $0x38] sm:$0xff] %vm324_vm0, %v283_v7  ;;  %v285_v9 = vld [vmem:[%s4522_s6 + $0x48] sm:$0xff]  ;;  %v286_v10 = vld [vmem:[%s4522_s6 + $0x50] sm:$0xff] }
  0x22   : > { %333 = vst.msk [vmem:[#allocation2 + $0x40] sm:$0xff] %vm324_vm0, %v284_v8  ;;  %v287_v11 = vld [vmem:[%s4522_s6 + $0x58] sm:$0xff]  ;;  %334 = vst.msk [vmem:[#allocation2 + $0x48] sm:$0xff] %vm324_vm0, %v285_v9  ;;  %v288_v12 = vld [vmem:[%s4522_s6 + $0x60] sm:$0xff] }
  0x23   : > { %335 = vst.msk [vmem:[#allocation2 + $0x50] sm:$0xff] %vm324_vm0, %v286_v10  ;;  %336 = vst.msk [vmem:[#allocation2 + $0x58] sm:$0xff] %vm324_vm0, %v287_v11  ;;  %v289_v13 = vld [vmem:[%s4522_s6 + $0x68] sm:$0xff]  ;;  %v290_v14 = vld [vmem:[%s4522_s6 + $0x70] sm:$0xff] }
  0x24   : > { %337 = vst.msk [vmem:[#allocation2 + $0x60] sm:$0xff] %vm324_vm0, %v288_v12  ;;  %338 = vst.msk [vmem:[#allocation2 + $0x68] sm:$0xff] %vm324_vm0, %v289_v13  ;;  %v291_v15 = vld [vmem:[%s4522_s6 + $0x78] sm:$0xff]  ;;  %v292_v16 = vld [vmem:[%s4522_s6 + $0x80] sm:$0xff] }
  0x25   : > { %339 = vst.msk [vmem:[#allocation2 + $0x70] sm:$0xff] %vm324_vm0, %v290_v14  ;;  %v293_v17 = vld [vmem:[%s4522_s6 + $0x88] sm:$0xff]  ;;  %340 = vst.msk [vmem:[#allocation2 + $0x78] sm:$0xff] %vm324_vm0, %v291_v15  ;;  %v294_v18 = vld [vmem:[%s4522_s6 + $0x90] sm:$0xff] }
  0x26   : > { %341 = vst.msk [vmem:[#allocation2 + $0x80] sm:$0xff] %vm324_vm0, %v292_v16  ;;  %342 = vst.msk [vmem:[#allocation2 + $0x88] sm:$0xff] %vm324_vm0, %v293_v17  ;;  %v295_v19 = vld [vmem:[%s4522_s6 + $0x98] sm:$0xff]  ;;  %v296_v20 = vld [vmem:[%s4522_s6 + $0xa0] sm:$0xff] }
  0x27   : > { %343 = vst.msk [vmem:[#allocation2 + $0x90] sm:$0xff] %vm324_vm0, %v294_v18  ;;  %344 = vst.msk [vmem:[#allocation2 + $0x98] sm:$0xff] %vm324_vm0, %v295_v19  ;;  %v297_v21 = vld [vmem:[%s4522_s6 + $0xa8] sm:$0xff]  ;;  %v298_v22 = vld [vmem:[%s4522_s6 + $0xb0] sm:$0xff] }
  0x28   : > { %345 = vst.msk [vmem:[#allocation2 + $0xa0] sm:$0xff] %vm324_vm0, %v296_v20  ;;  %v299_v23 = vld [vmem:[%s4522_s6 + $0xb8] sm:$0xff]  ;;  %346 = vst.msk [vmem:[#allocation2 + $0xa8] sm:$0xff] %vm324_vm0, %v297_v21  ;;  %v300_v25 = vld [vmem:[%s4522_s6 + $0xc0] sm:$0xff] }
  0x29   : > { %v487_v24 = vld [vmem:[#allocation2 + $0x11] sm:$0xff]  ;;  %347 = vst.msk [vmem:[#allocation2 + $0xb0] sm:$0xff] %vm324_vm0, %v298_v22  ;;  %348 = vst.msk [vmem:[#allocation2 + $0xb8] sm:$0xff] %vm324_vm0, %v299_v23  ;;  %v301_v26 = vld [vmem:[%s4522_s6 + $0xc8] sm:$0xff] }
  0x2a   : > { %585 = vrot.lane.b32.xlu1 %v487_v24, %s4430_s9  ;;  %v485_v27 = vld [vmem:[#allocation2 + $0x1] sm:$0xff]  ;;  %349 = vst.msk [vmem:[#allocation2 + $0xc0] sm:$0xff] %vm324_vm0, %v300_v25  ;;  %350 = vst.msk [vmem:[#allocation2 + $0xc8] sm:$0xff] %vm324_vm0, %v301_v26  ;;  %v488_v28 = vld [vmem:[#allocation2 + $0x19] sm:$0xff] }
  0x2b   : > { %581 = vrot.lane.b32.xlu0 %v485_v27, %s4430_s9  ;;  %v486_v29 = vld [vmem:[#allocation2 + $0x9] sm:$0xff]  ;;  %v489_v31 = vld [vmem:[#allocation2 + $0x21] sm:$0xff]  ;;  %v492_v32 = vld [vmem:[#allocation2 + $0x39] sm:$0xff] }
  0x2c   : > { %v490_v30 = vld [vmem:[#allocation2 + $0x29] sm:$0xff]  ;;  %v491_v34 = vld [vmem:[#allocation2 + $0x31] sm:$0xff]  ;;  %v304_v36 = vld [vmem:[%s4522_s6 + $0xe0] sm:$0xff] }
  0x2d   : > { %v302_v33 = vld [vmem:[%s4522_s6 + $0xd0] sm:$0xff]  ;;  %v303_v35 = vld [vmem:[%s4522_s6 + $0xd8] sm:$0xff]  ;;  %353 = vst.msk [vmem:[#allocation2 + $0xe0] sm:$0xff] %vm324_vm0, %v304_v36  ;;  %v305_v37 = vld [vmem:[%s4522_s6 + $0xe8] sm:$0xff] }
  0x2e   : > { %587 = vrot.lane.b32.xlu1 %v488_v28, %s4430_s9  ;;  %351 = vst.msk [vmem:[#allocation2 + $0xd0] sm:$0xff] %vm324_vm0, %v302_v33  ;;  %352 = vst.msk [vmem:[#allocation2 + $0xd8] sm:$0xff] %vm324_vm0, %v303_v35  ;;  %v306_v38 = vld [vmem:[%s4522_s6 + $0xf0] sm:$0xff]  ;;  %v307_v39 = vld [vmem:[%s4522_s6 + $0xf8] sm:$0xff] }
  0x2f   : > { %583 = vrot.lane.b32.xlu0 %v486_v29, %s4430_s9  ;;  %354 = vst.msk [vmem:[#allocation2 + $0xe8] sm:$0xff] %vm324_vm0, %v305_v37  ;;  %355 = vst.msk [vmem:[#allocation2 + $0xf0] sm:$0xff] %vm324_vm0, %v306_v38  ;;  %v308_v40 = vld [vmem:[%s4522_s6 + $0x100] sm:$0xff]  ;;  %v309_v41 = vld [vmem:[%s4522_s6 + $0x108] sm:$0xff] }
  0x30   : > { %356 = vst.msk [vmem:[#allocation2 + $0xf8] sm:$0xff] %vm324_vm0, %v307_v39  ;;  %v310_v42 = vld [vmem:[%s4522_s6 + $0x110] sm:$0xff]  ;;  %357 = vst.msk [vmem:[#allocation2 + $0x100] sm:$0xff] %vm324_vm0, %v308_v40  ;;  %v311_v44 = vld [vmem:[%s4522_s6 + $0x118] sm:$0xff] }
  0x31   : > { %v494_v43 = vld [vmem:[#allocation2 + $0x49] sm:$0xff]  ;;  %358 = vst.msk [vmem:[#allocation2 + $0x108] sm:$0xff] %vm324_vm0, %v309_v41  ;;  %359 = vst.msk [vmem:[#allocation2 + $0x110] sm:$0xff] %vm324_vm0, %v310_v42  ;;  %v312_v45 = vld [vmem:[%s4522_s6 + $0x120] sm:$0xff] }
  0x32   : > { %591 = vrot.lane.b32.xlu1 %v490_v30, %s4430_s9  ;;  %v313_v46 = vld [vmem:[%s4522_s6 + $0x128] sm:$0xff]  ;;  %360 = vst.msk [vmem:[#allocation2 + $0x118] sm:$0xff] %vm324_vm0, %v311_v44  ;;  %361 = vst.msk [vmem:[#allocation2 + $0x120] sm:$0xff] %vm324_vm0, %v312_v45  ;;  %v314_v48 = vld [vmem:[%s4522_s6 + $0x130] sm:$0xff] }
  0x33   : > { %589 = vrot.lane.b32.xlu0 %v489_v31, %s4430_s9  ;;  %v493_v47 = vld [vmem:[#allocation2 + $0x41] sm:$0xff]  ;;  %362 = vst.msk [vmem:[#allocation2 + $0x128] sm:$0xff] %vm324_vm0, %v313_v46  ;;  %v315_v49 = vld [vmem:[%s4522_s6 + $0x138] sm:$0xff]  ;;  %363 = vst.msk [vmem:[#allocation2 + $0x130] sm:$0xff] %vm324_vm0, %v314_v48 }
  0x34   : > { %v316_v50 = vld [vmem:[%s4522_s6 + $0x140] sm:$0xff]  ;;  %364 = vst.msk [vmem:[#allocation2 + $0x138] sm:$0xff] %vm324_vm0, %v315_v49  ;;  %v317_v51 = vld [vmem:[%s4522_s6 + $0x148] sm:$0xff]  ;;  %v318_v52 = vld [vmem:[%s4522_s6 + $0x150] sm:$0xff] }
  0x35   : > { %365 = vst.msk [vmem:[#allocation2 + $0x140] sm:$0xff] %vm324_vm0, %v316_v50  ;;  %v319_v53 = vld [vmem:[%s4522_s6 + $0x158] sm:$0xff]  ;;  %366 = vst.msk [vmem:[#allocation2 + $0x148] sm:$0xff] %vm324_vm0, %v317_v51  ;;  %v320_v54 = vld [vmem:[%s4522_s6 + $0x160] sm:$0xff] }
  0x36   : > { %595 = vrot.lane.b32.xlu1 %v492_v32, %s4430_s9  ;;  %367 = vst.msk [vmem:[#allocation2 + $0x150] sm:$0xff] %vm324_vm0, %v318_v52  ;;  %368 = vst.msk [vmem:[#allocation2 + $0x158] sm:$0xff] %vm324_vm0, %v319_v53  ;;  %v321_v55 = vld [vmem:[%s4522_s6 + $0x168] sm:$0xff]  ;;  %v322_v56 = vld [vmem:[%s4522_s6 + $0x170] sm:$0xff] }
  0x37   : > { %593 = vrot.lane.b32.xlu0 %v491_v34, %s4430_s9  ;;  %369 = vst.msk [vmem:[#allocation2 + $0x160] sm:$0xff] %vm324_vm0, %v320_v54  ;;  %370 = vst.msk [vmem:[#allocation2 + $0x168] sm:$0xff] %vm324_vm0, %v321_v55  ;;  %v323_v57 = vld [vmem:[%s4522_s6 + $0x178] sm:$0xff]  ;;  %v373_v58 = vld [vmem:[%s4617_s13] sm:$0xff]  ;;  %s4435_s6 = smov 24  }
  0x38   : > { %371 = vst.msk [vmem:[#allocation2 + $0x170] sm:$0xff] %vm324_vm0, %v322_v56  ;;  %372 = vst.msk [vmem:[#allocation2 + $0x178] sm:$0xff] %vm324_vm0, %v323_v57  ;;  %v496_v59 = vld [vmem:[#allocation2 + $0x59] sm:$0xff]  ;;  %v495_v60 = vld [vmem:[#allocation2 + $0x51] sm:$0xff] }
  0x39   : > { %381 = vst.msk [vmem:[#allocation2 + $0x180] sm:$0xff] %vm324_vm0, %v373_v58  ;;  %v498_v61 = vld [vmem:[#allocation2 + $0x69] sm:$0xff]  ;;  %v497_v62 = vld [vmem:[#allocation2 + $0x61] sm:$0xff]  ;;  %v500_v63 = vld [vmem:[#allocation2 + $0x79] sm:$0xff] }
  0x3a   : > { %599 = vrot.lane.b32.xlu1 %v494_v43, %s4430_s9  ;;  %v499_v0 = vld [vmem:[#allocation2 + $0x71] sm:$0xff]  ;;  %v389_v1 = vld [vmem:[#allocation2] sm:$0xff]  ;;  %v502_v3 = vld [vmem:[#allocation2 + $0x89] sm:$0xff] }
  0x3b   : > { %597 = vrot.lane.b32.xlu0 %v493_v47, %s4430_s9  ;;  %437 = vst.msk [vmem:[#allocation3] sm:$0xff] %vm324_vm0, %v389_v1  ;;  %v391_v2 = vld [vmem:[#allocation2 + $0x10] sm:$0xff]  ;;  %v390_v4 = vld [vmem:[#allocation2 + $0x8] sm:$0xff]  ;;  %v392_v5 = vld [vmem:[#allocation2 + $0x18] sm:$0xff] }
  0x3c   : > { %439 = vst.msk [vmem:[#allocation3 + $0x10] sm:$0xff] %vm324_vm0, %v391_v2  ;;  %v501_v6 = vld [vmem:[#allocation2 + $0x81] sm:$0xff]  ;;  %438 = vst.msk [vmem:[#allocation3 + $0x8] sm:$0xff] %vm324_vm0, %v390_v4  ;;  %v395_v9 = vld [vmem:[#allocation2 + $0x30] sm:$0xff] }
  0x3d   : > { %440 = vst.msk [vmem:[#allocation3 + $0x18] sm:$0xff] %vm324_vm0, %v392_v5  ;;  %v393_v7 = vld [vmem:[#allocation2 + $0x20] sm:$0xff]  ;;  %v394_v8 = vld [vmem:[#allocation2 + $0x28] sm:$0xff]  ;;  %443 = vst.msk [vmem:[#allocation3 + $0x30] sm:$0xff] %vm324_vm0, %v395_v9 }
  0x3e   : > { %603 = vrot.lane.b32.xlu1 %v496_v59, %s4430_s9  ;;  %441 = vst.msk [vmem:[#allocation3 + $0x20] sm:$0xff] %vm324_vm0, %v393_v7  ;;  %442 = vst.msk [vmem:[#allocation3 + $0x28] sm:$0xff] %vm324_vm0, %v394_v8  ;;  %v396_v10 = vld [vmem:[#allocation2 + $0x38] sm:$0xff]  ;;  %v397_v12 = vld [vmem:[#allocation2 + $0x40] sm:$0xff] }
  0x3f   : > { %601 = vrot.lane.b32.xlu0 %v495_v60, %s4430_s9  ;;  %v504_v11 = vld [vmem:[#allocation2 + $0x99] sm:$0xff]  ;;  %444 = vst.msk [vmem:[#allocation3 + $0x38] sm:$0xff] %vm324_vm0, %v396_v10  ;;  %v398_v13 = vld [vmem:[#allocation2 + $0x48] sm:$0xff]  ;;  %v503_v14 = vld [vmem:[#allocation2 + $0x91] sm:$0xff] }
  0x40   : > { %445 = vst.msk [vmem:[#allocation3 + $0x40] sm:$0xff] %vm324_vm0, %v397_v12  ;;  %446 = vst.msk [vmem:[#allocation3 + $0x48] sm:$0xff] %vm324_vm0, %v398_v13  ;;  %v399_v15 = vld [vmem:[#allocation2 + $0x50] sm:$0xff]  ;;  %v400_v16 = vld [vmem:[#allocation2 + $0x58] sm:$0xff] }
  0x41   : > { %447 = vst.msk [vmem:[#allocation3 + $0x50] sm:$0xff] %vm324_vm0, %v399_v15  ;;  %448 = vst.msk [vmem:[#allocation3 + $0x58] sm:$0xff] %vm324_vm0, %v400_v16  ;;  %v401_v17 = vld [vmem:[#allocation2 + $0x60] sm:$0xff]  ;;  %v402_v18 = vld [vmem:[#allocation2 + $0x68] sm:$0xff] }
  0x42   : > { %607 = vrot.lane.b32.xlu1 %v498_v61, %s4430_s9  ;;  %449 = vst.msk [vmem:[#allocation3 + $0x60] sm:$0xff] %vm324_vm0, %v401_v17  ;;  %v506_v19 = vld [vmem:[#allocation2 + $0xa9] sm:$0xff]  ;;  %450 = vst.msk [vmem:[#allocation3 + $0x68] sm:$0xff] %vm324_vm0, %v402_v18  ;;  %v404_v21 = vld [vmem:[#allocation2 + $0x78] sm:$0xff] }
  0x43   : > { %605 = vrot.lane.b32.xlu0 %v497_v62, %s4430_s9  ;;  %v403_v20 = vld [vmem:[#allocation2 + $0x70] sm:$0xff]  ;;  %v505_v22 = vld [vmem:[#allocation2 + $0xa1] sm:$0xff]  ;;  %452 = vst.msk [vmem:[#allocation3 + $0x78] sm:$0xff] %vm324_vm0, %v404_v21  ;;  %v408_v26 = vld [vmem:[#allocation2 + $0x98] sm:$0xff] }
  0x44   : > { %451 = vst.msk [vmem:[#allocation3 + $0x70] sm:$0xff] %vm324_vm0, %v403_v20  ;;  %v405_v23 = vld [vmem:[#allocation2 + $0x80] sm:$0xff]  ;;  %v406_v24 = vld [vmem:[#allocation2 + $0x88] sm:$0xff]  ;;  %v407_v25 = vld [vmem:[#allocation2 + $0x90] sm:$0xff] }
  0x45   : > { %453 = vst.msk [vmem:[#allocation3 + $0x80] sm:$0xff] %vm324_vm0, %v405_v23  ;;  %454 = vst.msk [vmem:[#allocation3 + $0x88] sm:$0xff] %vm324_vm0, %v406_v24  ;;  %v508_v27 = vld [vmem:[#allocation2 + $0xb9] sm:$0xff]  ;;  %v410_v29 = vld [vmem:[#allocation2 + $0xa8] sm:$0xff] }
  0x46   : > { %611 = vrot.lane.b32.xlu1 %v500_v63, %s4430_s9  ;;  %455 = vst.msk [vmem:[#allocation3 + $0x90] sm:$0xff] %vm324_vm0, %v407_v25  ;;  %456 = vst.msk [vmem:[#allocation3 + $0x98] sm:$0xff] %vm324_vm0, %v408_v26  ;;  %v409_v28 = vld [vmem:[#allocation2 + $0xa0] sm:$0xff]  ;;  %v507_v30 = vld [vmem:[#allocation2 + $0xb1] sm:$0xff] }
  0x47   : > { %609 = vrot.lane.b32.xlu0 %v499_v0, %s4430_s9  ;;  %457 = vst.msk [vmem:[#allocation3 + $0xa0] sm:$0xff] %vm324_vm0, %v409_v28  ;;  %458 = vst.msk [vmem:[#allocation3 + $0xa8] sm:$0xff] %vm324_vm0, %v410_v29  ;;  %v411_v31 = vld [vmem:[#allocation2 + $0xb0] sm:$0xff]  ;;  %v412_v32 = vld [vmem:[#allocation2 + $0xb8] sm:$0xff] }
  0x48   : > { %459 = vst.msk [vmem:[#allocation3 + $0xb0] sm:$0xff] %vm324_vm0, %v411_v31  ;;  %460 = vst.msk [vmem:[#allocation3 + $0xb8] sm:$0xff] %vm324_vm0, %v412_v32  ;;  %v413_v33 = vld [vmem:[#allocation2 + $0xc0] sm:$0xff]  ;;  %v414_v34 = vld [vmem:[#allocation2 + $0xc8] sm:$0xff] }
  0x49   : > { %461 = vst.msk [vmem:[#allocation3 + $0xc0] sm:$0xff] %vm324_vm0, %v413_v33  ;;  %v510_v35 = vld [vmem:[#allocation2 + $0xc9] sm:$0xff]  ;;  %462 = vst.msk [vmem:[#allocation3 + $0xc8] sm:$0xff] %vm324_vm0, %v414_v34  ;;  %v416_v37 = vld [vmem:[#allocation2 + $0xd8] sm:$0xff] }
  0x4a   : > { %615 = vrot.lane.b32.xlu1 %v502_v3, %s4430_s9  ;;  %v415_v36 = vld [vmem:[#allocation2 + $0xd0] sm:$0xff]  ;;  %v509_v38 = vld [vmem:[#allocation2 + $0xc1] sm:$0xff]  ;;  %464 = vst.msk [vmem:[#allocation3 + $0xd8] sm:$0xff] %vm324_vm0, %v416_v37  ;;  %v420_v42 = vld [vmem:[#allocation2 + $0xf8] sm:$0xff] }
  0x4b   : > { %613 = vrot.lane.b32.xlu0 %v501_v6, %s4430_s9  ;;  %463 = vst.msk [vmem:[#allocation3 + $0xd0] sm:$0xff] %vm324_vm0, %v415_v36  ;;  %v417_v39 = vld [vmem:[#allocation2 + $0xe0] sm:$0xff]  ;;  %v418_v40 = vld [vmem:[#allocation2 + $0xe8] sm:$0xff]  ;;  %v419_v41 = vld [vmem:[#allocation2 + $0xf0] sm:$0xff] }
  0x4c   : > { %465 = vst.msk [vmem:[#allocation3 + $0xe0] sm:$0xff] %vm324_vm0, %v417_v39  ;;  %466 = vst.msk [vmem:[#allocation3 + $0xe8] sm:$0xff] %vm324_vm0, %v418_v40  ;;  %v512_v43 = vld [vmem:[#allocation2 + $0xd9] sm:$0xff]  ;;  %v511_v45 = vld [vmem:[#allocation2 + $0xd1] sm:$0xff] }
  0x4d   : > { %467 = vst.msk [vmem:[#allocation3 + $0xf0] sm:$0xff] %vm324_vm0, %v419_v41  ;;  %468 = vst.msk [vmem:[#allocation3 + $0xf8] sm:$0xff] %vm324_vm0, %v420_v42  ;;  %v421_v44 = vld [vmem:[#allocation2 + $0x100] sm:$0xff]  ;;  %v422_v46 = vld [vmem:[#allocation2 + $0x108] sm:$0xff] }
  0x4e   : > { %619 = vrot.lane.b32.xlu1 %v504_v11, %s4430_s9  ;;  %469 = vst.msk [vmem:[#allocation3 + $0x100] sm:$0xff] %vm324_vm0, %v421_v44  ;;  %470 = vst.msk [vmem:[#allocation3 + $0x108] sm:$0xff] %vm324_vm0, %v422_v46  ;;  %v514_v47 = vld [vmem:[#allocation2 + $0xe9] sm:$0xff]  ;;  %v513_v49 = vld [vmem:[#allocation2 + $0xe1] sm:$0xff] }
  0x4f   : > { %617 = vrot.lane.b32.xlu0 %v503_v14, %s4430_s9  ;;  %v423_v48 = vld [vmem:[#allocation2 + $0x110] sm:$0xff]  ;;  %v424_v50 = vld [vmem:[#allocation2 + $0x118] sm:$0xff]  ;;  %v425_v52 = vld [vmem:[#allocation2 + $0x120] sm:$0xff] }
  0x50   : > { %471 = vst.msk [vmem:[#allocation3 + $0x110] sm:$0xff] %vm324_vm0, %v423_v48  ;;  %472 = vst.msk [vmem:[#allocation3 + $0x118] sm:$0xff] %vm324_vm0, %v424_v50  ;;  %v516_v51 = vld [vmem:[#allocation2 + $0xf9] sm:$0xff]  ;;  %v515_v53 = vld [vmem:[#allocation2 + $0xf1] sm:$0xff] }
  0x51   : > { %473 = vst.msk [vmem:[#allocation3 + $0x120] sm:$0xff] %vm324_vm0, %v425_v52  ;;  %v426_v54 = vld [vmem:[#allocation2 + $0x128] sm:$0xff]  ;;  %v427_v56 = vld [vmem:[#allocation2 + $0x130] sm:$0xff]  ;;  %v428_v58 = vld [vmem:[#allocation2 + $0x138] sm:$0xff] }
  0x52   : > { %623 = vrot.lane.b32.xlu1 %v506_v19, %s4430_s9  ;;  %474 = vst.msk [vmem:[#allocation3 + $0x128] sm:$0xff] %vm324_vm0, %v426_v54  ;;  %v518_v55 = vld [vmem:[#allocation2 + $0x109] sm:$0xff]  ;;  %v517_v57 = vld [vmem:[#allocation2 + $0x101] sm:$0xff]  ;;  %475 = vst.msk [vmem:[#allocation3 + $0x130] sm:$0xff] %vm324_vm0, %v427_v56 }
  0x53   : > { %621 = vrot.lane.b32.xlu0 %v505_v22, %s4430_s9  ;;  %476 = vst.msk [vmem:[#allocation3 + $0x138] sm:$0xff] %vm324_vm0, %v428_v58  ;;  %v520_v59 = vld [vmem:[#allocation2 + $0x119] sm:$0xff]  ;;  %v519_v61 = vld [vmem:[#allocation2 + $0x111] sm:$0xff]  ;;  %v430_v62 = vld [vmem:[#allocation2 + $0x148] sm:$0xff] }
  0x54   : > { %v429_v60 = vld [vmem:[#allocation2 + $0x140] sm:$0xff]  ;;  %478 = vst.msk [vmem:[#allocation3 + $0x148] sm:$0xff] %vm324_vm0, %v430_v62  ;;  %v522_v63 = vld [vmem:[#allocation2 + $0x129] sm:$0xff]  ;;  %v432_v2 = vld [vmem:[#allocation2 + $0x158] sm:$0xff] }
  0x55   : > { %477 = vst.msk [vmem:[#allocation3 + $0x140] sm:$0xff] %vm324_vm0, %v429_v60  ;;  %v431_v0 = vld [vmem:[#allocation2 + $0x150] sm:$0xff]  ;;  %v521_v1 = vld [vmem:[#allocation2 + $0x121] sm:$0xff]  ;;  %480 = vst.msk [vmem:[#allocation3 + $0x158] sm:$0xff] %vm324_vm0, %v432_v2 }
  0x56   : > { %627 = vrot.lane.b32.xlu1 %v508_v27, %s4430_s9  ;;  %479 = vst.msk [vmem:[#allocation3 + $0x150] sm:$0xff] %vm324_vm0, %v431_v0  ;;  %v524_v3 = vld [vmem:[#allocation2 + $0x139] sm:$0xff]  ;;  %v523_v5 = vld [vmem:[#allocation2 + $0x131] sm:$0xff]  ;;  %v434_v6 = vld [vmem:[#allocation2 + $0x168] sm:$0xff] }
  0x57   : > { %625 = vrot.lane.b32.xlu0 %v507_v30, %s4430_s9  ;;  %v433_v4 = vld [vmem:[#allocation2 + $0x160] sm:$0xff]  ;;  %482 = vst.msk [vmem:[#allocation3 + $0x168] sm:$0xff] %vm324_vm0, %v434_v6  ;;  %v526_v7 = vld [vmem:[#allocation2 + $0x149] sm:$0xff]  ;;  %v436_v10 = vld [vmem:[#allocation2 + $0x178] sm:$0xff] }
  0x58   : > { %481 = vst.msk [vmem:[#allocation3 + $0x160] sm:$0xff] %vm324_vm0, %v433_v4  ;;  %v435_v8 = vld [vmem:[#allocation2 + $0x170] sm:$0xff]  ;;  %v525_v9 = vld [vmem:[#allocation2 + $0x141] sm:$0xff]  ;;  %484 = vst.msk [vmem:[#allocation3 + $0x178] sm:$0xff] %vm324_vm0, %v436_v10 }
  0x59   : > { %483 = vst.msk [vmem:[#allocation3 + $0x170] sm:$0xff] %vm324_vm0, %v435_v8  ;;  %v528_v11 = vld [vmem:[#allocation2 + $0x159] sm:$0xff]  ;;  %v527_v12 = vld [vmem:[#allocation2 + $0x151] sm:$0xff]  ;;  %v530_v13 = vld [vmem:[#allocation2 + $0x169] sm:$0xff] }
  0x5a   : > { %631 = vrot.lane.b32.xlu1 %v510_v35, %s4430_s9  ;;  %v529_v14 = vld [vmem:[#allocation2 + $0x161] sm:$0xff]  ;;  %v532_v15 = vld [vmem:[#allocation2 + $0x179] sm:$0xff]  ;;  %v531_v16 = vld [vmem:[#allocation2 + $0x171] sm:$0xff] }
  0x5b   : > { %629 = vrot.lane.b32.xlu0 %v509_v38, %s4430_s9  ;;  %v775_v17 = vld [vmem:[#allocation2 + $0xa] sm:$0xff]  ;;  %v774_v18 = vld [vmem:[#allocation2 + $0x2] sm:$0xff]  ;;  %v4729_v19 = vld [vmem:[#allocation2 + $0x1a] sm:$0xff] }
  0x5c   : > { %v4731_v20 = vld [vmem:[#allocation2 + $0x12] sm:$0xff]  ;;  %v4737_v21 = vld [vmem:[#allocation2 + $0x2a] sm:$0xff]  ;;  %v4739_v22 = vld [vmem:[#allocation2 + $0x22] sm:$0xff] }
  0x5d   : > { %v4745_v23 = vld [vmem:[#allocation2 + $0x3a] sm:$0xff]  ;;  %v4747_v24 = vld [vmem:[#allocation2 + $0x32] sm:$0xff]  ;;  %v4753_v25 = vld [vmem:[#allocation2 + $0x4a] sm:$0xff] }
  0x5e   : > { %635 = vrot.lane.b32.xlu1 %v512_v43, %s4430_s9  ;;  %v4755_v26 = vld [vmem:[#allocation2 + $0x42] sm:$0xff]  ;;  %v4761_v27 = vld [vmem:[#allocation2 + $0x5a] sm:$0xff]  ;;  %v4763_v29 = vld [vmem:[#allocation2 + $0x52] sm:$0xff] }
  0x5f   : > { %633 = vrot.lane.b32.xlu0 %v511_v45, %s4430_s9  ;;  %v4771_v31 = vld [vmem:[#allocation2 + $0x6a] sm:$0xff]  ;;  %v4773_v33 = vld [vmem:[#allocation2 + $0x62] sm:$0xff]  ;;  %v4781_v35 = vld [vmem:[#allocation2 + $0x7a] sm:$0xff] }
  0x60   : > { %v4783_v37 = vld [vmem:[#allocation2 + $0x72] sm:$0xff]  ;;  %v4791_v39 = vld [vmem:[#allocation2 + $0x8a] sm:$0xff]  ;;  %v4793_v41 = vld [vmem:[#allocation2 + $0x82] sm:$0xff] }
  0x61   : > { %v4801_v43 = vld [vmem:[#allocation2 + $0x9a] sm:$0xff]  ;;  %v4803_v45 = vld [vmem:[#allocation2 + $0x92] sm:$0xff] }
  0x62   : > { %639 = vrot.lane.b32.xlu1 %v514_v47, %s4430_s9  ;;  %v4811_v47 = vld [vmem:[#allocation2 + $0xaa] sm:$0xff] }
  0x63   : > { %637 = vrot.lane.b32.xlu0 %v513_v49, %s4430_s9  ;;  %v4813_v49 = vld [vmem:[#allocation2 + $0xa2] sm:$0xff]  ;;  %v375_v0 = vld [vmem:[%s4617_s13 + $0x10] sm:$0xff] }
  0x64   : > { %383 = vst.msk [vmem:[#allocation2 + $0x190] sm:$0xff] %vm324_vm0, %v375_v0 }
  0x66   : > { %643 = vrot.lane.b32.xlu1 %v516_v51, %s4430_s9  ;;  %v4821_v51 = vld [vmem:[#allocation2 + $0xba] sm:$0xff] }
  0x67   : > { %641 = vrot.lane.b32.xlu0 %v515_v53, %s4430_s9  ;;  %v4823_v53 = vld [vmem:[#allocation2 + $0xb2] sm:$0xff] }
  0x6a   : > { %647 = vrot.lane.b32.xlu1 %v518_v55, %s4430_s9  ;;  %v4831_v55 = vld [vmem:[#allocation2 + $0xca] sm:$0xff] }
  0x6b   : > { %645 = vrot.lane.b32.xlu0 %v517_v57, %s4430_s9  ;;  %v4833_v57 = vld [vmem:[#allocation2 + $0xc2] sm:$0xff] }
  0x6e   : > { %651 = vrot.lane.b32.xlu1 %v520_v59, %s4430_s9  ;;  %v4841_v59 = vld [vmem:[#allocation2 + $0xda] sm:$0xff] }
  0x6f   : > { %649 = vrot.lane.b32.xlu0 %v519_v61, %s4430_s9  ;;  %v4843_v61 = vld [vmem:[#allocation2 + $0xd2] sm:$0xff] }
  0x72   : > { %655 = vrot.lane.b32.xlu1 %v522_v63, %s4430_s9  ;;  %v374_v63 = vld [vmem:[%s4617_s13 + $0x8] sm:$0xff] }
  0x73   : > { %653 = vrot.lane.b32.xlu0 %v521_v1, %s4430_s9  ;;  %v4853_v1 = vld [vmem:[#allocation2 + $0xea] sm:$0xff]  ;;  %382 = vst.msk [vmem:[#allocation2 + $0x188] sm:$0xff] %vm324_vm0, %v374_v63  ;;  %v4945_v63 = vld [vmem:[#allocation2 + $0x17a] sm:$0xff] }
  0x76   : > { %659 = vrot.lane.b32.xlu1 %v524_v3, %s4430_s9  ;;  %v4857_v3 = vld [vmem:[#allocation2 + $0xe2] sm:$0xff] }
  0x77   : > { %657 = vrot.lane.b32.xlu0 %v523_v5, %s4430_s9  ;;  %v4865_v5 = vld [vmem:[#allocation2 + $0xfa] sm:$0xff] }
  0x7a   : > { %663 = vrot.lane.b32.xlu1 %v526_v7, %s4430_s9  ;;  %v4867_v7 = vld [vmem:[#allocation2 + $0xf2] sm:$0xff] }
  0x7b   : > { %661 = vrot.lane.b32.xlu0 %v525_v9, %s4430_s9  ;;  %v4875_v9 = vld [vmem:[#allocation2 + $0x10a] sm:$0xff] }
  0x7e   : > { %667 = vrot.lane.b32.xlu1 %v528_v11, %s4430_s9  ;;  %v4877_v11 = vld [vmem:[#allocation2 + $0x102] sm:$0xff] }
  0x7f   : > { %665 = vrot.lane.b32.xlu0 %v527_v12, %s4430_s9 }
  0x82   : > { %671 = vrot.lane.b32.xlu1 %v530_v13, %s4430_s9  ;;  %v4885_v13 = vld [vmem:[#allocation2 + $0x11a] sm:$0xff] }
  0x83   : > { %669 = vrot.lane.b32.xlu0 %v529_v14, %s4430_s9 }
  0x86   : > { %675 = vrot.lane.b32.xlu1 %v532_v15, %s4430_s9  ;;  %v4887_v15 = vld [vmem:[#allocation2 + $0x112] sm:$0xff] }
  0x87   : > { %673 = vrot.lane.b32.xlu0 %v531_v16, %s4430_s9 }
  0x8a   : > { %872 = vrot.lane.b32.xlu1 %v775_v17, %s4431_s14  ;;  %v4895_v17 = vld [vmem:[#allocation2 + $0x12a] sm:$0xff] }
  0x8b   : > { %870 = vrot.lane.b32.xlu0 %v774_v18, %s4431_s14 }
  0x8e   : > { %876 = vrot.lane.b32.xlu1 %v4729_v19, %s4431_s14 }
  0x8f   : > { %874 = vrot.lane.b32.xlu0 %v4731_v20, %s4431_s14 }
  0x92   : > { %880 = vrot.lane.b32.xlu1 %v4737_v21, %s4431_s14 }
  0x93   : > { %878 = vrot.lane.b32.xlu0 %v4739_v22, %s4431_s14 }
  0x96   : > { %884 = vrot.lane.b32.xlu1 %v4745_v23, %s4431_s14 }
  0x97   : > { %882 = vrot.lane.b32.xlu0 %v4747_v24, %s4431_s14 }
  0x9a   : > { %888 = vrot.lane.b32.xlu1 %v4753_v25, %s4431_s14 }
  0x9b   : > { %886 = vrot.lane.b32.xlu0 %v4755_v26, %s4431_s14 }
  0x9c   : > { %v586_v28 = vpop.permute.xlu1 %585 }
  0x9d   : > { %v582_v30 = vpop.permute.xlu0 %581  ;;  %728 = vst.msk [vmem:[#allocation3 + $0x10] sm:$0xff] %vm725_vm1, %v586_v28  ;;  %v4897_v28 = vld [vmem:[#allocation2 + $0x122] sm:$0xff] }
  0x9e   : > { %726 = vst.msk [vmem:[#allocation3] sm:$0xff] %vm725_vm1, %v582_v30  ;;  %892 = vrot.lane.b32.xlu1 %v4761_v27, %s4431_s14 }
  0x9f   : > { %890 = vrot.lane.b32.xlu0 %v4763_v29, %s4431_s14 }
  0xa0   : > { %v588_v32 = vpop.permute.xlu1 %587 }
  0xa1   : > { %v584_v34 = vpop.permute.xlu0 %583  ;;  %729 = vst.msk [vmem:[#allocation3 + $0x18] sm:$0xff] %vm725_vm1, %v588_v32  ;;  %v4905_v32 = vld [vmem:[#allocation2 + $0x13a] sm:$0xff] }
  0xa2   : > { %727 = vst.msk [vmem:[#allocation3 + $0x8] sm:$0xff] %vm725_vm1, %v584_v34  ;;  %896 = vrot.lane.b32.xlu1 %v4771_v31, %s4431_s14 }
  0xa3   : > { %894 = vrot.lane.b32.xlu0 %v4773_v33, %s4431_s14 }
  0xa4   : > { %v592_v36 = vpop.permute.xlu1 %591 }
  0xa5   : > { %v590_v38 = vpop.permute.xlu0 %589  ;;  %731 = vst.msk [vmem:[#allocation3 + $0x28] sm:$0xff] %vm725_vm1, %v592_v36  ;;  %v4907_v36 = vld [vmem:[#allocation2 + $0x132] sm:$0xff] }
  0xa6   : > { %730 = vst.msk [vmem:[#allocation3 + $0x20] sm:$0xff] %vm725_vm1, %v590_v38  ;;  %900 = vrot.lane.b32.xlu1 %v4781_v35, %s4431_s14 }
  0xa7   : > { %898 = vrot.lane.b32.xlu0 %v4783_v37, %s4431_s14 }
  0xa8   : > { %v596_v40 = vpop.permute.xlu1 %595 }
  0xa9   : > { %v594_v42 = vpop.permute.xlu0 %593  ;;  %733 = vst.msk [vmem:[#allocation3 + $0x38] sm:$0xff] %vm725_vm1, %v596_v40  ;;  %v4915_v40 = vld [vmem:[#allocation2 + $0x14a] sm:$0xff] }
  0xaa   : > { %732 = vst.msk [vmem:[#allocation3 + $0x30] sm:$0xff] %vm725_vm1, %v594_v42  ;;  %904 = vrot.lane.b32.xlu1 %v4791_v39, %s4431_s14 }
  0xab   : > { %902 = vrot.lane.b32.xlu0 %v4793_v41, %s4431_s14 }
  0xac   : > { %v600_v44 = vpop.permute.xlu1 %599 }
  0xad   : > { %v598_v46 = vpop.permute.xlu0 %597  ;;  %735 = vst.msk [vmem:[#allocation3 + $0x48] sm:$0xff] %vm725_vm1, %v600_v44  ;;  %v4917_v44 = vld [vmem:[#allocation2 + $0x142] sm:$0xff] }
  0xae   : > { %734 = vst.msk [vmem:[#allocation3 + $0x40] sm:$0xff] %vm725_vm1, %v598_v46  ;;  %908 = vrot.lane.b32.xlu1 %v4801_v43, %s4431_s14 }
  0xaf   : > { %906 = vrot.lane.b32.xlu0 %v4803_v45, %s4431_s14 }
  0xb0   : > { %v604_v48 = vpop.permute.xlu1 %603 }
  0xb1   : > { %v602_v50 = vpop.permute.xlu0 %601  ;;  %737 = vst.msk [vmem:[#allocation3 + $0x58] sm:$0xff] %vm725_vm1, %v604_v48  ;;  %v4925_v48 = vld [vmem:[#allocation2 + $0x15a] sm:$0xff] }
  0xb2   : > { %736 = vst.msk [vmem:[#allocation3 + $0x50] sm:$0xff] %vm725_vm1, %v602_v50  ;;  %912 = vrot.lane.b32.xlu1 %v4811_v47, %s4431_s14 }
  0xb3   : > { %910 = vrot.lane.b32.xlu0 %v4813_v49, %s4431_s14 }
  0xb4   : > { %v608_v52 = vpop.permute.xlu1 %607 }
  0xb5   : > { %v606_v54 = vpop.permute.xlu0 %605  ;;  %739 = vst.msk [vmem:[#allocation3 + $0x68] sm:$0xff] %vm725_vm1, %v608_v52  ;;  %v4927_v52 = vld [vmem:[#allocation2 + $0x152] sm:$0xff] }
  0xb6   : > { %738 = vst.msk [vmem:[#allocation3 + $0x60] sm:$0xff] %vm725_vm1, %v606_v54  ;;  %916 = vrot.lane.b32.xlu1 %v4821_v51, %s4431_s14 }
  0xb7   : > { %914 = vrot.lane.b32.xlu0 %v4823_v53, %s4431_s14 }
  0xb8   : > { %v612_v56 = vpop.permute.xlu1 %611 }
  0xb9   : > { %v610_v58 = vpop.permute.xlu0 %609  ;;  %741 = vst.msk [vmem:[#allocation3 + $0x78] sm:$0xff] %vm725_vm1, %v612_v56  ;;  %v4935_v56 = vld [vmem:[#allocation2 + $0x16a] sm:$0xff] }
  0xba   : > { %740 = vst.msk [vmem:[#allocation3 + $0x70] sm:$0xff] %vm725_vm1, %v610_v58  ;;  %920 = vrot.lane.b32.xlu1 %v4831_v55, %s4431_s14 }
  0xbb   : > { %918 = vrot.lane.b32.xlu0 %v4833_v57, %s4431_s14 }
  0xbc   : > { %v616_v60 = vpop.permute.xlu1 %615 }
  0xbd   : > { %v614_v62 = vpop.permute.xlu0 %613  ;;  %743 = vst.msk [vmem:[#allocation3 + $0x88] sm:$0xff] %vm725_vm1, %v616_v60  ;;  %v4937_v60 = vld [vmem:[#allocation2 + $0x162] sm:$0xff] }
  0xbe   : > { %742 = vst.msk [vmem:[#allocation3 + $0x80] sm:$0xff] %vm725_vm1, %v614_v62  ;;  %924 = vrot.lane.b32.xlu1 %v4841_v59, %s4431_s14 }
  0xbf   : > { %922 = vrot.lane.b32.xlu0 %v4843_v61, %s4431_s14 }
  0xc0   : > { %v620_v2 = vpop.permute.xlu1 %619 }
  0xc1   : > { %v618_v4 = vpop.permute.xlu0 %617  ;;  %745 = vst.msk [vmem:[#allocation3 + $0x98] sm:$0xff] %vm725_vm1, %v620_v2  ;;  %v4947_v2 = vld [vmem:[#allocation2 + $0x172] sm:$0xff] }
  0xc2   : > { %744 = vst.msk [vmem:[#allocation3 + $0x90] sm:$0xff] %vm725_vm1, %v618_v4  ;;  %928 = vrot.lane.b32.xlu1 %v4853_v1, %s4431_s14 }
  0xc3   : > { %926 = vrot.lane.b32.xlu0 %v4857_v3, %s4431_s14 }
  0xc4   : > { %v624_v6 = vpop.permute.xlu1 %623 }
  0xc5   : > { %v622_v8 = vpop.permute.xlu0 %621  ;;  %747 = vst.msk [vmem:[#allocation3 + $0xa8] sm:$0xff] %vm725_vm1, %v624_v6 }
  0xc6   : > { %746 = vst.msk [vmem:[#allocation3 + $0xa0] sm:$0xff] %vm725_vm1, %v622_v8  ;;  %932 = vrot.lane.b32.xlu1 %v4865_v5, %s4431_s14 }
  0xc7   : > { %930 = vrot.lane.b32.xlu0 %v4867_v7, %s4431_s14 }
  0xc8   : > { %v628_v10 = vpop.permute.xlu1 %627 }
  0xc9   : > { %v626_v12 = vpop.permute.xlu0 %625  ;;  %749 = vst.msk [vmem:[#allocation3 + $0xb8] sm:$0xff] %vm725_vm1, %v628_v10 }
  0xca   : > { %748 = vst.msk [vmem:[#allocation3 + $0xb0] sm:$0xff] %vm725_vm1, %v626_v12  ;;  %936 = vrot.lane.b32.xlu1 %v4875_v9, %s4431_s14 }
  0xcb   : > { %934 = vrot.lane.b32.xlu0 %v4877_v11, %s4431_s14 }
  0xcc   : > { %v632_v14 = vpop.permute.xlu1 %631 }
  0xcd   : > { %v630_v16 = vpop.permute.xlu0 %629  ;;  %751 = vst.msk [vmem:[#allocation3 + $0xc8] sm:$0xff] %vm725_vm1, %v632_v14 }
  0xce   : > { %750 = vst.msk [vmem:[#allocation3 + $0xc0] sm:$0xff] %vm725_vm1, %v630_v16  ;;  %940 = vrot.lane.b32.xlu1 %v4885_v13, %s4431_s14 }
  0xcf   : > { %938 = vrot.lane.b32.xlu0 %v4887_v15, %s4431_s14 }
  0xd0   : > { %v636_v18 = vpop.permute.xlu1 %635 }
  0xd1   : > { %v634_v30 = vpop.permute.xlu0 %633  ;;  %753 = vst.msk [vmem:[#allocation3 + $0xd8] sm:$0xff] %vm725_vm1, %v636_v18 }
  0xd2   : > { %752 = vst.msk [vmem:[#allocation3 + $0xd0] sm:$0xff] %vm725_vm1, %v634_v30  ;;  %944 = vrot.lane.b32.xlu1 %v4895_v17, %s4431_s14 }
  0xd3   : > { %942 = vrot.lane.b32.xlu0 %v4897_v28, %s4431_s14 }
  0xd4   : > { %v640_v34 = vpop.permute.xlu1 %639 }
  0xd5   : > { %v638_v38 = vpop.permute.xlu0 %637  ;;  %755 = vst.msk [vmem:[#allocation3 + $0xe8] sm:$0xff] %vm725_vm1, %v640_v34 }
  0xd6   : > { %754 = vst.msk [vmem:[#allocation3 + $0xe0] sm:$0xff] %vm725_vm1, %v638_v38  ;;  %948 = vrot.lane.b32.xlu1 %v4905_v32, %s4431_s14 }
  0xd7   : > { %946 = vrot.lane.b32.xlu0 %v4907_v36, %s4431_s14 }
  0xd8   : > { %v644_v42 = vpop.permute.xlu1 %643 }
  0xd9   : > { %v642_v46 = vpop.permute.xlu0 %641  ;;  %757 = vst.msk [vmem:[#allocation3 + $0xf8] sm:$0xff] %vm725_vm1, %v644_v42 }
  0xda   : > { %756 = vst.msk [vmem:[#allocation3 + $0xf0] sm:$0xff] %vm725_vm1, %v642_v46  ;;  %952 = vrot.lane.b32.xlu1 %v4915_v40, %s4431_s14 }
  0xdb   : > { %950 = vrot.lane.b32.xlu0 %v4917_v44, %s4431_s14 }
  0xdc   : > { %v648_v50 = vpop.permute.xlu1 %647 }
  0xdd   : > { %v646_v54 = vpop.permute.xlu0 %645  ;;  %759 = vst.msk [vmem:[#allocation3 + $0x108] sm:$0xff] %vm725_vm1, %v648_v50 }
  0xde   : > { %758 = vst.msk [vmem:[#allocation3 + $0x100] sm:$0xff] %vm725_vm1, %v646_v54  ;;  %956 = vrot.lane.b32.xlu1 %v4925_v48, %s4431_s14 }
  0xdf   : > { %954 = vrot.lane.b32.xlu0 %v4927_v52, %s4431_s14 }
  0xe0   : > { %v652_v58 = vpop.permute.xlu1 %651 }
  0xe1   : > { %v650_v62 = vpop.permute.xlu0 %649  ;;  %761 = vst.msk [vmem:[#allocation3 + $0x118] sm:$0xff] %vm725_vm1, %v652_v58 }
  0xe2   : > { %760 = vst.msk [vmem:[#allocation3 + $0x110] sm:$0xff] %vm725_vm1, %v650_v62  ;;  %960 = vrot.lane.b32.xlu1 %v4935_v56, %s4431_s14 }
  0xe3   : > { %958 = vrot.lane.b32.xlu0 %v4937_v60, %s4431_s14 }
  0xe4   : > { %v656_v0 = vpop.permute.xlu1 %655 }
  0xe5   : > { %v654_v4 = vpop.permute.xlu0 %653  ;;  %763 = vst.msk [vmem:[#allocation3 + $0x128] sm:$0xff] %vm725_vm1, %v656_v0 }
  0xe6   : > { %762 = vst.msk [vmem:[#allocation3 + $0x120] sm:$0xff] %vm725_vm1, %v654_v4  ;;  %964 = vrot.lane.b32.xlu1 %v4945_v63, %s4431_s14 }
  0xe7   : > { %962 = vrot.lane.b32.xlu0 %v4947_v2, %s4431_s14  ;;  %s4436_s14 = smov 28  }
  0xe8   : > { %v660_v6 = vpop.permute.xlu1 %659 }
  0xe9   : > { %v658_v8 = vpop.permute.xlu0 %657  ;;  %765 = vst.msk [vmem:[#allocation3 + $0x138] sm:$0xff] %vm725_vm1, %v660_v6  ;;  %v1358_v6 = vld [vmem:[#allocation2 + $0x43] sm:$0xff] }
  0xea   : > { %764 = vst.msk [vmem:[#allocation3 + $0x130] sm:$0xff] %vm725_vm1, %v658_v8  ;;  %1161 = vrot.lane.b32.xlu1 %v4729_v19, %s4432_s20 }
  0xeb   : > { %1159 = vrot.lane.b32.xlu0 %v4731_v20, %s4432_s20 }
  0xec   : > { %v664_v10 = vpop.permute.xlu1 %663 }
  0xed   : > { %v662_v12 = vpop.permute.xlu0 %661  ;;  %767 = vst.msk [vmem:[#allocation3 + $0x148] sm:$0xff] %vm725_vm1, %v664_v10  ;;  %v1361_v10 = vld [vmem:[#allocation2 + $0x5b] sm:$0xff] }
  0xee   : > { %766 = vst.msk [vmem:[#allocation3 + $0x140] sm:$0xff] %vm725_vm1, %v662_v12  ;;  %1165 = vrot.lane.b32.xlu1 %v4737_v21, %s4432_s20 }
  0xef   : > { %1163 = vrot.lane.b32.xlu0 %v4739_v22, %s4432_s20 }
  0xf0   : > { %v668_v14 = vpop.permute.xlu1 %667 }
  0xf1   : > { %v666_v16 = vpop.permute.xlu0 %665  ;;  %769 = vst.msk [vmem:[#allocation3 + $0x158] sm:$0xff] %vm725_vm1, %v668_v14  ;;  %v1360_v14 = vld [vmem:[#allocation2 + $0x53] sm:$0xff] }
  0xf2   : > { %768 = vst.msk [vmem:[#allocation3 + $0x150] sm:$0xff] %vm725_vm1, %v666_v16  ;;  %1169 = vrot.lane.b32.xlu1 %v4745_v23, %s4432_s20 }
  0xf3   : > { %1167 = vrot.lane.b32.xlu0 %v4747_v24, %s4432_s20 }
  0xf4   : > { %v672_v19 = vpop.permute.xlu1 %671 }
  0xf5   : > { %v670_v20 = vpop.permute.xlu0 %669  ;;  %771 = vst.msk [vmem:[#allocation3 + $0x168] sm:$0xff] %vm725_vm1, %v672_v19  ;;  %v1363_v19 = vld [vmem:[#allocation2 + $0x6b] sm:$0xff] }
  0xf6   : > { %770 = vst.msk [vmem:[#allocation3 + $0x160] sm:$0xff] %vm725_vm1, %v670_v20  ;;  %1173 = vrot.lane.b32.xlu1 %v4753_v25, %s4432_s20 }
  0xf7   : > { %1171 = vrot.lane.b32.xlu0 %v4755_v26, %s4432_s20 }
  0xf8   : > { %v676_v21 = vpop.permute.xlu1 %675 }
  0xf9   : > { %v674_v22 = vpop.permute.xlu0 %673  ;;  %773 = vst.msk [vmem:[#allocation3 + $0x178] sm:$0xff] %vm725_vm1, %v676_v21  ;;  %v1362_v21 = vld [vmem:[#allocation2 + $0x63] sm:$0xff] }
  0xfa   : > { %772 = vst.msk [vmem:[#allocation3 + $0x170] sm:$0xff] %vm725_vm1, %v674_v22  ;;  %1177 = vrot.lane.b32.xlu1 %v4761_v27, %s4432_s20 }
  0xfb   : > { %1175 = vrot.lane.b32.xlu0 %v4763_v29, %s4432_s20 }
  0xfc   : > { %v873_v23 = vpop.permute.xlu1 %872 }
  0xfd   : > { %v871_v24 = vpop.permute.xlu0 %870  ;;  %1016 = vst.msk [vmem:[#allocation3 + $0x8] sm:$0xff] %vm1014_vm2, %v873_v23  ;;  %v1365_v23 = vld [vmem:[#allocation2 + $0x7b] sm:$0xff] }
  0xfe   : > { %1015 = vst.msk [vmem:[#allocation3] sm:$0xff] %vm1014_vm2, %v871_v24  ;;  %1181 = vrot.lane.b32.xlu1 %v4771_v31, %s4432_s20 }
  0xff   : > { %1179 = vrot.lane.b32.xlu0 %v4773_v33, %s4432_s20 }
 0x100   : > { %v877_v25 = vpop.permute.xlu1 %876 }
 0x101   : > { %v875_v26 = vpop.permute.xlu0 %874  ;;  %1018 = vst.msk [vmem:[#allocation3 + $0x18] sm:$0xff] %vm1014_vm2, %v877_v25  ;;  %v1364_v25 = vld [vmem:[#allocation2 + $0x73] sm:$0xff] }
 0x102   : > { %1017 = vst.msk [vmem:[#allocation3 + $0x10] sm:$0xff] %vm1014_vm2, %v875_v26  ;;  %1185 = vrot.lane.b32.xlu1 %v4781_v35, %s4432_s20 }
 0x103   : > { %1183 = vrot.lane.b32.xlu0 %v4783_v37, %s4432_s20 }
 0x104   : > { %v881_v27 = vpop.permute.xlu1 %880 }
 0x105   : > { %v879_v29 = vpop.permute.xlu0 %878  ;;  %1020 = vst.msk [vmem:[#allocation3 + $0x28] sm:$0xff] %vm1014_vm2, %v881_v27  ;;  %v1367_v27 = vld [vmem:[#allocation2 + $0x8b] sm:$0xff] }
 0x106   : > { %1019 = vst.msk [vmem:[#allocation3 + $0x20] sm:$0xff] %vm1014_vm2, %v879_v29  ;;  %1189 = vrot.lane.b32.xlu1 %v4791_v39, %s4432_s20 }
 0x107   : > { %1187 = vrot.lane.b32.xlu0 %v4793_v41, %s4432_s20 }
 0x108   : > { %v885_v31 = vpop.permute.xlu1 %884 }
 0x109   : > { %v883_v33 = vpop.permute.xlu0 %882  ;;  %1022 = vst.msk [vmem:[#allocation3 + $0x38] sm:$0xff] %vm1014_vm2, %v885_v31  ;;  %v1366_v31 = vld [vmem:[#allocation2 + $0x83] sm:$0xff] }
 0x10a   : > { %1021 = vst.msk [vmem:[#allocation3 + $0x30] sm:$0xff] %vm1014_vm2, %v883_v33  ;;  %1193 = vrot.lane.b32.xlu1 %v4801_v43, %s4432_s20 }
 0x10b   : > { %1191 = vrot.lane.b32.xlu0 %v4803_v45, %s4432_s20 }
 0x10c   : > { %v889_v35 = vpop.permute.xlu1 %888 }
 0x10d   : > { %v887_v37 = vpop.permute.xlu0 %886  ;;  %1024 = vst.msk [vmem:[#allocation3 + $0x48] sm:$0xff] %vm1014_vm2, %v889_v35  ;;  %v1369_v35 = vld [vmem:[#allocation2 + $0x9b] sm:$0xff] }
 0x10e   : > { %1023 = vst.msk [vmem:[#allocation3 + $0x40] sm:$0xff] %vm1014_vm2, %v887_v37  ;;  %1197 = vrot.lane.b32.xlu1 %v4811_v47, %s4432_s20 }
 0x10f   : > { %1195 = vrot.lane.b32.xlu0 %v4813_v49, %s4432_s20 }
 0x110   : > { %v893_v39 = vpop.permute.xlu1 %892 }
 0x111   : > { %v891_v41 = vpop.permute.xlu0 %890  ;;  %1026 = vst.msk [vmem:[#allocation3 + $0x58] sm:$0xff] %vm1014_vm2, %v893_v39  ;;  %v1368_v39 = vld [vmem:[#allocation2 + $0x93] sm:$0xff] }
 0x112   : > { %1025 = vst.msk [vmem:[#allocation3 + $0x50] sm:$0xff] %vm1014_vm2, %v891_v41  ;;  %1201 = vrot.lane.b32.xlu1 %v4821_v51, %s4432_s20 }
 0x113   : > { %1199 = vrot.lane.b32.xlu0 %v4823_v53, %s4432_s20 }
 0x114   : > { %v897_v43 = vpop.permute.xlu1 %896 }
 0x115   : > { %v895_v45 = vpop.permute.xlu0 %894  ;;  %1028 = vst.msk [vmem:[#allocation3 + $0x68] sm:$0xff] %vm1014_vm2, %v897_v43  ;;  %v1371_v43 = vld [vmem:[#allocation2 + $0xab] sm:$0xff] }
 0x116   : > { %1027 = vst.msk [vmem:[#allocation3 + $0x60] sm:$0xff] %vm1014_vm2, %v895_v45  ;;  %1205 = vrot.lane.b32.xlu1 %v4831_v55, %s4432_s20 }
 0x117   : > { %1203 = vrot.lane.b32.xlu0 %v4833_v57, %s4432_s20 }
 0x118   : > { %v901_v47 = vpop.permute.xlu1 %900 }
 0x119   : > { %v899_v49 = vpop.permute.xlu0 %898  ;;  %1030 = vst.msk [vmem:[#allocation3 + $0x78] sm:$0xff] %vm1014_vm2, %v901_v47  ;;  %v1370_v47 = vld [vmem:[#allocation2 + $0xa3] sm:$0xff] }
 0x11a   : > { %1029 = vst.msk [vmem:[#allocation3 + $0x70] sm:$0xff] %vm1014_vm2, %v899_v49  ;;  %1209 = vrot.lane.b32.xlu1 %v4841_v59, %s4432_s20 }
 0x11b   : > { %1207 = vrot.lane.b32.xlu0 %v4843_v61, %s4432_s20 }
 0x11c   : > { %v905_v51 = vpop.permute.xlu1 %904 }
 0x11d   : > { %v903_v53 = vpop.permute.xlu0 %902  ;;  %1032 = vst.msk [vmem:[#allocation3 + $0x88] sm:$0xff] %vm1014_vm2, %v905_v51  ;;  %v1373_v51 = vld [vmem:[#allocation2 + $0xbb] sm:$0xff] }
 0x11e   : > { %1031 = vst.msk [vmem:[#allocation3 + $0x80] sm:$0xff] %vm1014_vm2, %v903_v53  ;;  %1213 = vrot.lane.b32.xlu1 %v4853_v1, %s4432_s20 }
 0x11f   : > { %1211 = vrot.lane.b32.xlu0 %v4857_v3, %s4432_s20 }
 0x120   : > { %v909_v55 = vpop.permute.xlu1 %908 }
 0x121   : > { %v907_v57 = vpop.permute.xlu0 %906  ;;  %1034 = vst.msk [vmem:[#allocation3 + $0x98] sm:$0xff] %vm1014_vm2, %v909_v55  ;;  %v1372_v55 = vld [vmem:[#allocation2 + $0xb3] sm:$0xff] }
 0x122   : > { %1033 = vst.msk [vmem:[#allocation3 + $0x90] sm:$0xff] %vm1014_vm2, %v907_v57  ;;  %1217 = vrot.lane.b32.xlu1 %v4865_v5, %s4432_s20 }
 0x123   : > { %1215 = vrot.lane.b32.xlu0 %v4867_v7, %s4432_s20 }
 0x124   : > { %v913_v59 = vpop.permute.xlu1 %912 }
 0x125   : > { %v911_v61 = vpop.permute.xlu0 %910  ;;  %1036 = vst.msk [vmem:[#allocation3 + $0xa8] sm:$0xff] %vm1014_vm2, %v913_v59  ;;  %v1375_v59 = vld [vmem:[#allocation2 + $0xcb] sm:$0xff] }
 0x126   : > { %1035 = vst.msk [vmem:[#allocation3 + $0xa0] sm:$0xff] %vm1014_vm2, %v911_v61  ;;  %1221 = vrot.lane.b32.xlu1 %v4875_v9, %s4432_s20 }
 0x127   : > { %1219 = vrot.lane.b32.xlu0 %v4877_v11, %s4432_s20 }
 0x128   : > { %v917_v1 = vpop.permute.xlu1 %916 }
 0x129   : > { %v915_v3 = vpop.permute.xlu0 %914  ;;  %1038 = vst.msk [vmem:[#allocation3 + $0xb8] sm:$0xff] %vm1014_vm2, %v917_v1  ;;  %v1374_v1 = vld [vmem:[#allocation2 + $0xc3] sm:$0xff] }
 0x12a   : > { %1037 = vst.msk [vmem:[#allocation3 + $0xb0] sm:$0xff] %vm1014_vm2, %v915_v3  ;;  %1225 = vrot.lane.b32.xlu1 %v4885_v13, %s4432_s20 }
 0x12b   : > { %1223 = vrot.lane.b32.xlu0 %v4887_v15, %s4432_s20 }
 0x12c   : > { %v921_v5 = vpop.permute.xlu1 %920 }
 0x12d   : > { %v919_v7 = vpop.permute.xlu0 %918  ;;  %1040 = vst.msk [vmem:[#allocation3 + $0xc8] sm:$0xff] %vm1014_vm2, %v921_v5  ;;  %v1377_v5 = vld [vmem:[#allocation2 + $0xdb] sm:$0xff] }
 0x12e   : > { %1039 = vst.msk [vmem:[#allocation3 + $0xc0] sm:$0xff] %vm1014_vm2, %v919_v7  ;;  %1229 = vrot.lane.b32.xlu1 %v4895_v17, %s4432_s20 }
 0x12f   : > { %1227 = vrot.lane.b32.xlu0 %v4897_v28, %s4432_s20 }
 0x130   : > { %v925_v9 = vpop.permute.xlu1 %924 }
 0x131   : > { %v923_v11 = vpop.permute.xlu0 %922  ;;  %1042 = vst.msk [vmem:[#allocation3 + $0xd8] sm:$0xff] %vm1014_vm2, %v925_v9  ;;  %v1376_v9 = vld [vmem:[#allocation2 + $0xd3] sm:$0xff] }
 0x132   : > { %1041 = vst.msk [vmem:[#allocation3 + $0xd0] sm:$0xff] %vm1014_vm2, %v923_v11  ;;  %1233 = vrot.lane.b32.xlu1 %v4905_v32, %s4432_s20 }
 0x133   : > { %1231 = vrot.lane.b32.xlu0 %v4907_v36, %s4432_s20  ;;  %v1110_v36 = vld [vmem:[#allocation2 + $0x18a] sm:$0xff] }
 0x134   : > { %v929_v13 = vpop.permute.xlu1 %928 }
 0x135   : > { %v927_v15 = vpop.permute.xlu0 %926  ;;  %1044 = vst.msk [vmem:[#allocation3 + $0xe8] sm:$0xff] %vm1014_vm2, %v929_v13  ;;  %v1379_v13 = vld [vmem:[#allocation2 + $0xeb] sm:$0xff] }
 0x136   : > { %1043 = vst.msk [vmem:[#allocation3 + $0xe0] sm:$0xff] %vm1014_vm2, %v927_v15  ;;  %1237 = vrot.lane.b32.xlu1 %v4915_v40, %s4432_s20  ;;  %v1109_v40 = vld [vmem:[#allocation2 + $0x182] sm:$0xff] }
 0x137   : > { %1235 = vrot.lane.b32.xlu0 %v4917_v44, %s4432_s20  ;;  %v1353_v44 = vld [vmem:[#allocation2 + $0x1b] sm:$0xff] }
 0x138   : > { %v933_v17 = vpop.permute.xlu1 %932 }
 0x139   : > { %v931_v18 = vpop.permute.xlu0 %930  ;;  %1046 = vst.msk [vmem:[#allocation3 + $0xf8] sm:$0xff] %vm1014_vm2, %v933_v17  ;;  %v1378_v17 = vld [vmem:[#allocation2 + $0xe3] sm:$0xff] }
 0x13a   : > { %1045 = vst.msk [vmem:[#allocation3 + $0xf0] sm:$0xff] %vm1014_vm2, %v931_v18  ;;  %1241 = vrot.lane.b32.xlu1 %v4925_v48, %s4432_s20  ;;  %v1352_v48 = vld [vmem:[#allocation2 + $0x13] sm:$0xff] }
 0x13b   : > { %1239 = vrot.lane.b32.xlu0 %v4927_v52, %s4432_s20  ;;  %v1355_v52 = vld [vmem:[#allocation2 + $0x2b] sm:$0xff] }
 0x13c   : > { %v937_v28 = vpop.permute.xlu1 %936 }
 0x13d   : > { %v935_v30 = vpop.permute.xlu0 %934  ;;  %1048 = vst.msk [vmem:[#allocation3 + $0x108] sm:$0xff] %vm1014_vm2, %v937_v28  ;;  %v1381_v28 = vld [vmem:[#allocation2 + $0xfb] sm:$0xff] }
 0x13e   : > { %1047 = vst.msk [vmem:[#allocation3 + $0x100] sm:$0xff] %vm1014_vm2, %v935_v30  ;;  %1245 = vrot.lane.b32.xlu1 %v4935_v56, %s4432_s20  ;;  %v1354_v56 = vld [vmem:[#allocation2 + $0x23] sm:$0xff] }
 0x13f   : > { %1243 = vrot.lane.b32.xlu0 %v4937_v60, %s4432_s20  ;;  %v1357_v60 = vld [vmem:[#allocation2 + $0x3b] sm:$0xff] }
 0x140   : > { %v941_v32 = vpop.permute.xlu1 %940 }
 0x141   : > { %v939_v34 = vpop.permute.xlu0 %938  ;;  %1050 = vst.msk [vmem:[#allocation3 + $0x118] sm:$0xff] %vm1014_vm2, %v941_v32  ;;  %v1380_v32 = vld [vmem:[#allocation2 + $0xf3] sm:$0xff] }
 0x142   : > { %1049 = vst.msk [vmem:[#allocation3 + $0x110] sm:$0xff] %vm1014_vm2, %v939_v34  ;;  %1249 = vrot.lane.b32.xlu1 %v4945_v63, %s4432_s20  ;;  %v1356_v63 = vld [vmem:[#allocation2 + $0x33] sm:$0xff] }
 0x143   : > { %1247 = vrot.lane.b32.xlu0 %v4947_v2, %s4432_s20  ;;  %v1359_v2 = vld [vmem:[#allocation2 + $0x4b] sm:$0xff] }
 0x144   : > { %v945_v38 = vpop.permute.xlu1 %944 }
 0x145   : > { %v943_v42 = vpop.permute.xlu0 %942  ;;  %1052 = vst.msk [vmem:[#allocation3 + $0x128] sm:$0xff] %vm1014_vm2, %v945_v38 }
 0x146   : > { %1051 = vst.msk [vmem:[#allocation3 + $0x120] sm:$0xff] %vm1014_vm2, %v943_v42  ;;  %1253 = vrot.lane.b32.xlu1 %v1110_v36, %s4432_s20  ;;  %v1383_v36 = vld [vmem:[#allocation2 + $0x10b] sm:$0xff] }
 0x147   : > { %1251 = vrot.lane.b32.xlu0 %v1109_v40, %s4432_s20  ;;  %v1382_v40 = vld [vmem:[#allocation2 + $0x103] sm:$0xff]  ;;  %s4437_s20 = smov 32  }
 0x148   : > { %v949_v46 = vpop.permute.xlu1 %948 }
 0x149   : > { %v947_v50 = vpop.permute.xlu0 %946  ;;  %1054 = vst.msk [vmem:[#allocation3 + $0x138] sm:$0xff] %vm1014_vm2, %v949_v46 }
 0x14a   : > { %1053 = vst.msk [vmem:[#allocation3 + $0x130] sm:$0xff] %vm1014_vm2, %v947_v50  ;;  %1450 = vrot.lane.b32.xlu1 %v1353_v44, %s4433_s22  ;;  %v1385_v44 = vld [vmem:[#allocation2 + $0x11b] sm:$0xff] }
 0x14b   : > { %1448 = vrot.lane.b32.xlu0 %v1352_v48, %s4433_s22  ;;  %v1384_v48 = vld [vmem:[#allocation2 + $0x113] sm:$0xff] }
 0x14c   : > { %v953_v54 = vpop.permute.xlu1 %952 }
 0x14d   : > { %v951_v58 = vpop.permute.xlu0 %950  ;;  %1056 = vst.msk [vmem:[#allocation3 + $0x148] sm:$0xff] %vm1014_vm2, %v953_v54 }
 0x14e   : > { %1055 = vst.msk [vmem:[#allocation3 + $0x140] sm:$0xff] %vm1014_vm2, %v951_v58  ;;  %1454 = vrot.lane.b32.xlu1 %v1355_v52, %s4433_s22  ;;  %v1387_v52 = vld [vmem:[#allocation2 + $0x12b] sm:$0xff] }
 0x14f   : > { %1452 = vrot.lane.b32.xlu0 %v1354_v56, %s4433_s22  ;;  %v1386_v56 = vld [vmem:[#allocation2 + $0x123] sm:$0xff] }
 0x150   : > { %v957_v62 = vpop.permute.xlu1 %956 }
 0x151   : > { %v955_v0 = vpop.permute.xlu0 %954  ;;  %1058 = vst.msk [vmem:[#allocation3 + $0x158] sm:$0xff] %vm1014_vm2, %v957_v62 }
 0x152   : > { %1057 = vst.msk [vmem:[#allocation3 + $0x150] sm:$0xff] %vm1014_vm2, %v955_v0  ;;  %1458 = vrot.lane.b32.xlu1 %v1357_v60, %s4433_s22  ;;  %v1389_v60 = vld [vmem:[#allocation2 + $0x13b] sm:$0xff] }
 0x153   : > { %1456 = vrot.lane.b32.xlu0 %v1356_v63, %s4433_s22  ;;  %v1388_v63 = vld [vmem:[#allocation2 + $0x133] sm:$0xff] }
 0x154   : > { %v961_v4 = vpop.permute.xlu1 %960 }
 0x155   : > { %v959_v8 = vpop.permute.xlu0 %958  ;;  %1060 = vst.msk [vmem:[#allocation3 + $0x168] sm:$0xff] %vm1014_vm2, %v961_v4 }
 0x156   : > { %1059 = vst.msk [vmem:[#allocation3 + $0x160] sm:$0xff] %vm1014_vm2, %v959_v8  ;;  %1462 = vrot.lane.b32.xlu1 %v1359_v2, %s4433_s22  ;;  %v1391_v2 = vld [vmem:[#allocation2 + $0x14b] sm:$0xff] }
 0x157   : > { %1460 = vrot.lane.b32.xlu0 %v1358_v6, %s4433_s22  ;;  %v1390_v6 = vld [vmem:[#allocation2 + $0x143] sm:$0xff] }
 0x158   : > { %v965_v12 = vpop.permute.xlu1 %964 }
 0x159   : > { %v963_v16 = vpop.permute.xlu0 %962  ;;  %1062 = vst.msk [vmem:[#allocation3 + $0x178] sm:$0xff] %vm1014_vm2, %v965_v12 }
 0x15a   : > { %1061 = vst.msk [vmem:[#allocation3 + $0x170] sm:$0xff] %vm1014_vm2, %v963_v16  ;;  %1466 = vrot.lane.b32.xlu1 %v1361_v10, %s4433_s22  ;;  %v1393_v10 = vld [vmem:[#allocation2 + $0x15b] sm:$0xff] }
 0x15b   : > { %1464 = vrot.lane.b32.xlu0 %v1360_v14, %s4433_s22  ;;  %v1392_v14 = vld [vmem:[#allocation2 + $0x153] sm:$0xff] }
 0x15c   : > { %v1162_v20 = vpop.permute.xlu1 %1161 }
 0x15d   : > { %v1160_v22 = vpop.permute.xlu0 %1159  ;;  %1305 = vst.msk [vmem:[#allocation3 + $0x8] sm:$0xff] %vm1303_vm3, %v1162_v20 }
 0x15e   : > { %1304 = vst.msk [vmem:[#allocation3] sm:$0xff] %vm1303_vm3, %v1160_v22  ;;  %1470 = vrot.lane.b32.xlu1 %v1363_v19, %s4433_s22  ;;  %v1395_v19 = vld [vmem:[#allocation2 + $0x16b] sm:$0xff] }
 0x15f   : > { %1468 = vrot.lane.b32.xlu0 %v1362_v21, %s4433_s22  ;;  %v1394_v21 = vld [vmem:[#allocation2 + $0x163] sm:$0xff] }
 0x160   : > { %v1166_v24 = vpop.permute.xlu1 %1165 }
 0x161   : > { %v1164_v26 = vpop.permute.xlu0 %1163  ;;  %1307 = vst.msk [vmem:[#allocation3 + $0x18] sm:$0xff] %vm1303_vm3, %v1166_v24 }
 0x162   : > { %1306 = vst.msk [vmem:[#allocation3 + $0x10] sm:$0xff] %vm1303_vm3, %v1164_v26  ;;  %1474 = vrot.lane.b32.xlu1 %v1365_v23, %s4433_s22  ;;  %v1397_v23 = vld [vmem:[#allocation2 + $0x17b] sm:$0xff] }
 0x163   : > { %1472 = vrot.lane.b32.xlu0 %v1364_v25, %s4433_s22  ;;  %v1396_v25 = vld [vmem:[#allocation2 + $0x173] sm:$0xff] }
 0x164   : > { %v1170_v29 = vpop.permute.xlu1 %1169 }
 0x165   : > { %v1168_v33 = vpop.permute.xlu0 %1167  ;;  %1309 = vst.msk [vmem:[#allocation3 + $0x28] sm:$0xff] %vm1303_vm3, %v1170_v29 }
 0x166   : > { %1308 = vst.msk [vmem:[#allocation3 + $0x20] sm:$0xff] %vm1303_vm3, %v1168_v33  ;;  %1478 = vrot.lane.b32.xlu1 %v1367_v27, %s4433_s22  ;;  %v1399_v27 = vld [vmem:[#allocation2 + $0x18b] sm:$0xff] }
 0x167   : > { %1476 = vrot.lane.b32.xlu0 %v1366_v31, %s4433_s22  ;;  %v1398_v31 = vld [vmem:[#allocation2 + $0x183] sm:$0xff] }
 0x168   : > { %v1174_v37 = vpop.permute.xlu1 %1173 }
 0x169   : > { %v1172_v41 = vpop.permute.xlu0 %1171  ;;  %1311 = vst.msk [vmem:[#allocation3 + $0x38] sm:$0xff] %vm1303_vm3, %v1174_v37 }
 0x16a   : > { %1310 = vst.msk [vmem:[#allocation3 + $0x30] sm:$0xff] %vm1303_vm3, %v1172_v41  ;;  %1482 = vrot.lane.b32.xlu1 %v1369_v35, %s4433_s22  ;;  %v1642_v35 = vld [vmem:[#allocation2 + $0x1c] sm:$0xff] }
 0x16b   : > { %1480 = vrot.lane.b32.xlu0 %v1368_v39, %s4433_s22  ;;  %v1641_v39 = vld [vmem:[#allocation2 + $0x14] sm:$0xff] }
 0x16c   : > { %v1178_v45 = vpop.permute.xlu1 %1177 }
 0x16d   : > { %v1176_v49 = vpop.permute.xlu0 %1175  ;;  %1313 = vst.msk [vmem:[#allocation3 + $0x48] sm:$0xff] %vm1303_vm3, %v1178_v45 }
 0x16e   : > { %1312 = vst.msk [vmem:[#allocation3 + $0x40] sm:$0xff] %vm1303_vm3, %v1176_v49  ;;  %1486 = vrot.lane.b32.xlu1 %v1371_v43, %s4433_s22  ;;  %v5197_v43 = vld [vmem:[#allocation2 + $0x2c] sm:$0xff] }
 0x16f   : > { %1484 = vrot.lane.b32.xlu0 %v1370_v47, %s4433_s22  ;;  %v5199_v47 = vld [vmem:[#allocation2 + $0x24] sm:$0xff] }
 0x170   : > { %v1182_v53 = vpop.permute.xlu1 %1181 }
 0x171   : > { %v1180_v57 = vpop.permute.xlu0 %1179  ;;  %1315 = vst.msk [vmem:[#allocation3 + $0x58] sm:$0xff] %vm1303_vm3, %v1182_v53 }
 0x172   : > { %1314 = vst.msk [vmem:[#allocation3 + $0x50] sm:$0xff] %vm1303_vm3, %v1180_v57  ;;  %1490 = vrot.lane.b32.xlu1 %v1373_v51, %s4433_s22  ;;  %v5207_v51 = vld [vmem:[#allocation2 + $0x3c] sm:$0xff] }
 0x173   : > { %1488 = vrot.lane.b32.xlu0 %v1372_v55, %s4433_s22  ;;  %v5209_v55 = vld [vmem:[#allocation2 + $0x34] sm:$0xff] }
 0x174   : > { %v1186_v61 = vpop.permute.xlu1 %1185 }
 0x175   : > { %v1184_v3 = vpop.permute.xlu0 %1183  ;;  %1317 = vst.msk [vmem:[#allocation3 + $0x68] sm:$0xff] %vm1303_vm3, %v1186_v61 }
 0x176   : > { %1316 = vst.msk [vmem:[#allocation3 + $0x60] sm:$0xff] %vm1303_vm3, %v1184_v3  ;;  %1494 = vrot.lane.b32.xlu1 %v1375_v59, %s4433_s22  ;;  %v5217_v59 = vld [vmem:[#allocation2 + $0x4c] sm:$0xff] }
 0x177   : > { %1492 = vrot.lane.b32.xlu0 %v1374_v1, %s4433_s22  ;;  %v5219_v1 = vld [vmem:[#allocation2 + $0x44] sm:$0xff] }
 0x178   : > { %v1190_v7 = vpop.permute.xlu1 %1189 }
 0x179   : > { %v1188_v11 = vpop.permute.xlu0 %1187  ;;  %1319 = vst.msk [vmem:[#allocation3 + $0x78] sm:$0xff] %vm1303_vm3, %v1190_v7 }
 0x17a   : > { %1318 = vst.msk [vmem:[#allocation3 + $0x70] sm:$0xff] %vm1303_vm3, %v1188_v11  ;;  %1498 = vrot.lane.b32.xlu1 %v1377_v5, %s4433_s22  ;;  %v5227_v5 = vld [vmem:[#allocation2 + $0x5c] sm:$0xff] }
 0x17b   : > { %1496 = vrot.lane.b32.xlu0 %v1376_v9, %s4433_s22  ;;  %v5229_v9 = vld [vmem:[#allocation2 + $0x54] sm:$0xff] }
 0x17c   : > { %v1194_v15 = vpop.permute.xlu1 %1193 }
 0x17d   : > { %v1192_v18 = vpop.permute.xlu0 %1191  ;;  %1321 = vst.msk [vmem:[#allocation3 + $0x88] sm:$0xff] %vm1303_vm3, %v1194_v15 }
 0x17e   : > { %1320 = vst.msk [vmem:[#allocation3 + $0x80] sm:$0xff] %vm1303_vm3, %v1192_v18  ;;  %1502 = vrot.lane.b32.xlu1 %v1379_v13, %s4433_s22  ;;  %v5237_v13 = vld [vmem:[#allocation2 + $0x6c] sm:$0xff] }
 0x17f   : > { %1500 = vrot.lane.b32.xlu0 %v1378_v17, %s4433_s22  ;;  %v5239_v17 = vld [vmem:[#allocation2 + $0x64] sm:$0xff] }
 0x180   : > { %v1198_v30 = vpop.permute.xlu1 %1197 }
 0x181   : > { %v1196_v34 = vpop.permute.xlu0 %1195  ;;  %1323 = vst.msk [vmem:[#allocation3 + $0x98] sm:$0xff] %vm1303_vm3, %v1198_v30 }
 0x182   : > { %1322 = vst.msk [vmem:[#allocation3 + $0x90] sm:$0xff] %vm1303_vm3, %v1196_v34  ;;  %1506 = vrot.lane.b32.xlu1 %v1381_v28, %s4433_s22  ;;  %v5247_v28 = vld [vmem:[#allocation2 + $0x7c] sm:$0xff] }
 0x183   : > { %1504 = vrot.lane.b32.xlu0 %v1380_v32, %s4433_s22  ;;  %v5249_v32 = vld [vmem:[#allocation2 + $0x74] sm:$0xff] }
 0x184   : > { %v1202_v38 = vpop.permute.xlu1 %1201 }
 0x185   : > { %v1200_v42 = vpop.permute.xlu0 %1199  ;;  %1325 = vst.msk [vmem:[#allocation3 + $0xa8] sm:$0xff] %vm1303_vm3, %v1202_v38 }
 0x186   : > { %1324 = vst.msk [vmem:[#allocation3 + $0xa0] sm:$0xff] %vm1303_vm3, %v1200_v42  ;;  %1510 = vrot.lane.b32.xlu1 %v1383_v36, %s4433_s22  ;;  %v5257_v36 = vld [vmem:[#allocation2 + $0x8c] sm:$0xff] }
 0x187   : > { %1508 = vrot.lane.b32.xlu0 %v1382_v40, %s4433_s22  ;;  %v5259_v40 = vld [vmem:[#allocation2 + $0x84] sm:$0xff] }
 0x188   : > { %v1206_v46 = vpop.permute.xlu1 %1205 }
 0x189   : > { %v1204_v50 = vpop.permute.xlu0 %1203  ;;  %1327 = vst.msk [vmem:[#allocation3 + $0xb8] sm:$0xff] %vm1303_vm3, %v1206_v46 }
 0x18a   : > { %1326 = vst.msk [vmem:[#allocation3 + $0xb0] sm:$0xff] %vm1303_vm3, %v1204_v50  ;;  %1514 = vrot.lane.b32.xlu1 %v1385_v44, %s4433_s22  ;;  %v5267_v44 = vld [vmem:[#allocation2 + $0x9c] sm:$0xff] }
 0x18b   : > { %1512 = vrot.lane.b32.xlu0 %v1384_v48, %s4433_s22  ;;  %v5269_v48 = vld [vmem:[#allocation2 + $0x94] sm:$0xff] }
 0x18c   : > { %v1210_v54 = vpop.permute.xlu1 %1209 }
 0x18d   : > { %v1208_v58 = vpop.permute.xlu0 %1207  ;;  %1329 = vst.msk [vmem:[#allocation3 + $0xc8] sm:$0xff] %vm1303_vm3, %v1210_v54 }
 0x18e   : > { %1328 = vst.msk [vmem:[#allocation3 + $0xc0] sm:$0xff] %vm1303_vm3, %v1208_v58  ;;  %1518 = vrot.lane.b32.xlu1 %v1387_v52, %s4433_s22  ;;  %v5277_v52 = vld [vmem:[#allocation2 + $0xac] sm:$0xff] }
 0x18f   : > { %1516 = vrot.lane.b32.xlu0 %v1386_v56, %s4433_s22  ;;  %v5279_v56 = vld [vmem:[#allocation2 + $0xa4] sm:$0xff] }
 0x190   : > { %v1214_v62 = vpop.permute.xlu1 %1213 }
 0x191   : > { %v1212_v0 = vpop.permute.xlu0 %1211  ;;  %1331 = vst.msk [vmem:[#allocation3 + $0xd8] sm:$0xff] %vm1303_vm3, %v1214_v62 }
 0x192   : > { %1330 = vst.msk [vmem:[#allocation3 + $0xd0] sm:$0xff] %vm1303_vm3, %v1212_v0  ;;  %1522 = vrot.lane.b32.xlu1 %v1389_v60, %s4433_s22  ;;  %v5287_v60 = vld [vmem:[#allocation2 + $0xbc] sm:$0xff] }
 0x193   : > { %1520 = vrot.lane.b32.xlu0 %v1388_v63, %s4433_s22  ;;  %v5289_v63 = vld [vmem:[#allocation2 + $0xb4] sm:$0xff] }
 0x194   : > { %v1218_v4 = vpop.permute.xlu1 %1217 }
 0x195   : > { %v1216_v8 = vpop.permute.xlu0 %1215  ;;  %1333 = vst.msk [vmem:[#allocation3 + $0xe8] sm:$0xff] %vm1303_vm3, %v1218_v4 }
 0x196   : > { %1332 = vst.msk [vmem:[#allocation3 + $0xe0] sm:$0xff] %vm1303_vm3, %v1216_v8  ;;  %1526 = vrot.lane.b32.xlu1 %v1391_v2, %s4433_s22  ;;  %v5297_v2 = vld [vmem:[#allocation2 + $0xcc] sm:$0xff] }
 0x197   : > { %1524 = vrot.lane.b32.xlu0 %v1390_v6, %s4433_s22  ;;  %v5299_v6 = vld [vmem:[#allocation2 + $0xc4] sm:$0xff] }
 0x198   : > { %v1222_v12 = vpop.permute.xlu1 %1221 }
 0x199   : > { %v1220_v16 = vpop.permute.xlu0 %1219  ;;  %1335 = vst.msk [vmem:[#allocation3 + $0xf8] sm:$0xff] %vm1303_vm3, %v1222_v12 }
 0x19a   : > { %1334 = vst.msk [vmem:[#allocation3 + $0xf0] sm:$0xff] %vm1303_vm3, %v1220_v16  ;;  %1530 = vrot.lane.b32.xlu1 %v1393_v10, %s4433_s22  ;;  %v5307_v10 = vld [vmem:[#allocation2 + $0xdc] sm:$0xff] }
 0x19b   : > { %1528 = vrot.lane.b32.xlu0 %v1392_v14, %s4433_s22  ;;  %v5309_v14 = vld [vmem:[#allocation2 + $0xd4] sm:$0xff] }
 0x19c   : > { %v1226_v20 = vpop.permute.xlu1 %1225 }
 0x19d   : > { %v1224_v22 = vpop.permute.xlu0 %1223  ;;  %1337 = vst.msk [vmem:[#allocation3 + $0x108] sm:$0xff] %vm1303_vm3, %v1226_v20 }
 0x19e   : > { %1336 = vst.msk [vmem:[#allocation3 + $0x100] sm:$0xff] %vm1303_vm3, %v1224_v22  ;;  %1534 = vrot.lane.b32.xlu1 %v1395_v19, %s4433_s22  ;;  %v5317_v19 = vld [vmem:[#allocation2 + $0xec] sm:$0xff] }
 0x19f   : > { %1532 = vrot.lane.b32.xlu0 %v1394_v21, %s4433_s22  ;;  %v5319_v21 = vld [vmem:[#allocation2 + $0xe4] sm:$0xff] }
 0x1a0   : > { %v1230_v24 = vpop.permute.xlu1 %1229 }
 0x1a1   : > { %v1228_v26 = vpop.permute.xlu0 %1227  ;;  %1339 = vst.msk [vmem:[#allocation3 + $0x118] sm:$0xff] %vm1303_vm3, %v1230_v24 }
 0x1a2   : > { %1338 = vst.msk [vmem:[#allocation3 + $0x110] sm:$0xff] %vm1303_vm3, %v1228_v26  ;;  %1538 = vrot.lane.b32.xlu1 %v1397_v23, %s4433_s22  ;;  %v5327_v23 = vld [vmem:[#allocation2 + $0xfc] sm:$0xff] }
 0x1a3   : > { %1536 = vrot.lane.b32.xlu0 %v1396_v25, %s4433_s22  ;;  %v5329_v25 = vld [vmem:[#allocation2 + $0xf4] sm:$0xff] }
 0x1a4   : > { %v1234_v29 = vpop.permute.xlu1 %1233 }
 0x1a5   : > { %v1232_v33 = vpop.permute.xlu0 %1231  ;;  %1341 = vst.msk [vmem:[#allocation3 + $0x128] sm:$0xff] %vm1303_vm3, %v1234_v29 }
 0x1a6   : > { %1340 = vst.msk [vmem:[#allocation3 + $0x120] sm:$0xff] %vm1303_vm3, %v1232_v33  ;;  %1542 = vrot.lane.b32.xlu1 %v1399_v27, %s4433_s22  ;;  %v5337_v27 = vld [vmem:[#allocation2 + $0x10c] sm:$0xff] }
 0x1a7   : > { %1540 = vrot.lane.b32.xlu0 %v1398_v31, %s4433_s22  ;;  %v5339_v31 = vld [vmem:[#allocation2 + $0x104] sm:$0xff] }
 0x1a8   : > { %v1238_v37 = vpop.permute.xlu1 %1237 }
 0x1a9   : > { %v1236_v41 = vpop.permute.xlu0 %1235  ;;  %1343 = vst.msk [vmem:[#allocation3 + $0x138] sm:$0xff] %vm1303_vm3, %v1238_v37 }
 0x1aa   : > { %1342 = vst.msk [vmem:[#allocation3 + $0x130] sm:$0xff] %vm1303_vm3, %v1236_v41  ;;  %1739 = vrot.lane.b32.xlu1 %v1642_v35, %s4434_s23  ;;  %v5347_v35 = vld [vmem:[#allocation2 + $0x11c] sm:$0xff] }
 0x1ab   : > { %1737 = vrot.lane.b32.xlu0 %v1641_v39, %s4434_s23  ;;  %v5349_v39 = vld [vmem:[#allocation2 + $0x114] sm:$0xff] }
 0x1ac   : > { %v1242_v45 = vpop.permute.xlu1 %1241 }
 0x1ad   : > { %v1240_v49 = vpop.permute.xlu0 %1239  ;;  %1345 = vst.msk [vmem:[#allocation3 + $0x148] sm:$0xff] %vm1303_vm3, %v1242_v45  ;;  %v5357_v45 = vld [vmem:[#allocation2 + $0x12c] sm:$0xff] }
 0x1ae   : > { %1344 = vst.msk [vmem:[#allocation3 + $0x140] sm:$0xff] %vm1303_vm3, %v1240_v49  ;;  %1743 = vrot.lane.b32.xlu1 %v5197_v43, %s4434_s23 }
 0x1af   : > { %1741 = vrot.lane.b32.xlu0 %v5199_v47, %s4434_s23 }
 0x1b0   : > { %v1246_v53 = vpop.permute.xlu1 %1245 }
 0x1b1   : > { %v1244_v57 = vpop.permute.xlu0 %1243  ;;  %1347 = vst.msk [vmem:[#allocation3 + $0x158] sm:$0xff] %vm1303_vm3, %v1246_v53  ;;  %v5359_v53 = vld [vmem:[#allocation2 + $0x124] sm:$0xff] }
 0x1b2   : > { %1346 = vst.msk [vmem:[#allocation3 + $0x150] sm:$0xff] %vm1303_vm3, %v1244_v57  ;;  %1747 = vrot.lane.b32.xlu1 %v5207_v51, %s4434_s23 }
 0x1b3   : > { %1745 = vrot.lane.b32.xlu0 %v5209_v55, %s4434_s23 }
 0x1b4   : > { %v1250_v61 = vpop.permute.xlu1 %1249 }
 0x1b5   : > { %v1248_v3 = vpop.permute.xlu0 %1247  ;;  %1349 = vst.msk [vmem:[#allocation3 + $0x168] sm:$0xff] %vm1303_vm3, %v1250_v61  ;;  %v1678_v61 = vld [vmem:[#allocation2 + $0x13c] sm:$0xff] }
 0x1b6   : > { %1348 = vst.msk [vmem:[#allocation3 + $0x160] sm:$0xff] %vm1303_vm3, %v1248_v3  ;;  %1751 = vrot.lane.b32.xlu1 %v5217_v59, %s4434_s23 }
 0x1b7   : > { %1749 = vrot.lane.b32.xlu0 %v5219_v1, %s4434_s23 }
 0x1b8   : > { %v1254_v7 = vpop.permute.xlu1 %1253 }
 0x1b9   : > { %v1252_v11 = vpop.permute.xlu0 %1251  ;;  %1351 = vst.msk [vmem:[#allocation3 + $0x178] sm:$0xff] %vm1303_vm3, %v1254_v7  ;;  %v1677_v7 = vld [vmem:[#allocation2 + $0x134] sm:$0xff] }
 0x1ba   : > { %1350 = vst.msk [vmem:[#allocation3 + $0x170] sm:$0xff] %vm1303_vm3, %v1252_v11  ;;  %1755 = vrot.lane.b32.xlu1 %v5227_v5, %s4434_s23 }
 0x1bb   : > { %1753 = vrot.lane.b32.xlu0 %v5229_v9, %s4434_s23 }
 0x1bc   : > { %v1451_v15 = vpop.permute.xlu1 %1450 }
 0x1bd   : > { %v1449_v18 = vpop.permute.xlu0 %1448  ;;  %1594 = vst.msk [vmem:[#allocation3 + $0x8] sm:$0xff] %vm1592_vm4, %v1451_v15  ;;  %v1680_v15 = vld [vmem:[#allocation2 + $0x14c] sm:$0xff] }
 0x1be   : > { %1593 = vst.msk [vmem:[#allocation3] sm:$0xff] %vm1592_vm4, %v1449_v18  ;;  %1759 = vrot.lane.b32.xlu1 %v5237_v13, %s4434_s23 }
 0x1bf   : > { %1757 = vrot.lane.b32.xlu0 %v5239_v17, %s4434_s23 }
 0x1c0   : > { %v1455_v30 = vpop.permute.xlu1 %1454 }
 0x1c1   : > { %v1453_v34 = vpop.permute.xlu0 %1452  ;;  %1596 = vst.msk [vmem:[#allocation3 + $0x18] sm:$0xff] %vm1592_vm4, %v1455_v30  ;;  %v1679_v30 = vld [vmem:[#allocation2 + $0x144] sm:$0xff] }
 0x1c2   : > { %1595 = vst.msk [vmem:[#allocation3 + $0x10] sm:$0xff] %vm1592_vm4, %v1453_v34  ;;  %1763 = vrot.lane.b32.xlu1 %v5247_v28, %s4434_s23 }
 0x1c3   : > { %1761 = vrot.lane.b32.xlu0 %v5249_v32, %s4434_s23 }
 0x1c4   : > { %v1459_v38 = vpop.permute.xlu1 %1458 }
 0x1c5   : > { %v1457_v42 = vpop.permute.xlu0 %1456  ;;  %1598 = vst.msk [vmem:[#allocation3 + $0x28] sm:$0xff] %vm1592_vm4, %v1459_v38  ;;  %v1682_v38 = vld [vmem:[#allocation2 + $0x15c] sm:$0xff] }
 0x1c6   : > { %1597 = vst.msk [vmem:[#allocation3 + $0x20] sm:$0xff] %vm1592_vm4, %v1457_v42  ;;  %1767 = vrot.lane.b32.xlu1 %v5257_v36, %s4434_s23 }
 0x1c7   : > { %1765 = vrot.lane.b32.xlu0 %v5259_v40, %s4434_s23 }
 0x1c8   : > { %v1463_v46 = vpop.permute.xlu1 %1462 }
 0x1c9   : > { %v1461_v50 = vpop.permute.xlu0 %1460  ;;  %1600 = vst.msk [vmem:[#allocation3 + $0x38] sm:$0xff] %vm1592_vm4, %v1463_v46  ;;  %v1681_v46 = vld [vmem:[#allocation2 + $0x154] sm:$0xff] }
 0x1ca   : > { %1599 = vst.msk [vmem:[#allocation3 + $0x30] sm:$0xff] %vm1592_vm4, %v1461_v50  ;;  %1771 = vrot.lane.b32.xlu1 %v5267_v44, %s4434_s23 }
 0x1cb   : > { %1769 = vrot.lane.b32.xlu0 %v5269_v48, %s4434_s23 }
 0x1cc   : > { %v1467_v54 = vpop.permute.xlu1 %1466 }
 0x1cd   : > { %v1465_v58 = vpop.permute.xlu0 %1464  ;;  %1602 = vst.msk [vmem:[#allocation3 + $0x48] sm:$0xff] %vm1592_vm4, %v1467_v54  ;;  %v1684_v54 = vld [vmem:[#allocation2 + $0x16c] sm:$0xff] }
 0x1ce   : > { %1601 = vst.msk [vmem:[#allocation3 + $0x40] sm:$0xff] %vm1592_vm4, %v1465_v58  ;;  %1775 = vrot.lane.b32.xlu1 %v5277_v52, %s4434_s23 }
 0x1cf   : > { %1773 = vrot.lane.b32.xlu0 %v5279_v56, %s4434_s23 }
 0x1d0   : > { %v1471_v62 = vpop.permute.xlu1 %1470 }
 0x1d1   : > { %v1469_v0 = vpop.permute.xlu0 %1468  ;;  %1604 = vst.msk [vmem:[#allocation3 + $0x58] sm:$0xff] %vm1592_vm4, %v1471_v62  ;;  %v1683_v62 = vld [vmem:[#allocation2 + $0x164] sm:$0xff] }
 0x1d2   : > { %1603 = vst.msk [vmem:[#allocation3 + $0x50] sm:$0xff] %vm1592_vm4, %v1469_v0  ;;  %1779 = vrot.lane.b32.xlu1 %v5287_v60, %s4434_s23 }
 0x1d3   : > { %1777 = vrot.lane.b32.xlu0 %v5289_v63, %s4434_s23 }
 0x1d4   : > { %v1475_v4 = vpop.permute.xlu1 %1474 }
 0x1d5   : > { %v1473_v8 = vpop.permute.xlu0 %1472  ;;  %1606 = vst.msk [vmem:[#allocation3 + $0x68] sm:$0xff] %vm1592_vm4, %v1475_v4  ;;  %v1686_v4 = vld [vmem:[#allocation2 + $0x17c] sm:$0xff] }
 0x1d6   : > { %1605 = vst.msk [vmem:[#allocation3 + $0x60] sm:$0xff] %vm1592_vm4, %v1473_v8  ;;  %1783 = vrot.lane.b32.xlu1 %v5297_v2, %s4434_s23 }
 0x1d7   : > { %1781 = vrot.lane.b32.xlu0 %v5299_v6, %s4434_s23 }
 0x1d8   : > { %v1479_v12 = vpop.permute.xlu1 %1478 }
 0x1d9   : > { %v1477_v16 = vpop.permute.xlu0 %1476  ;;  %1608 = vst.msk [vmem:[#allocation3 + $0x78] sm:$0xff] %vm1592_vm4, %v1479_v12  ;;  %v1685_v12 = vld [vmem:[#allocation2 + $0x174] sm:$0xff] }
 0x1da   : > { %1607 = vst.msk [vmem:[#allocation3 + $0x70] sm:$0xff] %vm1592_vm4, %v1477_v16  ;;  %1787 = vrot.lane.b32.xlu1 %v5307_v10, %s4434_s23 }
 0x1db   : > { %1785 = vrot.lane.b32.xlu0 %v5309_v14, %s4434_s23 }
 0x1dc   : > { %v1483_v20 = vpop.permute.xlu1 %1482 }
 0x1dd   : > { %v1481_v22 = vpop.permute.xlu0 %1480  ;;  %1610 = vst.msk [vmem:[#allocation3 + $0x88] sm:$0xff] %vm1592_vm4, %v1483_v20  ;;  %v1688_v20 = vld [vmem:[#allocation2 + $0x18c] sm:$0xff] }
 0x1de   : > { %1609 = vst.msk [vmem:[#allocation3 + $0x80] sm:$0xff] %vm1592_vm4, %v1481_v22  ;;  %1791 = vrot.lane.b32.xlu1 %v5317_v19, %s4434_s23 }
 0x1df   : > { %1789 = vrot.lane.b32.xlu0 %v5319_v21, %s4434_s23 }
 0x1e0   : > { %v1487_v24 = vpop.permute.xlu1 %1486 }
 0x1e1   : > { %v1485_v26 = vpop.permute.xlu0 %1484  ;;  %1612 = vst.msk [vmem:[#allocation3 + $0x98] sm:$0xff] %vm1592_vm4, %v1487_v24  ;;  %v1687_v24 = vld [vmem:[#allocation2 + $0x184] sm:$0xff] }
 0x1e2   : > { %1611 = vst.msk [vmem:[#allocation3 + $0x90] sm:$0xff] %vm1592_vm4, %v1485_v26  ;;  %1795 = vrot.lane.b32.xlu1 %v5327_v23, %s4434_s23 }
 0x1e3   : > { %1793 = vrot.lane.b32.xlu0 %v5329_v25, %s4434_s23 }
 0x1e4   : > { %v1491_v29 = vpop.permute.xlu1 %1490 }
 0x1e5   : > { %v1489_v33 = vpop.permute.xlu0 %1488  ;;  %1614 = vst.msk [vmem:[#allocation3 + $0xa8] sm:$0xff] %vm1592_vm4, %v1491_v29  ;;  %v2845_v29 = vld [vmem:[%s6745_s2] sm:$0xff] }
 0x1e6   : > { %1613 = vst.msk [vmem:[#allocation3 + $0xa0] sm:$0xff] %vm1592_vm4, %v1489_v33  ;;  %1799 = vrot.lane.b32.xlu1 %v5337_v27, %s4434_s23  ;;  %v2846_v33 = vld [vmem:[%s6745_s2 + $0x8] sm:$0xff] }
 0x1e7   : > { %1797 = vrot.lane.b32.xlu0 %v5339_v31, %s4434_s23 }
 0x1e8   : > { %v1495_v37 = vpop.permute.xlu1 %1494 }
 0x1e9   : > { %v1493_v41 = vpop.permute.xlu0 %1492  ;;  %1616 = vst.msk [vmem:[#allocation3 + $0xb8] sm:$0xff] %vm1592_vm4, %v1495_v37 }
 0x1ea   : > { %1615 = vst.msk [vmem:[#allocation3 + $0xb0] sm:$0xff] %vm1592_vm4, %v1493_v41  ;;  %1803 = vrot.lane.b32.xlu1 %v5347_v35, %s4434_s23  ;;  %v4295_v41 = vpack.c.bf16 %v2846_v33, %v2845_v29  ;;  %v2512_v33 = vld [vmem:[#allocation2 + $0x46] sm:$0xff] }
 0x1eb   : > { %1801 = vrot.lane.b32.xlu0 %v5349_v39, %s4434_s23 }
 0x1ec   : > { %v1499_v49 = vpop.permute.xlu1 %1498  ;;  %4296 = vmatprep.subr.bf16.mxu0 %v4295_v41  ;;  %4303 = vmatprep.subr.bf16.mxu1 %v4295_v41 }
 0x1ed   : > { %v1497_v57 = vpop.permute.xlu0 %1496  ;;  %1618 = vst.msk [vmem:[#allocation3 + $0xc8] sm:$0xff] %vm1592_vm4, %v1499_v49  ;;  %4298 = vmatpush3.bf16.msra.mxu0 %v4295_v41  ;;  %4306 = vmatpush3.bf16.msra.mxu1 %v4295_v41  ;;  %v2226_v41 = vld [vmem:[#allocation2 + $0x5d] sm:$0xff] }
 0x1ee   : > { %1617 = vst.msk [vmem:[#allocation3 + $0xc0] sm:$0xff] %vm1592_vm4, %v1497_v57  ;;  %1807 = vrot.lane.b32.xlu1 %v5357_v45, %s4434_s23  ;;  %v2847_v57 = vld [vmem:[%s6745_s2 + $0x10] sm:$0xff] }
 0x1ef   : > { %1805 = vrot.lane.b32.xlu0 %v5359_v53, %s4434_s23 }
 0x1f0   : > { %v1503_v3 = vpop.permute.xlu1 %1502 }
 0x1f1   : > { %v1501_v11 = vpop.permute.xlu0 %1500  ;;  %1620 = vst.msk [vmem:[#allocation3 + $0xd8] sm:$0xff] %vm1592_vm4, %v1503_v3 }
 0x1f2   : > { %1619 = vst.msk [vmem:[#allocation3 + $0xd0] sm:$0xff] %vm1592_vm4, %v1501_v11  ;;  %1811 = vrot.lane.b32.xlu1 %v1678_v61, %s4434_s23  ;;  %v2848_v61 = vld [vmem:[%s6745_s2 + $0x18] sm:$0xff] }
 0x1f3   : > { %1809 = vrot.lane.b32.xlu0 %v1677_v7, %s4434_s23  ;;  %v4299_v7 = vpack.c.bf16 %v2848_v61, %v2847_v57  ;;  %v2225_v57 = vld [vmem:[#allocation2 + $0x55] sm:$0xff] }
 0x1f4   : > { %v1507_v18 = vpop.permute.xlu1 %1506 }
 0x1f5   : > { %v1505_v34 = vpop.permute.xlu0 %1504  ;;  %1622 = vst.msk [vmem:[#allocation3 + $0xe8] sm:$0xff] %vm1592_vm4, %v1507_v18  ;;  %4300 = vmatprep.subr.bf16.mxu0 %v4299_v7  ;;  %v2219_v18 = vld [vmem:[#allocation2 + $0x25] sm:$0xff]  ;;  %4304 = vmatprep.subr.bf16.mxu1 %v4299_v7 }
 0x1f6   : > { %1621 = vst.msk [vmem:[#allocation3 + $0xe0] sm:$0xff] %vm1592_vm4, %v1505_v34  ;;  %1815 = vrot.lane.b32.xlu1 %v1680_v15, %s4434_s23  ;;  %4302 = vmatpush3.bf16.msra.mxu0 %v4299_v7  ;;  %v2508_v34 = vld [vmem:[#allocation2 + $0x26] sm:$0xff] }
 0x1f7   : > { %1813 = vrot.lane.b32.xlu0 %v1679_v30, %s4434_s23  ;;  %4307 = vmatpush3.bf16.msra.mxu1 %v4299_v7 }
 0x1f8   : > { %v1511_v42 = vpop.permute.xlu1 %1510 }
 0x1f9   : > { %v1509_v50 = vpop.permute.xlu0 %1508  ;;  %1624 = vst.msk [vmem:[#allocation3 + $0xf8] sm:$0xff] %vm1592_vm4, %v1511_v42  ;;  %v2222_v42 = vld [vmem:[#allocation2 + $0x3d] sm:$0xff] }
 0x1fa   : > { %1623 = vst.msk [vmem:[#allocation3 + $0xf0] sm:$0xff] %vm1592_vm4, %v1509_v50  ;;  %1819 = vrot.lane.b32.xlu1 %v1682_v38, %s4434_s23  ;;  %v2221_v50 = vld [vmem:[#allocation2 + $0x35] sm:$0xff] }
 0x1fb   : > { %1817 = vrot.lane.b32.xlu0 %v1681_v46, %s4434_s23 }
 0x1fc   : > { %v1515_v58 = vpop.permute.xlu1 %1514 }
 0x1fd   : > { %v1513_v0 = vpop.permute.xlu0 %1512  ;;  %1626 = vst.msk [vmem:[#allocation3 + $0x108] sm:$0xff] %vm1592_vm4, %v1515_v58  ;;  %v2511_v58 = vld [vmem:[#allocation2 + $0x3e] sm:$0xff] }
 0x1fe   : > { %1625 = vst.msk [vmem:[#allocation3 + $0x100] sm:$0xff] %vm1592_vm4, %v1513_v0  ;;  %1823 = vrot.lane.b32.xlu1 %v1684_v54, %s4434_s23  ;;  %v2510_v0 = vld [vmem:[#allocation2 + $0x36] sm:$0xff] }
 0x1ff   : > { %1821 = vrot.lane.b32.xlu0 %v1683_v62, %s4434_s23 }
 0x200   : > { %v1519_v8 = vpop.permute.xlu1 %1518 }
 0x201   : > { %v1517_v16 = vpop.permute.xlu0 %1516  ;;  %1628 = vst.msk [vmem:[#allocation3 + $0x118] sm:$0xff] %vm1592_vm4, %v1519_v8 }
 0x202   : > { %1627 = vst.msk [vmem:[#allocation3 + $0x110] sm:$0xff] %vm1592_vm4, %v1517_v16  ;;  %1827 = vrot.lane.b32.xlu1 %v1686_v4, %s4434_s23  ;;  %v2224_v16 = vld [vmem:[#allocation2 + $0x4d] sm:$0xff] }
 0x203   : > { %1825 = vrot.lane.b32.xlu0 %v1685_v12, %s4434_s23 }
 0x204   : > { %v1523_v22 = vpop.permute.xlu1 %1522 }
 0x205   : > { %v1521_v26 = vpop.permute.xlu0 %1520  ;;  %1630 = vst.msk [vmem:[#allocation3 + $0x128] sm:$0xff] %vm1592_vm4, %v1523_v22  ;;  %v2223_v22 = vld [vmem:[#allocation2 + $0x45] sm:$0xff] }
 0x206   : > { %1629 = vst.msk [vmem:[#allocation3 + $0x120] sm:$0xff] %vm1592_vm4, %v1521_v26  ;;  %1831 = vrot.lane.b32.xlu1 %v1688_v20, %s4434_s23  ;;  %v2513_v26 = vld [vmem:[#allocation2 + $0x4e] sm:$0xff] }
 0x207   : > { %1829 = vrot.lane.b32.xlu0 %v1687_v24, %s4434_s23 }
 0x208   : > { %v1527_v37 = vpop.permute.xlu1 %1526 }
 0x209   : > { %v1525_v49 = vpop.permute.xlu0 %1524  ;;  %1632 = vst.msk [vmem:[#allocation3 + $0x138] sm:$0xff] %vm1592_vm4, %v1527_v37 }
 0x20a   : > { %1631 = vst.msk [vmem:[#allocation3 + $0x130] sm:$0xff] %vm1592_vm4, %v1525_v49  ;;  %2028 = vrot.lane.b32.xlu1 %v5197_v43, %s4435_s6  ;;  %v2220_v43 = vld [vmem:[#allocation2 + $0x2d] sm:$0xff] }
 0x20b   : > { %2026 = vrot.lane.b32.xlu0 %v5199_v47, %s4435_s6  ;;  %v2849_v47 = vld [vmem:[%s6745_s2 + $0x20] sm:$0xf] }
 0x20c   : > { %v1531_v3 = vpop.permute.xlu1 %1530  ;;  %4221 = vmatprep.subr.msk.mxu0 %vm2995_vm5, %v2849_v47  ;;  %4305 = vmatprep.subr.msk.mxu1 %vm2995_vm5, %v2849_v47 }
 0x20d   : > { %v1529_v11 = vpop.permute.xlu0 %1528  ;;  %1634 = vst.msk [vmem:[#allocation3 + $0x148] sm:$0xff] %vm1592_vm4, %v1531_v3  ;;  %4222 = vmatpush3.msk.msra.mxu0 %vm2995_vm5, %v2849_v47  ;;  %4308 = vmatpush3.msk.msra.mxu1 %vm2995_vm5, %v2849_v47  ;;  %v2515_v3 = vld [vmem:[#allocation2 + $0x5e] sm:$0xff]  ;;  %v2228_v47 = vld [vmem:[#allocation2 + $0x6d] sm:$0xff] }
 0x20e   : > { %1633 = vst.msk [vmem:[#allocation3 + $0x140] sm:$0xff] %vm1592_vm4, %v1529_v11  ;;  %2032 = vrot.lane.b32.xlu1 %v5207_v51, %s4435_s6  ;;  %v2509_v51 = vld [vmem:[#allocation2 + $0x2e] sm:$0xff]  ;;  %v2514_v11 = vld [vmem:[#allocation2 + $0x56] sm:$0xff] }
 0x20f   : > { %2030 = vrot.lane.b32.xlu0 %v5209_v55, %s4435_s6 }
 0x210   : > { %v1535_v15 = vpop.permute.xlu1 %1534 }
 0x211   : > { %v1533_v30 = vpop.permute.xlu0 %1532  ;;  %1636 = vst.msk [vmem:[#allocation3 + $0x158] sm:$0xff] %vm1592_vm4, %v1535_v15 }
 0x212   : > { %1635 = vst.msk [vmem:[#allocation3 + $0x150] sm:$0xff] %vm1592_vm4, %v1533_v30  ;;  %2317 = vrot.lane.b32.xlu1 %v2220_v43, %s4436_s14 }
 0x213   : > { %2315 = vrot.lane.b32.xlu0 %v2219_v18, %s4436_s14  ;;  %v2227_v18 = vld [vmem:[#allocation2 + $0x65] sm:$0xff] }
 0x214   : > { %v1539_v55 = vpop.permute.xlu1 %1538 }
 0x215   : > { %v1537_v38 = vpop.permute.xlu0 %1536  ;;  %1638 = vst.msk [vmem:[#allocation3 + $0x168] sm:$0xff] %vm1592_vm4, %v1539_v55 }
 0x216   : > { %1637 = vst.msk [vmem:[#allocation3 + $0x160] sm:$0xff] %vm1592_vm4, %v1537_v38  ;;  %2606 = vrot.lane.b32.xlu1 %v2509_v51, %s4437_s20  ;;  %v2517_v51 = vld [vmem:[#allocation2 + $0x6e] sm:$0xff] }
 0x217   : > { %2604 = vrot.lane.b32.xlu0 %v2508_v34, %s4437_s20  ;;  %v2516_v34 = vld [vmem:[#allocation2 + $0x66] sm:$0xff] }
 0x218   : > { %v1543_v46 = vpop.permute.xlu1 %1542 }
 0x219   : > { %v1541_v54 = vpop.permute.xlu0 %1540  ;;  %1640 = vst.msk [vmem:[#allocation3 + $0x178] sm:$0xff] %vm1592_vm4, %v1543_v46 }
 0x21a   : > { %1639 = vst.msk [vmem:[#allocation3 + $0x170] sm:$0xff] %vm1592_vm4, %v1541_v54  ;;  %2321 = vrot.lane.b32.xlu1 %v2222_v42, %s4436_s14  ;;  %v2230_v42 = vld [vmem:[#allocation2 + $0x7d] sm:$0xff] }
 0x21b   : > { %2319 = vrot.lane.b32.xlu0 %v2221_v50, %s4436_s14  ;;  %v2229_v50 = vld [vmem:[#allocation2 + $0x75] sm:$0xff] }
 0x21c   : > { %v1740_v62 = vpop.permute.xlu1 %1739 }
 0x21d   : > { %v1738_v4 = vpop.permute.xlu0 %1737  ;;  %1883 = vst.msk [vmem:[#allocation3 + $0x8] sm:$0xff] %vm1881_vm6, %v1740_v62 }
 0x21e   : > { %1882 = vst.msk [vmem:[#allocation3] sm:$0xff] %vm1881_vm6, %v1738_v4  ;;  %2610 = vrot.lane.b32.xlu1 %v2511_v58, %s4437_s20  ;;  %v2519_v58 = vld [vmem:[#allocation2 + $0x7e] sm:$0xff] }
 0x21f   : > { %2608 = vrot.lane.b32.xlu0 %v2510_v0, %s4437_s20  ;;  %v2518_v0 = vld [vmem:[#allocation2 + $0x76] sm:$0xff] }
 0x220   : > { %v1744_v8 = vpop.permute.xlu1 %1743 }
 0x221   : > { %v1742_v12 = vpop.permute.xlu0 %1741  ;;  %1885 = vst.msk [vmem:[#allocation3 + $0x18] sm:$0xff] %vm1881_vm6, %v1744_v8  ;;  %v2232_v8 = vld [vmem:[#allocation2 + $0x8d] sm:$0xff] }
 0x222   : > { %1884 = vst.msk [vmem:[#allocation3 + $0x10] sm:$0xff] %vm1881_vm6, %v1742_v12  ;;  %2036 = vrot.lane.b32.xlu1 %v5217_v59, %s4435_s6 }
 0x223   : > { %2034 = vrot.lane.b32.xlu0 %v5219_v1, %s4435_s6 }
 0x224   : > { %v1748_v20 = vpop.permute.xlu1 %1747 }
 0x225   : > { %v1746_v24 = vpop.permute.xlu0 %1745  ;;  %1887 = vst.msk [vmem:[#allocation3 + $0x28] sm:$0xff] %vm1881_vm6, %v1748_v20 }
 0x226   : > { %1886 = vst.msk [vmem:[#allocation3 + $0x20] sm:$0xff] %vm1881_vm6, %v1746_v24  ;;  %2325 = vrot.lane.b32.xlu1 %v2224_v16, %s4436_s14  ;;  %v2231_v16 = vld [vmem:[#allocation2 + $0x85] sm:$0xff] }
 0x227   : > { %2323 = vrot.lane.b32.xlu0 %v2223_v22, %s4436_s14  ;;  %v2521_v22 = vld [vmem:[#allocation2 + $0x8e] sm:$0xff] }
 0x228   : > { %v1752_v29 = vpop.permute.xlu1 %1751 }
 0x229   : > { %v1750_v37 = vpop.permute.xlu0 %1749  ;;  %1889 = vst.msk [vmem:[#allocation3 + $0x38] sm:$0xff] %vm1881_vm6, %v1752_v29 }
 0x22a   : > { %1888 = vst.msk [vmem:[#allocation3 + $0x30] sm:$0xff] %vm1881_vm6, %v1750_v37  ;;  %2614 = vrot.lane.b32.xlu1 %v2513_v26, %s4437_s20  ;;  %v2520_v26 = vld [vmem:[#allocation2 + $0x86] sm:$0xff] }
 0x22b   : > { %2612 = vrot.lane.b32.xlu0 %v2512_v33, %s4437_s20  ;;  %v2234_v33 = vld [vmem:[#allocation2 + $0x9d] sm:$0xff] }
 0x22c   : > { %v1756_v59 = vpop.permute.xlu1 %1755 }
 0x22d   : > { %v1754_v1 = vpop.permute.xlu0 %1753  ;;  %1891 = vst.msk [vmem:[#allocation3 + $0x48] sm:$0xff] %vm1881_vm6, %v1756_v59  ;;  %v2233_v59 = vld [vmem:[#allocation2 + $0x95] sm:$0xff] }
 0x22e   : > { %1890 = vst.msk [vmem:[#allocation3 + $0x40] sm:$0xff] %vm1881_vm6, %v1754_v1  ;;  %2040 = vrot.lane.b32.xlu1 %v5227_v5, %s4435_s6 }
 0x22f   : > { %2038 = vrot.lane.b32.xlu0 %v5229_v9, %s4435_s6 }
 0x230   : > { %v1760_v49 = vpop.permute.xlu1 %1759 }
 0x231   : > { %v1758_v61 = vpop.permute.xlu0 %1757  ;;  %1893 = vst.msk [vmem:[#allocation3 + $0x58] sm:$0xff] %vm1881_vm6, %v1760_v49 }
 0x232   : > { %1892 = vst.msk [vmem:[#allocation3 + $0x50] sm:$0xff] %vm1881_vm6, %v1758_v61  ;;  %2329 = vrot.lane.b32.xlu1 %v2226_v41, %s4436_s14  ;;  %v2523_v41 = vld [vmem:[#allocation2 + $0x9e] sm:$0xff] }
 0x233   : > { %2327 = vrot.lane.b32.xlu0 %v2225_v57, %s4436_s14  ;;  %v2522_v57 = vld [vmem:[#allocation2 + $0x96] sm:$0xff] }
 0x234   : > { %v1764_v7 = vpop.permute.xlu1 %1763 }
 0x235   : > { %v1762_v43 = vpop.permute.xlu0 %1761  ;;  %1895 = vst.msk [vmem:[#allocation3 + $0x68] sm:$0xff] %vm1881_vm6, %v1764_v7 }
 0x236   : > { %1894 = vst.msk [vmem:[#allocation3 + $0x60] sm:$0xff] %vm1881_vm6, %v1762_v43  ;;  %2618 = vrot.lane.b32.xlu1 %v2515_v3, %s4437_s20  ;;  %v2236_v3 = vld [vmem:[#allocation2 + $0xad] sm:$0xff] }
 0x237   : > { %2616 = vrot.lane.b32.xlu0 %v2514_v11, %s4437_s20  ;;  %v2235_v11 = vld [vmem:[#allocation2 + $0xa5] sm:$0xff] }
 0x238   : > { %v1768_v5 = vpop.permute.xlu1 %1767 }
 0x239   : > { %v1766_v9 = vpop.permute.xlu0 %1765  ;;  %1897 = vst.msk [vmem:[#allocation3 + $0x78] sm:$0xff] %vm1881_vm6, %v1768_v5  ;;  %v2525_v5 = vld [vmem:[#allocation2 + $0xae] sm:$0xff] }
 0x23a   : > { %1896 = vst.msk [vmem:[#allocation3 + $0x70] sm:$0xff] %vm1881_vm6, %v1766_v9  ;;  %2044 = vrot.lane.b32.xlu1 %v5237_v13, %s4435_s6 }
 0x23b   : > { %2042 = vrot.lane.b32.xlu0 %v5239_v17, %s4435_s6 }
 0x23c   : > { %v1772_v15 = vpop.permute.xlu1 %1771 }
 0x23d   : > { %v1770_v30 = vpop.permute.xlu0 %1769  ;;  %1899 = vst.msk [vmem:[#allocation3 + $0x88] sm:$0xff] %vm1881_vm6, %v1772_v15 }
 0x23e   : > { %1898 = vst.msk [vmem:[#allocation3 + $0x80] sm:$0xff] %vm1881_vm6, %v1770_v30  ;;  %2333 = vrot.lane.b32.xlu1 %v2228_v47, %s4436_s14  ;;  %v2524_v47 = vld [vmem:[#allocation2 + $0xa6] sm:$0xff] }
 0x23f   : > { %2331 = vrot.lane.b32.xlu0 %v2227_v18, %s4436_s14  ;;  %v2238_v18 = vld [vmem:[#allocation2 + $0xbd] sm:$0xff] }
 0x240   : > { %v1776_v55 = vpop.permute.xlu1 %1775 }
 0x241   : > { %v1774_v38 = vpop.permute.xlu0 %1773  ;;  %1901 = vst.msk [vmem:[#allocation3 + $0x98] sm:$0xff] %vm1881_vm6, %v1776_v55 }
 0x242   : > { %1900 = vst.msk [vmem:[#allocation3 + $0x90] sm:$0xff] %vm1881_vm6, %v1774_v38  ;;  %2622 = vrot.lane.b32.xlu1 %v2517_v51, %s4437_s20  ;;  %v2237_v51 = vld [vmem:[#allocation2 + $0xb5] sm:$0xff] }
 0x243   : > { %2620 = vrot.lane.b32.xlu0 %v2516_v34, %s4437_s20  ;;  %v2527_v34 = vld [vmem:[#allocation2 + $0xbe] sm:$0xff] }
 0x244   : > { %v1780_v13 = vpop.permute.xlu1 %1779 }
 0x245   : > { %v1778_v17 = vpop.permute.xlu0 %1777  ;;  %1903 = vst.msk [vmem:[#allocation3 + $0xa8] sm:$0xff] %vm1881_vm6, %v1780_v13  ;;  %v2526_v13 = vld [vmem:[#allocation2 + $0xb6] sm:$0xff] }
 0x246   : > { %1902 = vst.msk [vmem:[#allocation3 + $0xa0] sm:$0xff] %vm1881_vm6, %v1778_v17  ;;  %2048 = vrot.lane.b32.xlu1 %v5247_v28, %s4435_s6 }
 0x247   : > { %2046 = vrot.lane.b32.xlu0 %v5249_v32, %s4435_s6 }
 0x248   : > { %v1784_v46 = vpop.permute.xlu1 %1783 }
 0x249   : > { %v1782_v54 = vpop.permute.xlu0 %1781  ;;  %1905 = vst.msk [vmem:[#allocation3 + $0xb8] sm:$0xff] %vm1881_vm6, %v1784_v46 }
 0x24a   : > { %1904 = vst.msk [vmem:[#allocation3 + $0xb0] sm:$0xff] %vm1881_vm6, %v1782_v54  ;;  %2337 = vrot.lane.b32.xlu1 %v2230_v42, %s4436_s14  ;;  %v2240_v42 = vld [vmem:[#allocation2 + $0xcd] sm:$0xff] }
 0x24b   : > { %2335 = vrot.lane.b32.xlu0 %v2229_v50, %s4436_s14  ;;  %v2239_v50 = vld [vmem:[#allocation2 + $0xc5] sm:$0xff] }
 0x24c   : > { %v1788_v62 = vpop.permute.xlu1 %1787 }
 0x24d   : > { %v1786_v4 = vpop.permute.xlu0 %1785  ;;  %1907 = vst.msk [vmem:[#allocation3 + $0xc8] sm:$0xff] %vm1881_vm6, %v1788_v62 }
 0x24e   : > { %1906 = vst.msk [vmem:[#allocation3 + $0xc0] sm:$0xff] %vm1881_vm6, %v1786_v4  ;;  %2626 = vrot.lane.b32.xlu1 %v2519_v58, %s4437_s20  ;;  %v2529_v58 = vld [vmem:[#allocation2 + $0xce] sm:$0xff] }
 0x24f   : > { %2624 = vrot.lane.b32.xlu0 %v2518_v0, %s4437_s20 }
 0x250   : > { %v1792_v28 = vpop.permute.xlu1 %1791 }
 0x251   : > { %v1790_v32 = vpop.permute.xlu0 %1789  ;;  %1909 = vst.msk [vmem:[#allocation3 + $0xd8] sm:$0xff] %vm1881_vm6, %v1792_v28  ;;  %v2242_v28 = vld [vmem:[#allocation2 + $0xdd] sm:$0xff] }
 0x252   : > { %1908 = vst.msk [vmem:[#allocation3 + $0xd0] sm:$0xff] %vm1881_vm6, %v1790_v32  ;;  %2052 = vrot.lane.b32.xlu1 %v5257_v36, %s4435_s6 }
 0x253   : > { %2050 = vrot.lane.b32.xlu0 %v5259_v40, %s4435_s6 }
 0x254   : > { %v1796_v12 = vpop.permute.xlu1 %1795 }
 0x255   : > { %v1794_v20 = vpop.permute.xlu0 %1793  ;;  %1911 = vst.msk [vmem:[#allocation3 + $0xe8] sm:$0xff] %vm1881_vm6, %v1796_v12 }
 0x256   : > { %1910 = vst.msk [vmem:[#allocation3 + $0xe0] sm:$0xff] %vm1881_vm6, %v1794_v20  ;;  %2341 = vrot.lane.b32.xlu1 %v2232_v8, %s4436_s14  ;;  %v2241_v8 = vld [vmem:[#allocation2 + $0xd5] sm:$0xff] }
 0x257   : > { %2339 = vrot.lane.b32.xlu0 %v2231_v16, %s4436_s14 }
 0x258   : > { %v1800_v24 = vpop.permute.xlu1 %1799 }
 0x259   : > { %v1798_v29 = vpop.permute.xlu0 %1797  ;;  %1913 = vst.msk [vmem:[#allocation3 + $0xf8] sm:$0xff] %vm1881_vm6, %v1800_v24 }
 0x25a   : > { %1912 = vst.msk [vmem:[#allocation3 + $0xf0] sm:$0xff] %vm1881_vm6, %v1798_v29  ;;  %2630 = vrot.lane.b32.xlu1 %v2521_v22, %s4437_s20  ;;  %v2530_v22 = vld [vmem:[#allocation2 + $0xd6] sm:$0xff]  ;;  %v377_v29 = vld [vmem:[%s4617_s13 + $0x20] sm:$0xff] }
 0x25b   : > { %2628 = vrot.lane.b32.xlu0 %v2520_v26, %s4437_s20  ;;  %v376_v26 = vld [vmem:[%s4617_s13 + $0x18] sm:$0xff]  ;;  %385 = vst.msk [vmem:[#allocation2 + $0x1a0] sm:$0xff] %vm324_vm0, %v377_v29  ;;  %s4106_s13 = sshll.u32 %s6947_s27, 3 }
 0x25c   : > { %v1804_v36 = vpop.permute.xlu1 %1803  ;;  %384 = vst.msk [vmem:[#allocation2 + $0x198] sm:$0xff] %vm324_vm0, %v376_v26  ;;  %s5602_s28 = scalar_lea.vmem %s6746_s3, %s4106_s13  ;;  %s4370_s13 = sshll.u32 %s4440_s19, 4  ;;  %s4371_s13 = int_to_ptr.vmem [resolvable:$false] %s4370_s13 }
 0x25d   : > { %v1802_v40 = vpop.permute.xlu0 %1801  ;;  %1915 = vst.msk [vmem:[#allocation3 + $0x108] sm:$0xff] %vm1881_vm6, %v1804_v36  ;;  %v5675_v26 = vld [vmem:[%s5602_s28 + $0x38] sm:$0xff]  ;;  %s4372_s22 = scalar_lea.vmem %s4371_s13, 256 }
 0x25e   : > { %1914 = vst.msk [vmem:[#allocation3 + $0x100] sm:$0xff] %vm1881_vm6, %v1802_v40  ;;  %2056 = vrot.lane.b32.xlu1 %v5267_v44, %s4435_s6 }
 0x25f   : > { %2054 = vrot.lane.b32.xlu0 %v5269_v48, %s4435_s6 }
 0x260   : > { %v1808_v37 = vpop.permute.xlu1 %1807 }
 0x261   : > { %v1806_v1 = vpop.permute.xlu0 %1805  ;;  %1917 = vst.msk [vmem:[#allocation3 + $0x118] sm:$0xff] %vm1881_vm6, %v1808_v37 }
 0x262   : > { %1916 = vst.msk [vmem:[#allocation3 + $0x110] sm:$0xff] %vm1881_vm6, %v1806_v1  ;;  %2345 = vrot.lane.b32.xlu1 %v2234_v33, %s4436_s14 }
 0x263   : > { %2343 = vrot.lane.b32.xlu0 %v2233_v59, %s4436_s14  ;;  %v2244_v59 = vld [vmem:[#allocation2 + $0xed] sm:$0xff] }
 0x264   : > { %v1812_v49 = vpop.permute.xlu1 %1811 }
 0x265   : > { %v1810_v61 = vpop.permute.xlu0 %1809  ;;  %1919 = vst.msk [vmem:[#allocation3 + $0x128] sm:$0xff] %vm1881_vm6, %v1812_v49 }
 0x266   : > { %1918 = vst.msk [vmem:[#allocation3 + $0x120] sm:$0xff] %vm1881_vm6, %v1810_v61  ;;  %2634 = vrot.lane.b32.xlu1 %v2523_v41, %s4437_s20  ;;  %v2243_v41 = vld [vmem:[#allocation2 + $0xe5] sm:$0xff] }
 0x267   : > { %2632 = vrot.lane.b32.xlu0 %v2522_v57, %s4437_s20  ;;  %v2532_v61 = vld [vmem:[#allocation2 + $0xe6] sm:$0xff] }
 0x268   : > { %v1816_v44 = vpop.permute.xlu1 %1815 }
 0x269   : > { %v1814_v48 = vpop.permute.xlu0 %1813  ;;  %1921 = vst.msk [vmem:[#allocation3 + $0x138] sm:$0xff] %vm1881_vm6, %v1816_v44 }
 0x26a   : > { %1920 = vst.msk [vmem:[#allocation3 + $0x130] sm:$0xff] %vm1881_vm6, %v1814_v48  ;;  %2060 = vrot.lane.b32.xlu1 %v5277_v52, %s4435_s6 }
 0x26b   : > { %2058 = vrot.lane.b32.xlu0 %v5279_v56, %s4435_s6 }
 0x26c   : > { %v1820_v7 = vpop.permute.xlu1 %1819 }
 0x26d   : > { %v1818_v43 = vpop.permute.xlu0 %1817  ;;  %1923 = vst.msk [vmem:[#allocation3 + $0x148] sm:$0xff] %vm1881_vm6, %v1820_v7  ;;  %v5611_v7 = vld [vmem:[%s5602_s28] sm:$0xff] }
 0x26e   : > { %1922 = vst.msk [vmem:[#allocation3 + $0x140] sm:$0xff] %vm1881_vm6, %v1818_v43  ;;  %2349 = vrot.lane.b32.xlu1 %v2236_v3, %s4436_s14  ;;  %v5608_v3 = vld [vmem:[%s5602_s28 + $0x8] sm:$0xff] }
 0x26f   : > { %2347 = vrot.lane.b32.xlu0 %v2235_v11, %s4436_s14 }
 0x270   : > { %v1824_v9 = vpop.permute.xlu1 %1823 }
 0x271   : > { %v1822_v15 = vpop.permute.xlu0 %1821  ;;  %1925 = vst.msk [vmem:[#allocation3 + $0x158] sm:$0xff] %vm1881_vm6, %v1824_v9  ;;  %v3354_v9 = vsel %vm3352_vm11, %v5608_v3, 0.0 }
 0x272   : > { %1924 = vst.msk [vmem:[#allocation3 + $0x150] sm:$0xff] %vm1881_vm6, %v1822_v15  ;;  %2638 = vrot.lane.b32.xlu1 %v2525_v5, %s4437_s20  ;;  %v2246_v5 = vld [vmem:[#allocation2 + $0xfd] sm:$0xff] }
 0x273   : > { %2636 = vrot.lane.b32.xlu0 %v2524_v47, %s4437_s20  ;;  %v3353_v47 = vsel %vm3352_vm11, %v5611_v7, 0.0 }
 0x274   : > { %v1828_v52 = vpop.permute.xlu1 %1827 }
 0x275   : > { %v1826_v56 = vpop.permute.xlu0 %1825  ;;  %1927 = vst.msk [vmem:[#allocation3 + $0x168] sm:$0xff] %vm1881_vm6, %v1828_v52  ;;  %v2245_v52 = vld [vmem:[#allocation2 + $0xf5] sm:$0xff] }
 0x276   : > { %1926 = vst.msk [vmem:[#allocation3 + $0x160] sm:$0xff] %vm1881_vm6, %v1826_v56  ;;  %2064 = vrot.lane.b32.xlu1 %v5287_v60, %s4435_s6  ;;  %v5626_v56 = vld [vmem:[%s5602_s28 + $0x10] sm:$0xff] }
 0x277   : > { %2062 = vrot.lane.b32.xlu0 %v5289_v63, %s4435_s6 }
 0x278   : > { %v1832_v30 = vpop.permute.xlu1 %1831 }
 0x279   : > { %v1830_v55 = vpop.permute.xlu0 %1829  ;;  %1929 = vst.msk [vmem:[#allocation3 + $0x178] sm:$0xff] %vm1881_vm6, %v1832_v30  ;;  %v2535_v30 = vld [vmem:[#allocation2 + $0xfe] sm:$0xff] }
 0x27a   : > { %1928 = vst.msk [vmem:[#allocation3 + $0x170] sm:$0xff] %vm1881_vm6, %v1830_v55  ;;  %2353 = vrot.lane.b32.xlu1 %v2238_v18, %s4436_s14 }
 0x27b   : > { %2351 = vrot.lane.b32.xlu0 %v2237_v51, %s4436_s14  ;;  %v3356_v51 = vsel %vm3352_vm11, %v5626_v56, 0.0 }
 0x27c   : > { %v2029_v38 = vpop.permute.xlu1 %2028 }
 0x27d   : > { %v2027_v60 = vpop.permute.xlu0 %2026  ;;  %2172 = vst.msk [vmem:[#allocation3 + $0x8] sm:$0xff] %vm2170_vm7, %v2029_v38  ;;  %v5635_v38 = vld [vmem:[%s5602_s28 + $0x18] sm:$0xff] }
 0x27e   : > { %2171 = vst.msk [vmem:[#allocation3] sm:$0xff] %vm2170_vm7, %v2027_v60  ;;  %2642 = vrot.lane.b32.xlu1 %v2527_v34, %s4437_s20  ;;  %v2534_v34 = vld [vmem:[#allocation2 + $0xf6] sm:$0xff] }
 0x27f   : > { %2640 = vrot.lane.b32.xlu0 %v2526_v13, %s4437_s20 }
 0x280   : > { %v2033_v63 = vpop.permute.xlu1 %2032 }
 0x281   : > { %v2031_v17 = vpop.permute.xlu0 %2030  ;;  %2174 = vst.msk [vmem:[#allocation3 + $0x18] sm:$0xff] %vm2170_vm7, %v2033_v63  ;;  %v3358_v63 = vsel %vm3352_vm11, %v5635_v38, 0.0 }
 0x282   : > { %2173 = vst.msk [vmem:[#allocation3 + $0x10] sm:$0xff] %vm2170_vm7, %v2031_v17  ;;  %2068 = vrot.lane.b32.xlu1 %v5297_v2, %s4435_s6  ;;  %v2528_v2 = vld [vmem:[#allocation2 + $0xc6] sm:$0xff] }
 0x283   : > { %2066 = vrot.lane.b32.xlu0 %v5299_v6, %s4435_s6 }
 0x284   : > { %v2318_v46 = vpop.permute.xlu1 %2317 }
 0x285   : > { %v2316_v54 = vpop.permute.xlu0 %2315  ;;  %2461 = vst.msk [vmem:[#allocation3 + $0x8] sm:$0xff] %vm2459_vm8, %v2318_v46  ;;  %v5644_v46 = vld [vmem:[%s5602_s28 + $0x20] sm:$0xff] }
 0x286   : > { %2460 = vst.msk [vmem:[#allocation3] sm:$0xff] %vm2459_vm8, %v2316_v54  ;;  %2357 = vrot.lane.b32.xlu1 %v2240_v42, %s4436_s14 }
 0x287   : > { %2355 = vrot.lane.b32.xlu0 %v2239_v50, %s4436_s14 }
 0x288   : > { %v2607_v62 = vpop.permute.xlu1 %2606 }
 0x289   : > { %v2605_v0 = vpop.permute.xlu0 %2604  ;;  %2750 = vst.msk [vmem:[#allocation3 + $0x8] sm:$0xff] %vm2748_vm9, %v2607_v62  ;;  %v2248_v62 = vld [vmem:[#allocation2 + $0x10d] sm:$0xff] }
 0x28a   : > { %2749 = vst.msk [vmem:[#allocation3] sm:$0xff] %vm2748_vm9, %v2605_v0  ;;  %2646 = vrot.lane.b32.xlu1 %v2529_v58, %s4437_s20 }
 0x28b   : > { %2644 = vrot.lane.b32.xlu0 %v2528_v2, %s4437_s20  ;;  %v3360_v2 = vsel %vm3352_vm11, %v5644_v46, 0.0 }
 0x28c   : > { %v2322_v6 = vpop.permute.xlu1 %2321 }
 0x28d   : > { %v2320_v4 = vpop.permute.xlu0 %2319  ;;  %2463 = vst.msk [vmem:[#allocation3 + $0x18] sm:$0xff] %vm2459_vm8, %v2322_v6  ;;  %v2247_v6 = vld [vmem:[#allocation2 + $0x105] sm:$0xff] }
 0x28e   : > { %2462 = vst.msk [vmem:[#allocation3 + $0x10] sm:$0xff] %vm2459_vm8, %v2320_v4  ;;  %2072 = vrot.lane.b32.xlu1 %v5307_v10, %s4435_s6  ;;  %v2531_v10 = vld [vmem:[#allocation2 + $0xde] sm:$0xff]  ;;  %v5657_v4 = vld [vmem:[%s5602_s28 + $0x28] sm:$0xff] }
 0x28f   : > { %2070 = vrot.lane.b32.xlu0 %v5309_v14, %s4435_s6 }
 0x290   : > { %v2611_v32 = vpop.permute.xlu1 %2610  ;;  %v2798_v12 = vld [vmem:[#allocation3 + $0x8] sm:$0xff] }
 0x291   : > { %v2609_v16 = vpop.permute.xlu0 %2608  ;;  %2752 = vst.msk [vmem:[#allocation3 + $0x18] sm:$0xff] %vm2748_vm9, %v2611_v32  ;;  %v2797_v20 = vld [vmem:[#allocation3] sm:$0xff]  ;;  %v3362_v32 = vsel %vm3352_vm11, %v5657_v4, 0.0 }
 0x292   : > { %2751 = vst.msk [vmem:[#allocation3 + $0x10] sm:$0xff] %vm2748_vm9, %v2609_v16  ;;  %4223 = vmatprep.mubr.msk.f32.mxu0 %vm2850_vm10, %v2797_v20  ;;  %2361 = vrot.lane.b32.xlu1 %v2242_v28, %s4436_s14  ;;  %v5666_v16 = vld [vmem:[%s5602_s28 + $0x30] sm:$0xff] }
 0x293   : > { %2359 = vrot.lane.b32.xlu0 %v2241_v8, %s4436_s14  ;;  %4224 = vmatmul.mubr.msk.f32.vlgmr.msra.gmra.mrb[0].mxu0 %vm2850_vm10, %v2798_v12  ;;  %v2536_v12 = vld [vmem:[#allocation2 + $0x106] sm:$0xff] }
 0x294   : > { %v2037_v14 = vpop.permute.xlu1 %2036 }
 0x295   : > { %v2035_v24 = vpop.permute.xlu0 %2034  ;;  %2176 = vst.msk [vmem:[#allocation3 + $0x28] sm:$0xff] %vm2170_vm7, %v2037_v14  ;;  %v3364_v14 = vsel %vm3352_vm11, %v5666_v16, 0.0 }
 0x296   : > { %2175 = vst.msk [vmem:[#allocation3 + $0x20] sm:$0xff] %vm2170_vm7, %v2035_v24  ;;  %2650 = vrot.lane.b32.xlu1 %v2531_v10, %s4437_s20 }
 0x297   : > { %2648 = vrot.lane.b32.xlu0 %v2530_v22, %s4437_s20 }
 0x298   : > { %v2326_v36 = vpop.permute.xlu1 %2325  ;;  %v2800_v40 = vld [vmem:[#allocation3 + $0x18] sm:$0xff] }
 0x299   : > { %v2324_v33 = vpop.permute.xlu0 %2323  ;;  %2465 = vst.msk [vmem:[#allocation3 + $0x28] sm:$0xff] %vm2459_vm8, %v2326_v36  ;;  %v2799_v37 = vld [vmem:[#allocation3 + $0x10] sm:$0xff] }
 0x29a   : > { %2464 = vst.msk [vmem:[#allocation3 + $0x20] sm:$0xff] %vm2459_vm8, %v2324_v33  ;;  %4226 = vmatprep.mubr.msk.f32.mxu0 %vm2850_vm10, %v2799_v37  ;;  %2076 = vrot.lane.b32.xlu1 %v5317_v19, %s4435_s6  ;;  %v2533_v19 = vld [vmem:[#allocation2 + $0xee] sm:$0xff]  ;;  %v2250_v33 = vld [vmem:[#allocation2 + $0x11d] sm:$0xff]  ;;  %v3366_v37 = vsel %vm3352_vm11, %v5675_v26, 0.0 }
 0x29b   : > { %2074 = vrot.lane.b32.xlu0 %v5319_v21, %s4435_s6  ;;  %4227 = vmatmul.mubr.msk.f32.gmra.mrb[2].mxu0 %vm2850_vm10, %v2800_v40 }
 0x29c   : > { %v2615_v1 = vpop.permute.xlu1 %2614 }
 0x29d   : > { %v2613_v49 = vpop.permute.xlu0 %2612  ;;  %2754 = vst.msk [vmem:[#allocation3 + $0x28] sm:$0xff] %vm2748_vm9, %v2615_v1  ;;  %v2249_v1 = vld [vmem:[#allocation2 + $0x115] sm:$0xff] }
 0x29e   : > { %2753 = vst.msk [vmem:[#allocation3 + $0x20] sm:$0xff] %vm2748_vm9, %v2613_v49  ;;  %2365 = vrot.lane.b32.xlu1 %v2244_v59, %s4436_s14 }
 0x29f   : > { %2363 = vrot.lane.b32.xlu0 %v2243_v41, %s4436_s14  ;;  %v5688_v41 = vld [vmem:[%s5602_s28 + $0x40] sm:$0xff] }
 0x2a0   : > { %v2041_v57 = vpop.permute.xlu1 %2040 }
 0x2a1   : > { %v2039_v44 = vpop.permute.xlu0 %2038  ;;  %2178 = vst.msk [vmem:[#allocation3 + $0x38] sm:$0xff] %vm2170_vm7, %v2041_v57 }
 0x2a2   : > { %2177 = vst.msk [vmem:[#allocation3 + $0x30] sm:$0xff] %vm2170_vm7, %v2039_v44  ;;  %2654 = vrot.lane.b32.xlu1 %v2533_v19, %s4437_s20  ;;  %v3368_v19 = vsel %vm3352_vm11, %v5688_v41, 0.0  ;;  %v5697_v44 = vld [vmem:[%s5602_s28 + $0x48] sm:$0xff] }
 0x2a3   : > { %2652 = vrot.lane.b32.xlu0 %v2532_v61, %s4437_s20  ;;  %v2538_v61 = vld [vmem:[#allocation2 + $0x116] sm:$0xff] }
 0x2a4   : > { %v2330_v21 = vpop.permute.xlu1 %2329  ;;  %v2802_v48 = vld [vmem:[#allocation3 + $0x28] sm:$0xff] }
 0x2a5   : > { %v2328_v11 = vpop.permute.xlu0 %2327  ;;  %2467 = vst.msk [vmem:[#allocation3 + $0x38] sm:$0xff] %vm2459_vm8, %v2330_v21  ;;  %v2801_v43 = vld [vmem:[#allocation3 + $0x20] sm:$0xff] }
 0x2a6   : > { %2466 = vst.msk [vmem:[#allocation3 + $0x30] sm:$0xff] %vm2459_vm8, %v2328_v11  ;;  %4229 = vmatprep.mubr.msk.f32.mxu0 %vm2850_vm10, %v2801_v43  ;;  %2080 = vrot.lane.b32.xlu1 %v5327_v23, %s4435_s6  ;;  %v4438_v23 = vmov 0   ;;  %v3370_v11 = vsel %vm3352_vm11, %v5697_v44, 0.0 }
 0x2a7   : > { %2078 = vrot.lane.b32.xlu0 %v5329_v25, %s4435_s6  ;;  %4230 = vmatmul.mubr.msk.f32.gmra.mrb[4].mxu0 %vm2850_vm10, %v2802_v48  ;;  %v3355_v25 = vadd.f32 %v3354_v9, %v3353_v47  ;;  %v5706_v9 = vld [vmem:[%s5602_s28 + $0x50] sm:$0xff] }
 0x2a8   : > { %v2619_v15 = vpop.permute.xlu1 %2618  ;;  %4360 = vset.pattern.permute.xlu0 %v4438_v23  ;;  %4361 = vset.pattern.permute.xlu1 %v4438_v23  ;;  %v3372_v23 = vsel %vm3352_vm11, %v5706_v9, 0.0 }
 0x2a9   : > { %v2617_v18 = vpop.permute.xlu0 %2616  ;;  %2756 = vst.msk [vmem:[#allocation3 + $0x38] sm:$0xff] %vm2748_vm9, %v2619_v15  ;;  %v3357_v60 = vadd.f32 %v3356_v51, %v3355_v25  ;;  %v5719_v51 = vld [vmem:[%s5602_s28 + $0x58] sm:$0xff] }
 0x2aa   : > { %2755 = vst.msk [vmem:[#allocation3 + $0x30] sm:$0xff] %vm2748_vm9, %v2617_v18  ;;  %2369 = vrot.lane.b32.xlu1 %v2246_v5, %s4436_s14  ;;  %v2252_v18 = vld [vmem:[#allocation2 + $0x12d] sm:$0xff] }
 0x2ab   : > { %2367 = vrot.lane.b32.xlu0 %v2245_v52, %s4436_s14  ;;  %v3359_v58 = vadd.f32 %v3358_v63, %v3357_v60  ;;  %v2540_v60 = vld [vmem:[#allocation2 + $0x126] sm:$0xff] }
 0x2ac   : > { %v2045_v55 = vpop.permute.xlu1 %2044  ;;  %v5728_v63 = vld [vmem:[%s5602_s28 + $0x60] sm:$0xff] }
 0x2ad   : > { %v2043_v13 = vpop.permute.xlu0 %2042  ;;  %2180 = vst.msk [vmem:[#allocation3 + $0x48] sm:$0xff] %vm2170_vm7, %v2045_v55 }
 0x2ae   : > { %2179 = vst.msk [vmem:[#allocation3 + $0x40] sm:$0xff] %vm2170_vm7, %v2043_v13  ;;  %2658 = vrot.lane.b32.xlu1 %v2535_v30, %s4437_s20  ;;  %v2251_v30 = vld [vmem:[#allocation2 + $0x125] sm:$0xff] }
 0x2af   : > { %2656 = vrot.lane.b32.xlu0 %v2534_v34, %s4437_s20  ;;  %v3374_v34 = vsel %vm3352_vm11, %v5719_v51, 0.0 }
 0x2b0   : > { %v2334_v17 = vpop.permute.xlu1 %2333  ;;  %v2804_v42 = vld [vmem:[#allocation3 + $0x38] sm:$0xff] }
 0x2b1   : > { %v2332_v50 = vpop.permute.xlu0 %2331  ;;  %2469 = vst.msk [vmem:[#allocation3 + $0x48] sm:$0xff] %vm2459_vm8, %v2334_v17  ;;  %v2803_v54 = vld [vmem:[#allocation3 + $0x30] sm:$0xff] }
 0x2b2   : > { %2468 = vst.msk [vmem:[#allocation3 + $0x40] sm:$0xff] %vm2459_vm8, %v2332_v50  ;;  %4232 = vmatprep.mubr.msk.f32.mxu0 %vm2850_vm10, %v2803_v54  ;;  %2084 = vrot.lane.b32.xlu1 %v5337_v27, %s4435_s6  ;;  %v3361_v27 = vadd.f32 %v3360_v2, %v3359_v58  ;;  %v3376_v50 = vsel %vm3352_vm11, %v5728_v63, 0.0 }
 0x2b3   : > { %2082 = vrot.lane.b32.xlu0 %v5339_v31, %s4435_s6  ;;  %4233 = vmatmul.mubr.msk.f32.gmra.mrb[6].mxu0 %vm2850_vm10, %v2804_v42  ;;  %v2537_v31 = vld [vmem:[#allocation2 + $0x10e] sm:$0xff] }
 0x2b4   : > { %v2623_v0 = vpop.permute.xlu1 %2622  ;;  %v3363_v10 = vadd.f32 %v3362_v32, %v3361_v27  ;;  %v4365_v27 = vld [vmem:[#allocation2 + $0x134] sm:$0xff] }
 0x2b5   : > { %v2621_v28 = vpop.permute.xlu0 %2620  ;;  %2758 = vst.msk [vmem:[#allocation3 + $0x48] sm:$0xff] %vm2748_vm9, %v2623_v0 }
 0x2b6   : > { %2757 = vst.msk [vmem:[#allocation3 + $0x40] sm:$0xff] %vm2748_vm9, %v2621_v28  ;;  %2373 = vrot.lane.b32.xlu1 %v2248_v62, %s4436_s14  ;;  %v3365_v40 = vadd.f32 %v3364_v14, %v3363_v10  ;;  %v5737_v62 = vld [vmem:[%s5602_s28 + $0x68] sm:$0xff] }
 0x2b7   : > { %2371 = vrot.lane.b32.xlu0 %v2247_v6, %s4436_s14  ;;  %v4364_v6 = vld [vmem:[#allocation2 + $0x13c] sm:$0xff]  ;;  %v3378_v32 = vsel %vm3352_vm11, %v5737_v62, 0.0 }
 0x2b8   : > { %v2049_v8 = vpop.permute.xlu1 %2048 }
 0x2b9   : > { %v2047_v20 = vpop.permute.xlu0 %2046  ;;  %2182 = vst.msk [vmem:[#allocation3 + $0x58] sm:$0xff] %vm2170_vm7, %v2049_v8 }
 0x2ba   : > { %2181 = vst.msk [vmem:[#allocation3 + $0x50] sm:$0xff] %vm2170_vm7, %v2047_v20  ;;  %2662 = vrot.lane.b32.xlu1 %v2537_v31, %s4437_s20  ;;  %v2254_v31 = vld [vmem:[#allocation2 + $0x13d] sm:$0xff]  ;;  %v5748_v20 = vld [vmem:[%s5602_s28 + $0x70] sm:$0xff] }
 0x2bb   : > { %2660 = vrot.lane.b32.xlu0 %v2536_v12, %s4437_s20  ;;  %v2253_v12 = vld [vmem:[#allocation2 + $0x135] sm:$0xff] }
 0x2bc   : > { %v2338_v22 = vpop.permute.xlu1 %2337  ;;  %v2806_v24 = vld [vmem:[#allocation3 + $0x48] sm:$0xff] }
 0x2bd   : > { %v2336_v29 = vpop.permute.xlu0 %2335  ;;  %2471 = vst.msk [vmem:[#allocation3 + $0x58] sm:$0xff] %vm2459_vm8, %v2338_v22  ;;  %v2805_v36 = vld [vmem:[#allocation3 + $0x40] sm:$0xff] }
 0x2be   : > { %2470 = vst.msk [vmem:[#allocation3 + $0x50] sm:$0xff] %vm2459_vm8, %v2336_v29  ;;  %4235 = vmatprep.mubr.msk.f32.mxu0 %vm2850_vm10, %v2805_v36  ;;  %2088 = vrot.lane.b32.xlu1 %v5347_v35, %s4435_s6  ;;  %v3367_v35 = vadd.f32 %v3366_v37, %v3365_v40  ;;  %v2543_v22 = vld [vmem:[#allocation2 + $0x13e] sm:$0xff]  ;;  %v2542_v36 = vld [vmem:[#allocation2 + $0x136] sm:$0xff] }
 0x2bf   : > { %2086 = vrot.lane.b32.xlu0 %v5349_v39, %s4435_s6  ;;  %4236 = vmatmul.mubr.msk.f32.gmra.mrb[8].mxu0 %vm2850_vm10, %v2806_v24  ;;  %v2539_v39 = vld [vmem:[#allocation2 + $0x11e] sm:$0xff]  ;;  %v3380_v24 = vsel %vm3352_vm11, %v5748_v20, 0.0 }
 0x2c0   : > { %v2627_v59 = vpop.permute.xlu1 %2626  ;;  %v3369_v48 = vadd.f32 %v3368_v19, %v3367_v35  ;;  %v5757_v40 = vld [vmem:[%s5602_s28 + $0x78] sm:$0xff]  ;;  %v1966_v35 = vld [vmem:[#allocation2 + $0x144] sm:$0xff] }
 0x2c1   : > { %v2625_v49 = vpop.permute.xlu0 %2624  ;;  %2760 = vst.msk [vmem:[#allocation3 + $0x58] sm:$0xff] %vm2748_vm9, %v2627_v59  ;;  %v1967_v59 = vld [vmem:[#allocation2 + $0x14c] sm:$0xff]  ;;  %v5766_v19 = vld [vmem:[%s5602_s28 + $0x80] sm:$0xff] }
 0x2c2   : > { %2759 = vst.msk [vmem:[#allocation3 + $0x50] sm:$0xff] %vm2748_vm9, %v2625_v49  ;;  %2377 = vrot.lane.b32.xlu1 %v2250_v33, %s4436_s14  ;;  %v3371_v52 = vadd.f32 %v3370_v11, %v3369_v48  ;;  %v2256_v48 = vld [vmem:[#allocation2 + $0x14d] sm:$0xff]  ;;  %v3384_v11 = vsel %vm3352_vm11, %v5766_v19, 0.0 }
 0x2c3   : > { %2375 = vrot.lane.b32.xlu0 %v2249_v1, %s4436_s14  ;;  %v3382_v1 = vsel %vm3352_vm11, %v5757_v40, 0.0 }
 0x2c4   : > { %v2053_v57 = vpop.permute.xlu1 %2052 }
 0x2c5   : > { %v2051_v21 = vpop.permute.xlu0 %2050  ;;  %2184 = vst.msk [vmem:[#allocation3 + $0x68] sm:$0xff] %vm2170_vm7, %v2053_v57 }
 0x2c6   : > { %2183 = vst.msk [vmem:[#allocation3 + $0x60] sm:$0xff] %vm2170_vm7, %v2051_v21  ;;  %2666 = vrot.lane.b32.xlu1 %v2539_v39, %s4437_s20 }
 0x2c7   : > { %2664 = vrot.lane.b32.xlu0 %v2538_v61, %s4437_s20 }
 0x2c8   : > { %v2342_v43 = vpop.permute.xlu1 %2341  ;;  %v2808_v5 = vld [vmem:[#allocation3 + $0x58] sm:$0xff] }
 0x2c9   : > { %v2340_v47 = vpop.permute.xlu0 %2339  ;;  %2473 = vst.msk [vmem:[#allocation3 + $0x68] sm:$0xff] %vm2459_vm8, %v2342_v43  ;;  %v2807_v15 = vld [vmem:[#allocation3 + $0x50] sm:$0xff] }
 0x2ca   : > { %2472 = vst.msk [vmem:[#allocation3 + $0x60] sm:$0xff] %vm2459_vm8, %v2340_v47  ;;  %4238 = vmatprep.mubr.msk.f32.mxu0 %vm2850_vm10, %v2807_v15  ;;  %2092 = vrot.lane.b32.xlu1 %v5357_v45, %s4435_s6  ;;  %v3373_v45 = vadd.f32 %v3372_v23, %v3371_v52  ;;  %v5777_v47 = vld [vmem:[%s5602_s28 + $0x88] sm:$0xff] }
 0x2cb   : > { %2090 = vrot.lane.b32.xlu0 %v5359_v53, %s4435_s6  ;;  %4239 = vmatmul.mubr.msk.f32.gmra.mrb[10].mxu0 %vm2850_vm10, %v2808_v5  ;;  %v2541_v53 = vld [vmem:[#allocation2 + $0x12e] sm:$0xff]  ;;  %v2255_v5 = vld [vmem:[#allocation2 + $0x145] sm:$0xff]  ;;  %v3386_v23 = vsel %vm3352_vm11, %v5777_v47, 0.0 }
 0x2cc   : > { %v2631_v25 = vpop.permute.xlu1 %2630  ;;  %v3375_v42 = vadd.f32 %v3374_v34, %v3373_v45  ;;  %v1969_v34 = vld [vmem:[#allocation2 + $0x15c] sm:$0xff] }
 0x2cd   : > { %v2629_v55 = vpop.permute.xlu0 %2628  ;;  %2762 = vst.msk [vmem:[#allocation3 + $0x68] sm:$0xff] %vm2748_vm9, %v2631_v25 }
 0x2ce   : > { %2761 = vst.msk [vmem:[#allocation3 + $0x60] sm:$0xff] %vm2748_vm9, %v2629_v55  ;;  %2381 = vrot.lane.b32.xlu1 %v2252_v18, %s4436_s14  ;;  %v3377_v28 = vadd.f32 %v3376_v50, %v3375_v42  ;;  %v2545_v18 = vld [vmem:[#allocation2 + $0x14e] sm:$0xff]  ;;  %v5795_v50 = vld [vmem:[%s5602_s28 + $0x98] sm:$0xff] }
 0x2cf   : > { %2379 = vrot.lane.b32.xlu0 %v2251_v30, %s4436_s14  ;;  %v2544_v30 = vld [vmem:[#allocation2 + $0x146] sm:$0xff]  ;;  %v5786_v55 = vld [vmem:[%s5602_s28 + $0x90] sm:$0xff] }
 0x2d0   : > { %v2057_v13 = vpop.permute.xlu1 %2056  ;;  %v3379_v14 = vadd.f32 %v3378_v32, %v3377_v28 }
 0x2d1   : > { %v2055_v17 = vpop.permute.xlu0 %2054  ;;  %2186 = vst.msk [vmem:[#allocation3 + $0x78] sm:$0xff] %vm2170_vm7, %v2057_v13  ;;  %v3388_v13 = vsel %vm3352_vm11, %v5786_v55, 0.0 }
 0x2d2   : > { %2185 = vst.msk [vmem:[#allocation3 + $0x70] sm:$0xff] %vm2170_vm7, %v2055_v17  ;;  %2670 = vrot.lane.b32.xlu1 %v2541_v53, %s4437_s20  ;;  %v3381_v37 = vadd.f32 %v3380_v24, %v3379_v14  ;;  %v1968_v17 = vld [vmem:[#allocation2 + $0x154] sm:$0xff]  ;;  %v5815_v24 = vld [vmem:[%s5602_s28 + $0xa8] sm:$0xff] }
 0x2d3   : > { %2668 = vrot.lane.b32.xlu0 %v2540_v60, %s4437_s20 }
 0x2d4   : > { %v2346_v54 = vpop.permute.xlu1 %2345  ;;  %v2810_v58 = vld [vmem:[#allocation3 + $0x68] sm:$0xff]  ;;  %v3383_v21 = vadd.f32 %v3382_v1, %v3381_v37  ;;  %v3394_v37 = vsel %vm3352_vm11, %v5815_v24, 0.0 }
 0x2d5   : > { %v2344_v2 = vpop.permute.xlu0 %2343  ;;  %2475 = vst.msk [vmem:[#allocation3 + $0x78] sm:$0xff] %vm2459_vm8, %v2346_v54  ;;  %v2809_v0 = vld [vmem:[#allocation3 + $0x60] sm:$0xff] }
 0x2d6   : > { %2474 = vst.msk [vmem:[#allocation3 + $0x70] sm:$0xff] %vm2459_vm8, %v2344_v2  ;;  %4241 = vmatprep.mubr.msk.f32.mxu0 %vm2850_vm10, %v2809_v0  ;;  %2096 = vrot.lane.b32.xlu1 %v4364_v6, %s4435_s6  ;;  %v3385_v52 = vadd.f32 %v3384_v11, %v3383_v21  ;;  %v2258_v0 = vld [vmem:[#allocation2 + $0x15d] sm:$0xff]  ;;  %v3390_v6 = vsel %vm3352_vm11, %v5795_v50, 0.0  ;;  %v2260_v21 = vld [vmem:[#allocation2 + $0x16d] sm:$0xff] }
 0x2d7   : > { %2094 = vrot.lane.b32.xlu0 %v4365_v27, %s4435_s6  ;;  %4242 = vmatmul.mubr.msk.f32.gmra.mrb[12].mxu0 %vm2850_vm10, %v2810_v58  ;;  %v2257_v27 = vld [vmem:[#allocation2 + $0x155] sm:$0xff]  ;;  %v1970_v1 = vld [vmem:[#allocation2 + $0x164] sm:$0xff] }
 0x2d8   : > { %v2635_v8 = vpop.permute.xlu1 %2634  ;;  %v3387_v53 = vadd.f32 %v3386_v23, %v3385_v52 }
 0x2d9   : > { %v2633_v10 = vpop.permute.xlu0 %2632  ;;  %2764 = vst.msk [vmem:[#allocation3 + $0x78] sm:$0xff] %vm2748_vm9, %v2635_v8 }
 0x2da   : > { %2763 = vst.msk [vmem:[#allocation3 + $0x70] sm:$0xff] %vm2748_vm9, %v2633_v10  ;;  %2385 = vrot.lane.b32.xlu1 %v2254_v31, %s4436_s14  ;;  %v3389_v2 = vadd.f32 %v3388_v13, %v3387_v53  ;;  %v5806_v31 = vld [vmem:[%s5602_s28 + $0xa0] sm:$0xff] }
 0x2db   : > { %2383 = vrot.lane.b32.xlu0 %v2253_v12, %s4436_s14  ;;  %v2547_v12 = vld [vmem:[#allocation2 + $0x15e] sm:$0xff]  ;;  %v3392_v10 = vsel %vm3352_vm11, %v5806_v31, 0.0 }
 0x2dc   : > { %v2061_v29 = vpop.permute.xlu1 %2060  ;;  %v3391_v8 = vadd.f32 %v3390_v6, %v3389_v2  ;;  %v1973_v13 = vld [vmem:[#allocation2 + $0x17c] sm:$0xff] }
 0x2dd   : > { %v2059_v33 = vpop.permute.xlu0 %2058  ;;  %2188 = vst.msk [vmem:[#allocation3 + $0x88] sm:$0xff] %vm2170_vm7, %v2061_v29 }
 0x2de   : > { %2187 = vst.msk [vmem:[#allocation3 + $0x80] sm:$0xff] %vm2170_vm7, %v2059_v33  ;;  %2674 = vrot.lane.b32.xlu1 %v2543_v22, %s4437_s20  ;;  %v2546_v22 = vld [vmem:[#allocation2 + $0x156] sm:$0xff]  ;;  %v1971_v33 = vld [vmem:[#allocation2 + $0x16c] sm:$0xff] }
 0x2df   : > { %2672 = vrot.lane.b32.xlu0 %v2542_v36, %s4437_s20  ;;  %v3393_v36 = vadd.f32 %v3392_v10, %v3391_v8  ;;  %v2261_v8 = vld [vmem:[#allocation2 + $0x175] sm:$0xff] }
 0x2e0   : > { %v2350_v49 = vpop.permute.xlu1 %2349  ;;  %v2812_v39 = vld [vmem:[#allocation3 + $0x78] sm:$0xff] }
 0x2e1   : > { %v2348_v57 = vpop.permute.xlu0 %2347  ;;  %2477 = vst.msk [vmem:[#allocation3 + $0x88] sm:$0xff] %vm2459_vm8, %v2350_v49  ;;  %v2811_v61 = vld [vmem:[#allocation3 + $0x70] sm:$0xff] }
 0x2e2   : > { %2476 = vst.msk [vmem:[#allocation3 + $0x80] sm:$0xff] %vm2459_vm8, %v2348_v57  ;;  %4244 = vmatprep.mubr.msk.f32.mxu0 %vm2850_vm10, %v2811_v61  ;;  %2100 = vrot.lane.b32.xlu1 %v1967_v59, %s4435_s6  ;;  %v3395_v61 = vadd.f32 %v3394_v37, %v3393_v36  ;;  %v5873_v37 = vld [vmem:[%s5602_s28 + $0xd8] sm:$0xff] }
 0x2e3   : > { %2098 = vrot.lane.b32.xlu0 %v1966_v35, %s4435_s6  ;;  %4245 = vmatmul.mubr.msk.f32.gmra.mrb[14].mxu0 %vm2850_vm10, %v2812_v39  ;;  %v5824_v35 = vld [vmem:[%s5602_s28 + $0xb0] sm:$0xff] }
 0x2e4   : > { %v2639_v43 = vpop.permute.xlu1 %2638 }
 0x2e5   : > { %v2637_v15 = vpop.permute.xlu0 %2636  ;;  %2766 = vst.msk [vmem:[#allocation3 + $0x88] sm:$0xff] %vm2748_vm9, %v2639_v43  ;;  %v2259_v43 = vld [vmem:[#allocation2 + $0x165] sm:$0xff] }
 0x2e6   : > { %2765 = vst.msk [vmem:[#allocation3 + $0x80] sm:$0xff] %vm2748_vm9, %v2637_v15  ;;  %2389 = vrot.lane.b32.xlu1 %v2256_v48, %s4436_s14  ;;  %v3396_v48 = vsel %vm3352_vm11, %v5824_v35, 0.0 }
 0x2e7   : > { %2387 = vrot.lane.b32.xlu0 %v2255_v5, %s4436_s14  ;;  %v5835_v5 = vld [vmem:[%s5602_s28 + $0xb8] sm:$0xff]  ;;  %v3397_v52 = vadd.f32 %v3396_v48, %v3395_v61  ;;  %v1974_v61 = vld [vmem:[#allocation2 + $0x184] sm:$0xff] }
 0x2e8   : > { %v2065_v25 = vpop.permute.xlu1 %2064  ;;  %v3398_v23 = vsel %vm3352_vm11, %v5835_v5, 0.0  ;;  %v5882_v48 = vld [vmem:[%s5602_s28 + $0xe0] sm:$0xff] }
 0x2e9   : > { %v2063_v45 = vpop.permute.xlu0 %2062  ;;  %2190 = vst.msk [vmem:[#allocation3 + $0x98] sm:$0xff] %vm2170_vm7, %v2065_v25 }
 0x2ea   : > { %2189 = vst.msk [vmem:[#allocation3 + $0x90] sm:$0xff] %vm2170_vm7, %v2063_v45  ;;  %2678 = vrot.lane.b32.xlu1 %v2545_v18, %s4437_s20  ;;  %v2549_v18 = vld [vmem:[#allocation2 + $0x16e] sm:$0xff]  ;;  %v5844_v45 = vld [vmem:[%s5602_s28 + $0xc0] sm:$0xff] }
 0x2eb   : > { %2676 = vrot.lane.b32.xlu0 %v2544_v30, %s4437_s20  ;;  %v2548_v30 = vld [vmem:[#allocation2 + $0x166] sm:$0xff] }
 0x2ec   : > { %v2354_v60 = vpop.permute.xlu1 %2353  ;;  %v2814_v42 = vld [vmem:[#allocation3 + $0x88] sm:$0xff] }
 0x2ed   : > { %v2352_v54 = vpop.permute.xlu0 %2351  ;;  %2479 = vst.msk [vmem:[#allocation3 + $0x98] sm:$0xff] %vm2459_vm8, %v2354_v60  ;;  %v2813_v58 = vld [vmem:[#allocation3 + $0x80] sm:$0xff]  ;;  %v3400_v60 = vsel %vm3352_vm11, %v5844_v45, 0.0 }
 0x2ee   : > { %2478 = vst.msk [vmem:[#allocation3 + $0x90] sm:$0xff] %vm2459_vm8, %v2352_v54  ;;  %4247 = vmatprep.mubr.msk.f32.mxu0 %vm2850_vm10, %v2813_v58  ;;  %2104 = vrot.lane.b32.xlu1 %v1969_v34, %s4435_s6  ;;  %v3399_v34 = vadd.f32 %v3398_v23, %v3397_v52  ;;  %v5853_v58 = vld [vmem:[%s5602_s28 + $0xc8] sm:$0xff] }
 0x2ef   : > { %2102 = vrot.lane.b32.xlu0 %v1968_v17, %s4435_s6  ;;  %4248 = vmatmul.mubr.msk.f32.gmra.mrb[16].mxu0 %vm2850_vm10, %v2814_v42  ;;  %v1972_v42 = vld [vmem:[#allocation2 + $0x174] sm:$0xff] }
 0x2f0   : > { %v2643_v28 = vpop.permute.xlu1 %2642  ;;  %v3401_v6 = vadd.f32 %v3400_v60, %v3399_v34  ;;  %v2264_v52 = vld [vmem:[#allocation2 + $0x18d] sm:$0xff] }
 0x2f1   : > { %v2641_v32 = vpop.permute.xlu0 %2640  ;;  %2768 = vst.msk [vmem:[#allocation3 + $0x98] sm:$0xff] %vm2748_vm9, %v2643_v28  ;;  %v2262_v28 = vld [vmem:[#allocation2 + $0x17d] sm:$0xff] }
 0x2f2   : > { %2767 = vst.msk [vmem:[#allocation3 + $0x90] sm:$0xff] %vm2748_vm9, %v2641_v32  ;;  %2393 = vrot.lane.b32.xlu1 %v2258_v0, %s4436_s14 }
 0x2f3   : > { %2391 = vrot.lane.b32.xlu0 %v2257_v27, %s4436_s14  ;;  %v3402_v27 = vsel %vm3352_vm11, %v5853_v58, 0.0 }
 0x2f4   : > { %v2069_v14 = vpop.permute.xlu1 %2068 }
 0x2f5   : > { %v2067_v29 = vpop.permute.xlu0 %2066  ;;  %2192 = vst.msk [vmem:[#allocation3 + $0xa8] sm:$0xff] %vm2170_vm7, %v2069_v14  ;;  %v3403_v14 = vadd.f32 %v3402_v27, %v3401_v6  ;;  %v1977_v6 = vld [vmem:[#allocation2 + $0x19c] sm:$0xff] }
 0x2f6   : > { %2191 = vst.msk [vmem:[#allocation3 + $0xa0] sm:$0xff] %vm2170_vm7, %v2067_v29  ;;  %2682 = vrot.lane.b32.xlu1 %v2547_v12, %s4437_s20  ;;  %v5864_v12 = vld [vmem:[%s5602_s28 + $0xd0] sm:$0xff] }
 0x2f7   : > { %2680 = vrot.lane.b32.xlu0 %v2546_v22, %s4437_s20  ;;  %v2551_v22 = vld [vmem:[#allocation2 + $0x17e] sm:$0xff]  ;;  %v3404_v29 = vsel %vm3352_vm11, %v5864_v12, 0.0 }
 0x2f8   : > { %v2358_v59 = vpop.permute.xlu1 %2357  ;;  %v2816_v49 = vld [vmem:[#allocation3 + $0x98] sm:$0xff] }
 0x2f9   : > { %v2356_v39 = vpop.permute.xlu0 %2355  ;;  %2481 = vst.msk [vmem:[#allocation3 + $0xa8] sm:$0xff] %vm2459_vm8, %v2358_v59  ;;  %v2815_v57 = vld [vmem:[#allocation3 + $0x90] sm:$0xff] }
 0x2fa   : > { %2480 = vst.msk [vmem:[#allocation3 + $0xa0] sm:$0xff] %vm2459_vm8, %v2356_v39  ;;  %4250 = vmatprep.mubr.msk.f32.mxu0 %vm2850_vm10, %v2815_v57  ;;  %2108 = vrot.lane.b32.xlu1 %v1971_v33, %s4435_s6  ;;  %v2550_v33 = vld [vmem:[#allocation2 + $0x176] sm:$0xff]  ;;  %v3406_v39 = vsel %vm3352_vm11, %v5873_v37, 0.0 }
 0x2fb   : > { %2106 = vrot.lane.b32.xlu0 %v1970_v1, %s4435_s6  ;;  %4251 = vmatmul.mubr.msk.f32.gmra.mrb[18].mxu0 %vm2850_vm10, %v2816_v49  ;;  %v3405_v1 = vadd.f32 %v3404_v29, %v3403_v14  ;;  %v1975_v49 = vld [vmem:[#allocation2 + $0x18c] sm:$0xff] }
 0x2fc   : > { %v2647_v11 = vpop.permute.xlu1 %2646 }
 0x2fd   : > { %v2645_v15 = vpop.permute.xlu0 %2644  ;;  %2770 = vst.msk [vmem:[#allocation3 + $0xa8] sm:$0xff] %vm2748_vm9, %v2647_v11 }
 0x2fe   : > { %2769 = vst.msk [vmem:[#allocation3 + $0xa0] sm:$0xff] %vm2748_vm9, %v2645_v15  ;;  %2397 = vrot.lane.b32.xlu1 %v2260_v21, %s4436_s14  ;;  %v3407_v15 = vadd.f32 %v3406_v39, %v3405_v1  ;;  %v2265_v1 = vld [vmem:[#allocation2 + $0x195] sm:$0xff] }
 0x2ff   : > { %2395 = vrot.lane.b32.xlu0 %v2259_v43, %s4436_s14 }
 0x300   : > { %v2073_v25 = vpop.permute.xlu1 %2072 }
 0x301   : > { %v2071_v53 = vpop.permute.xlu0 %2070  ;;  %2194 = vst.msk [vmem:[#allocation3 + $0xb8] sm:$0xff] %vm2170_vm7, %v2073_v25  ;;  %v2263_v25 = vld [vmem:[#allocation2 + $0x185] sm:$0xff] }
 0x302   : > { %2193 = vst.msk [vmem:[#allocation3 + $0xb0] sm:$0xff] %vm2170_vm7, %v2071_v53  ;;  %2686 = vrot.lane.b32.xlu1 %v2549_v18, %s4437_s20  ;;  %v3408_v18 = vsel %vm3352_vm11, %v5882_v48, 0.0 }
 0x303   : > { %2684 = vrot.lane.b32.xlu0 %v2548_v30, %s4437_s20  ;;  %v5893_v30 = vld [vmem:[%s5602_s28 + $0xe8] sm:$0xff]  ;;  %v3409_v34 = vadd.f32 %v3408_v18, %v3407_v15 }
 0x304   : > { %v2362_v17 = vpop.permute.xlu1 %2361  ;;  %v2818_v54 = vld [vmem:[#allocation3 + $0xa8] sm:$0xff]  ;;  %v3410_v60 = vsel %vm3352_vm11, %v5893_v30, 0.0 }
 0x305   : > { %v2360_v2 = vpop.permute.xlu0 %2359  ;;  %2483 = vst.msk [vmem:[#allocation3 + $0xb8] sm:$0xff] %vm2459_vm8, %v2362_v17  ;;  %v2817_v0 = vld [vmem:[#allocation3 + $0xa0] sm:$0xff]  ;;  %v5931_v15 = vld [vmem:[%s5602_s28 + $0x108] sm:$0xff] }
 0x306   : > { %2482 = vst.msk [vmem:[#allocation3 + $0xb0] sm:$0xff] %vm2459_vm8, %v2360_v2  ;;  %4253 = vmatprep.mubr.msk.f32.mxu0 %vm2850_vm10, %v2817_v0  ;;  %2112 = vrot.lane.b32.xlu1 %v1973_v13, %s4435_s6  ;;  %v2553_v13 = vld [vmem:[#allocation2 + $0x18e] sm:$0xff]  ;;  %v3411_v0 = vadd.f32 %v3410_v60, %v3409_v34 }
 0x307   : > { %2110 = vrot.lane.b32.xlu0 %v1972_v42, %s4435_s6  ;;  %4254 = vmatmul.mubr.msk.f32.gmra.mrb[20].mxu0 %vm2850_vm10, %v2818_v54  ;;  %v2552_v42 = vld [vmem:[#allocation2 + $0x186] sm:$0xff]  ;;  %v5902_v54 = vld [vmem:[%s5602_s28 + $0xf0] sm:$0xff] }
 0x308   : > { %v2651_v32 = vpop.permute.xlu1 %2650  ;;  %v5940_v34 = vld [vmem:[%s5602_s28 + $0x110] sm:$0xff] }
 0x309   : > { %v2649_v10 = vpop.permute.xlu0 %2648  ;;  %2772 = vst.msk [vmem:[#allocation3 + $0xb8] sm:$0xff] %vm2748_vm9, %v2651_v32  ;;  %v1976_v32 = vld [vmem:[#allocation2 + $0x194] sm:$0xff] }
 0x30a   : > { %2771 = vst.msk [vmem:[#allocation3 + $0xb0] sm:$0xff] %vm2748_vm9, %v2649_v10  ;;  %2401 = vrot.lane.b32.xlu1 %v2262_v28, %s4436_s14  ;;  %v3412_v28 = vsel %vm3352_vm11, %v5902_v54, 0.0  ;;  %v5911_v10 = vld [vmem:[%s5602_s28 + $0xf8] sm:$0xff] }
 0x30b   : > { %2399 = vrot.lane.b32.xlu0 %v2261_v8, %s4436_s14  ;;  %v3413_v29 = vadd.f32 %v3412_v28, %v3411_v0  ;;  %v5951_v0 = vld [vmem:[%s5602_s28 + $0x118] sm:$0xff] }
 0x30c   : > { %v2077_v36 = vpop.permute.xlu1 %2076 }
 0x30d   : > { %v2075_v59 = vpop.permute.xlu0 %2074  ;;  %2196 = vst.msk [vmem:[#allocation3 + $0xc8] sm:$0xff] %vm2170_vm7, %v2077_v36  ;;  %v2266_v36 = vld [vmem:[#allocation2 + $0x19d] sm:$0xff] }
 0x30e   : > { %2195 = vst.msk [vmem:[#allocation3 + $0xc0] sm:$0xff] %vm2170_vm7, %v2075_v59  ;;  %2690 = vrot.lane.b32.xlu1 %v2551_v22, %s4437_s20 }
 0x30f   : > { %2688 = vrot.lane.b32.xlu0 %v2550_v33, %s4437_s20  ;;  %v3414_v33 = vsel %vm3352_vm11, %v5911_v10, 0.0 }
 0x310   : > { %v2366_v57 = vpop.permute.xlu1 %2365  ;;  %v2820_v21 = vld [vmem:[#allocation3 + $0xb8] sm:$0xff] }
 0x311   : > { %v2364_v11 = vpop.permute.xlu0 %2363  ;;  %2485 = vst.msk [vmem:[#allocation3 + $0xc8] sm:$0xff] %vm2459_vm8, %v2366_v57  ;;  %v2819_v43 = vld [vmem:[#allocation3 + $0xb0] sm:$0xff]  ;;  %v3415_v57 = vadd.f32 %v3414_v33, %v3413_v29 }
 0x312   : > { %2484 = vst.msk [vmem:[#allocation3 + $0xc0] sm:$0xff] %vm2459_vm8, %v2364_v11  ;;  %4256 = vmatprep.mubr.msk.f32.mxu0 %vm2850_vm10, %v2819_v43  ;;  %2116 = vrot.lane.b32.xlu1 %v1975_v49, %s4435_s6  ;;  %v5922_v49 = vld [vmem:[%s5602_s28 + $0x100] sm:$0xff]  ;;  %v2554_v43 = vld [vmem:[#allocation2 + $0x196] sm:$0xff] }
 0x313   : > { %2114 = vrot.lane.b32.xlu0 %v1974_v61, %s4435_s6  ;;  %4257 = vmatmul.mubr.msk.f32.gmra.mrb[22].mxu0 %vm2850_vm10, %v2820_v21  ;;  %v2555_v61 = vld [vmem:[#allocation2 + $0x19e] sm:$0xff]  ;;  %v3416_v21 = vsel %vm3352_vm11, %v5922_v49, 0.0 }
 0x314   : > { %v2655_v23 = vpop.permute.xlu1 %2654  ;;  %v3417_v18 = vadd.f32 %v3416_v21, %v3415_v57  ;;  %v5989_v57 = vld [vmem:[%s5602_s28 + $0x138] sm:$0xff] }
 0x315   : > { %v2653_v53 = vpop.permute.xlu0 %2652  ;;  %2774 = vst.msk [vmem:[#allocation3 + $0xc8] sm:$0xff] %vm2748_vm9, %v2655_v23  ;;  %v3418_v23 = vsel %vm3352_vm11, %v5931_v15, 0.0 }
 0x316   : > { %2773 = vst.msk [vmem:[#allocation3 + $0xc0] sm:$0xff] %vm2748_vm9, %v2653_v53  ;;  %2405 = vrot.lane.b32.xlu1 %v2264_v52, %s4436_s14 }
 0x317   : > { %2403 = vrot.lane.b32.xlu0 %v2263_v25, %s4436_s14 }
 0x318   : > { %v2081_v17 = vpop.permute.xlu1 %2080 }
 0x319   : > { %v2079_v2 = vpop.permute.xlu0 %2078  ;;  %2198 = vst.msk [vmem:[#allocation3 + $0xd8] sm:$0xff] %vm2170_vm7, %v2081_v17  ;;  %v3419_v17 = vadd.f32 %v3418_v23, %v3417_v18 }
 0x31a   : > { %2197 = vst.msk [vmem:[#allocation3 + $0xd0] sm:$0xff] %vm2170_vm7, %v2079_v2  ;;  %2694 = vrot.lane.b32.xlu1 %v2553_v13, %s4437_s20 }
 0x31b   : > { %2692 = vrot.lane.b32.xlu0 %v2552_v42, %s4437_s20  ;;  %v3420_v42 = vsel %vm3352_vm11, %v5940_v34, 0.0 }
 0x31c   : > { %v2370_v27 = vpop.permute.xlu1 %2369  ;;  %v2822_v8 = vld [vmem:[#allocation3 + $0xc8] sm:$0xff] }
 0x31d   : > { %v2368_v14 = vpop.permute.xlu0 %2367  ;;  %2487 = vst.msk [vmem:[#allocation3 + $0xd8] sm:$0xff] %vm2459_vm8, %v2370_v27  ;;  %v2821_v22 = vld [vmem:[#allocation3 + $0xc0] sm:$0xff] }
 0x31e   : > { %2486 = vst.msk [vmem:[#allocation3 + $0xd0] sm:$0xff] %vm2459_vm8, %v2368_v14  ;;  %4259 = vmatprep.mubr.msk.f32.mxu1 %vm2850_vm10, %v2821_v22  ;;  %2120 = vrot.lane.b32.xlu1 %v1977_v6, %s4435_s6  ;;  %v5960_v27 = vld [vmem:[%s5602_s28 + $0x120] sm:$0xff]  ;;  %v5969_v22 = vld [vmem:[%s5602_s28 + $0x128] sm:$0xff] }
 0x31f   : > { %2118 = vrot.lane.b32.xlu0 %v1976_v32, %s4435_s6  ;;  %4260 = vmatmul.mubr.msk.f32.vlgmr.msra.gmra.mrb[0].mxu1 %vm2850_vm10, %v2822_v8  ;;  %s4102_s6 = sshll.u32 %s243_s5, 3 }
 0x320   : > { %v2659_v59 = vpop.permute.xlu1 %2658  ;;  %s6430_s7 = scalar_lea.vmem [#allocation4], %s4102_s6 }
 0x321   : > { %v2657_v39 = vpop.permute.xlu0 %2656  ;;  %2776 = vst.msk [vmem:[#allocation3 + $0xd8] sm:$0xff] %vm2748_vm9, %v2659_v59  ;;  %v5980_v59 = vld [vmem:[%s5602_s28 + $0x130] sm:$0xff]  ;;  %s4015_s9 = sshll.u32 %s6430_s7, 4  ;;  %s6700_s9 = int_to_ptr.vmem [resolvable:$true] %s4015_s9 }
 0x322   : > { %2775 = vst.msk [vmem:[#allocation3 + $0xd0] sm:$0xff] %vm2748_vm9, %v2657_v39  ;;  %2409 = vrot.lane.b32.xlu1 %v2266_v36, %s4436_s14  ;;  %p4373_p2 = scmp.lt.s32.totalorder %s6700_s9, %s4371_s13 }
 0x323   : > { %2407 = vrot.lane.b32.xlu0 %v2265_v1, %s4436_s14  ;;  %s4002_s14 = scalar_lea.sflag [#allocation5], %s243_s5 }
 0x324   : > { %v2085_v11 = vpop.permute.xlu1 %2084 }
 0x325   : > { %v2083_v52 = vpop.permute.xlu0 %2082  ;;  %2200 = vst.msk [vmem:[#allocation3 + $0xe8] sm:$0xff] %vm2170_vm7, %v2085_v11 }
 0x326   : > { %2199 = vst.msk [vmem:[#allocation3 + $0xe0] sm:$0xff] %vm2170_vm7, %v2083_v52  ;;  %2698 = vrot.lane.b32.xlu1 %v2555_v61, %s4437_s20 }
 0x327   : > { %2696 = vrot.lane.b32.xlu0 %v2554_v43, %s4437_s20  ;;  %v5998_v43 = vld [vmem:[%s5602_s28 + $0x140] sm:$0xff]  ;;  %s4366_s20 = scalar_lea.vmem %s6700_s9, 128 }
 0x328   : > { %v2374_v25 = vpop.permute.xlu1 %2373  ;;  %v2824_v53 = vld [vmem:[#allocation3 + $0xd8] sm:$0xff]  ;;  %p4367_p13 = scmp.ne.s32.totalorder %s6700_s9, %s4366_s20  ;;  %p4374_p3 = scmp.lt.s32.totalorder %s4372_s22, %s4366_s20 }
 0x329   : > { %v2372_v13 = vpop.permute.xlu0 %2371  ;;  %2489 = vst.msk [vmem:[#allocation3 + $0xe8] sm:$0xff] %vm2459_vm8, %v2374_v25  ;;  %v2823_v60 = vld [vmem:[#allocation3 + $0xd0] sm:$0xff]  ;;  %v6009_v25 = vld [vmem:[%s5602_s28 + $0x148] sm:$0xff] }
 0x32a   : > { %2488 = vst.msk [vmem:[#allocation3 + $0xe0] sm:$0xff] %vm2459_vm8, %v2372_v13  ;;  %4262 = vmatprep.mubr.msk.f32.mxu1 %vm2850_vm10, %v2823_v60  ;;  %3465 = vperm.xlu1 %4361, %v5608_v3   ;;  %v3421_v3 = vadd.f32 %v3420_v42, %v3419_v17  ;;  %v6017_v60 = vld [vmem:[%s5602_s28 + $0x150] sm:$0xff]  ;;  %p4368_p0 = pnand %p4367_p13, %p4504_p5  ;;  %p4375_p4 = por %p4374_p3, %p4373_p2 }
 0x32b   : > { %3460 = vperm.xlu0 %4360, %v5611_v7   ;;  %4263 = vmatmul.mubr.msk.f32.gmra.mrb[2].mxu1 %vm2850_vm10, %v2824_v53  ;;  %v3422_v7 = vsel %vm3352_vm11, %v5951_v0, 0.0 }
 0x32c   : > { %v2663_v2 = vpop.permute.xlu1 %2662  ;;  %v3423_v8 = vadd.f32 %v3422_v7, %v3421_v3  ;;  %v6025_v3 = vld [vmem:[%s5602_s28 + $0x158] sm:$0xff]  ;;  %p4369_p1 = pneg %p4368_p0 }
 0x32d   : > { %v2661_v6 = vpop.permute.xlu0 %2660  ;;  %2778 = vst.msk [vmem:[#allocation3 + $0xe8] sm:$0xff] %vm2748_vm9, %v2663_v2  ;;  %v3436_v2 = vsel %vm3352_vm11, %v6017_v60, 0.0 }
 0x32e   : > { %2777 = vst.msk [vmem:[#allocation3 + $0xe0] sm:$0xff] %vm2748_vm9, %v2661_v6  ;;  %3470 = vperm.xlu1 %4361, %v5626_v56   ;;  %v3424_v56 = vsel %vm3352_vm11, %v5960_v27, 0.0  ;;  %p4376_p7 = pnand %p4375_p4, %p4369_p1 }
 0x32f   : > { %3475 = vperm.xlu0 %4360, %v5635_v38  }
 0x330   : > { %v2089_v28 = vpop.permute.xlu1 %2088 }
 0x331   : > { %v2087_v32 = vpop.permute.xlu0 %2086  ;;  %2202 = vst.msk [vmem:[#allocation3 + $0xf8] sm:$0xff] %vm2170_vm7, %v2089_v28 }
 0x332   : > { %2201 = vst.msk [vmem:[#allocation3 + $0xf0] sm:$0xff] %vm2170_vm7, %v2087_v32  ;;  %3480 = vperm.xlu1 %4361, %v5644_v46   ;;  %v3425_v46 = vadd.f32 %v3424_v56, %v3423_v8  ;;  %v6035_v56 = vld [vmem:[%s5602_s28 + $0x160] sm:$0xff] }
 0x333   : > { %3485 = vperm.xlu0 %4360, %v5657_v4   ;;  %v3426_v4 = vsel %vm3352_vm11, %v5969_v22, 0.0 }
 0x334   : > { %v2378_v38 = vpop.permute.xlu1 %2377  ;;  %v2826_v14 = vld [vmem:[#allocation3 + $0xe8] sm:$0xff] }
 0x335   : > { %v2376_v29 = vpop.permute.xlu0 %2375  ;;  %2491 = vst.msk [vmem:[#allocation3 + $0xf8] sm:$0xff] %vm2459_vm8, %v2378_v38  ;;  %v2825_v36 = vld [vmem:[#allocation3 + $0xe0] sm:$0xff] }
 0x336   : > { %2490 = vst.msk [vmem:[#allocation3 + $0xf0] sm:$0xff] %vm2459_vm8, %v2376_v29  ;;  %4265 = vmatprep.mubr.msk.f32.mxu1 %vm2850_vm10, %v2825_v36  ;;  %3490 = vperm.xlu1 %4361, %v5666_v16   ;;  %v3427_v16 = vadd.f32 %v3426_v4, %v3425_v46  ;;  %v6043_v36 = vld [vmem:[%s5602_s28 + $0x168] sm:$0xff] }
 0x337   : > { %3495 = vperm.xlu0 %4360, %v5675_v26   ;;  %4266 = vmatmul.mubr.msk.f32.gmra.mrb[4].mxu1 %vm2850_vm10, %v2826_v14  ;;  %v3428_v26 = vsel %vm3352_vm11, %v5980_v59, 0.0 }
 0x338   : > { %v2667_v33 = vpop.permute.xlu1 %2666  ;;  %v3429_v21 = vadd.f32 %v3428_v26, %v3427_v16  ;;  %v6051_v16 = vld [vmem:[%s5602_s28 + $0x170] sm:$0xff] }
 0x339   : > { %v2665_v1 = vpop.permute.xlu0 %2664  ;;  %2780 = vst.msk [vmem:[#allocation3 + $0xf8] sm:$0xff] %vm2748_vm9, %v2667_v33  ;;  %v3442_v33 = vsel %vm3352_vm11, %v6043_v36, 0.0 }
 0x33a   : > { %2779 = vst.msk [vmem:[#allocation3 + $0xf0] sm:$0xff] %vm2748_vm9, %v2665_v1  ;;  %3500 = vperm.xlu1 %4361, %v5688_v41   ;;  %v3430_v41 = vsel %vm3352_vm11, %v5989_v57, 0.0 }
 0x33b   : > { %3505 = vperm.xlu0 %4360, %v5697_v44  }
 0x33c   : > { %v2093_v39 = vpop.permute.xlu1 %2092 }
 0x33d   : > { %v2091_v61 = vpop.permute.xlu0 %2090  ;;  %2204 = vst.msk [vmem:[#allocation3 + $0x108] sm:$0xff] %vm2170_vm7, %v2093_v39 }
 0x33e   : > { %2203 = vst.msk [vmem:[#allocation3 + $0x100] sm:$0xff] %vm2170_vm7, %v2091_v61  ;;  %3510 = vperm.xlu1 %4361, %v5706_v9   ;;  %v3431_v9 = vadd.f32 %v3430_v41, %v3429_v21  ;;  %v6061_v41 = vld [vmem:[%s5602_s28 + $0x178] sm:$0xff] }
 0x33f   : > { %3515 = vperm.xlu0 %4360, %v5719_v51   ;;  %v3432_v51 = vsel %vm3352_vm11, %v5998_v43, 0.0 }
 0x340   : > { %v2382_v44 = vpop.permute.xlu1 %2381  ;;  %v2828_v11 = vld [vmem:[#allocation3 + $0xf8] sm:$0xff]  ;;  %v3433_v13 = vadd.f32 %v3432_v51, %v3431_v9 }
 0x341   : > { %v2380_v52 = vpop.permute.xlu0 %2379  ;;  %2493 = vst.msk [vmem:[#allocation3 + $0x108] sm:$0xff] %vm2459_vm8, %v2382_v44  ;;  %v2827_v18 = vld [vmem:[#allocation3 + $0xf0] sm:$0xff] }
 0x342   : > { %2492 = vst.msk [vmem:[#allocation3 + $0x100] sm:$0xff] %vm2459_vm8, %v2380_v52  ;;  %4268 = vmatprep.mubr.msk.f32.mxu1 %vm2850_vm10, %v2827_v18  ;;  %3520 = vperm.xlu1 %4361, %v5728_v63   ;;  %v3434_v63 = vsel %vm3352_vm11, %v6009_v25, 0.0  ;;  %v3446_v52 = vsel %vm3352_vm11, %v6061_v41, 0.0 }
 0x343   : > { %3525 = vperm.xlu0 %4360, %v5737_v62   ;;  %4269 = vmatmul.mubr.msk.f32.gmra.mrb[6].mxu1 %vm2850_vm10, %v2828_v11  ;;  %v3435_v42 = vadd.f32 %v3434_v63, %v3433_v13 }
 0x344   : > { %v2671_v23 = vpop.permute.xlu1 %2670 }
 0x345   : > { %v2669_v53 = vpop.permute.xlu0 %2668  ;;  %2782 = vst.msk [vmem:[#allocation3 + $0x108] sm:$0xff] %vm2748_vm9, %v2671_v23  ;;  %v3437_v32 = vadd.f32 %v3436_v2, %v3435_v42 }
 0x346   : > { %2781 = vst.msk [vmem:[#allocation3 + $0x100] sm:$0xff] %vm2748_vm9, %v2669_v53 }
 0x347   : > { %3530 = vperm.xlu0 %4360, %v5748_v20  }
 0x348   : > { %v2097_v62 = vpop.permute.xlu1 %2096 }
 0x349   : > { %v2095_v17 = vpop.permute.xlu0 %2094  ;;  %2206 = vst.msk [vmem:[#allocation3 + $0x118] sm:$0xff] %vm2170_vm7, %v2097_v62 }
 0x34a   : > { %2205 = vst.msk [vmem:[#allocation3 + $0x110] sm:$0xff] %vm2170_vm7, %v2095_v17 }
 0x34b   : > { %3535 = vperm.xlu0 %4360, %v5757_v40   ;;  %v3438_v40 = vsel %vm3352_vm11, %v6025_v3, 0.0 }
 0x34c   : > { %v2386_v6 = vpop.permute.xlu1 %2385  ;;  %v2830_v20 = vld [vmem:[#allocation3 + $0x108] sm:$0xff]  ;;  %v3439_v14 = vadd.f32 %v3438_v40, %v3437_v32 }
 0x34d   : > { %v2384_v7 = vpop.permute.xlu0 %2383  ;;  %2495 = vst.msk [vmem:[#allocation3 + $0x118] sm:$0xff] %vm2459_vm8, %v2386_v6  ;;  %v2829_v28 = vld [vmem:[#allocation3 + $0x100] sm:$0xff] }
 0x34e   : > { %2494 = vst.msk [vmem:[#allocation3 + $0x110] sm:$0xff] %vm2459_vm8, %v2384_v7  ;;  %4271 = vmatprep.mubr.msk.f32.mxu1 %vm2850_vm10, %v2829_v28 }
 0x34f   : > { %3540 = vperm.xlu0 %4360, %v5766_v19   ;;  %4272 = vmatmul.mubr.msk.f32.gmra.mrb[8].mxu1 %vm2850_vm10, %v2830_v20  ;;  %v3440_v19 = vsel %vm3352_vm11, %v6035_v56, 0.0 }
 0x350   : > { %v2675_v8 = vpop.permute.xlu1 %2674  ;;  %v3441_v4 = vadd.f32 %v3440_v19, %v3439_v14 }
 0x351   : > { %v2673_v38 = vpop.permute.xlu0 %2672  ;;  %2784 = vst.msk [vmem:[#allocation3 + $0x118] sm:$0xff] %vm2748_vm9, %v2675_v8 }
 0x352   : > { %2783 = vst.msk [vmem:[#allocation3 + $0x110] sm:$0xff] %vm2748_vm9, %v2673_v38  ;;  %v3443_v61 = vadd.f32 %v3442_v33, %v3441_v4 }
 0x353   : > { %3545 = vperm.xlu0 %4360, %v5777_v47  }
 0x354   : > { %v2101_v29 = vpop.permute.xlu1 %2100 }
 0x355   : > { %v2099_v46 = vpop.permute.xlu0 %2098  ;;  %2208 = vst.msk [vmem:[#allocation3 + $0x128] sm:$0xff] %vm2170_vm7, %v2101_v29 }
 0x356   : > { %2207 = vst.msk [vmem:[#allocation3 + $0x120] sm:$0xff] %vm2170_vm7, %v2099_v46 }
 0x357   : > { %3550 = vperm.xlu0 %4360, %v5786_v55   ;;  %v3444_v55 = vsel %vm3352_vm11, %v6051_v16, 0.0 }
 0x358   : > { %v2390_v1 = vpop.permute.xlu1 %2389  ;;  %v2832_v47 = vld [vmem:[#allocation3 + $0x118] sm:$0xff]  ;;  %v3445_v11 = vadd.f32 %v3444_v55, %v3443_v61 }
 0x359   : > { %v2388_v26 = vpop.permute.xlu0 %2387  ;;  %2497 = vst.msk [vmem:[#allocation3 + $0x128] sm:$0xff] %vm2459_vm8, %v2390_v1  ;;  %v2831_v39 = vld [vmem:[#allocation3 + $0x110] sm:$0xff] }
 0x35a   : > { %2496 = vst.msk [vmem:[#allocation3 + $0x120] sm:$0xff] %vm2459_vm8, %v2388_v26  ;;  %4274 = vmatprep.mubr.msk.f32.mxu1 %vm2850_vm10, %v2831_v39  ;;  %v3447_v9 = vadd.f32 %v3446_v52, %v3445_v11 }
 0x35b   : > { %3555 = vperm.xlu0 %4360, %v5795_v50   ;;  %4275 = vmatmul.mubr.msk.f32.gmra.mrb[10].mxu1 %vm2850_vm10, %v2832_v47 }
 0x35c   : > { %v2679_v21 = vpop.permute.xlu1 %2678 }
 0x35d   : > { %v2677_v44 = vpop.permute.xlu0 %2676  ;;  %2786 = vst.msk [vmem:[#allocation3 + $0x128] sm:$0xff] %vm2748_vm9, %v2679_v21 }
 0x35e   : > { %2785 = vst.msk [vmem:[#allocation3 + $0x120] sm:$0xff] %vm2748_vm9, %v2677_v44 }
 0x35f   : > { %3560 = vperm.xlu0 %4360, %v5806_v31  }
 0x360   : > { %v2105_v50 = vpop.permute.xlu1 %2104 }
 0x361   : > { %v2103_v18 = vpop.permute.xlu0 %2102  ;;  %2210 = vst.msk [vmem:[#allocation3 + $0x138] sm:$0xff] %vm2170_vm7, %v2105_v50 }
 0x362   : > { %2209 = vst.msk [vmem:[#allocation3 + $0x130] sm:$0xff] %vm2170_vm7, %v2103_v18 }
 0x363   : > { %3565 = vperm.xlu0 %4360, %v5815_v24  }
 0x364   : > { %v2394_v51 = vpop.permute.xlu1 %2393  ;;  %v2834_v23 = vld [vmem:[#allocation3 + $0x128] sm:$0xff] }
 0x365   : > { %v2392_v53 = vpop.permute.xlu0 %2391  ;;  %2499 = vst.msk [vmem:[#allocation3 + $0x138] sm:$0xff] %vm2459_vm8, %v2394_v51  ;;  %v2833_v13 = vld [vmem:[#allocation3 + $0x120] sm:$0xff] }
 0x366   : > { %2498 = vst.msk [vmem:[#allocation3 + $0x130] sm:$0xff] %vm2459_vm8, %v2392_v53  ;;  %v6073_v31 = vpop.f32.mrb[0].mxu0  ;;  %4277 = vmatprep.mubr.msk.f32.mxu1 %vm2850_vm10, %v2833_v13  ;;  %3448 = vadd.xlane.f32.xlu1 %v3447_v9 }
 0x367   : > { %3570 = vperm.xlu0 %4360, %v5824_v35   ;;  %v6077_v63 = vpop.f32.mrb[1].mxu0  ;;  %4278 = vmatmul.mubr.msk.f32.gmra.mrb[12].mxu1 %vm2850_vm10, %v2834_v23 }
 0x368   : > { %v2683_v24 = vpop.permute.xlu1 %2682 }
 0x369   : > { %v2681_v62 = vpop.permute.xlu0 %2680  ;;  %2788 = vst.msk [vmem:[#allocation3 + $0x138] sm:$0xff] %vm2748_vm9, %v2683_v24 }
 0x36a   : > { %2787 = vst.msk [vmem:[#allocation3 + $0x130] sm:$0xff] %vm2748_vm9, %v2681_v62 }
 0x36b   : > { %3580 = vperm.xlu0 %4360, %v5844_v45  }
 0x36c   : > { %v2109_v17 = vpop.permute.xlu1 %2108 }
 0x36d   : > { %v2107_v42 = vpop.permute.xlu0 %2106  ;;  %2212 = vst.msk [vmem:[#allocation3 + $0x148] sm:$0xff] %vm2170_vm7, %v2109_v17 }
 0x36e   : > { %2211 = vst.msk [vmem:[#allocation3 + $0x140] sm:$0xff] %vm2170_vm7, %v2107_v42  ;;  %v6085_v2 = vpop.f32.mrb[2].mxu0 }
 0x36f   : > { %3585 = vperm.xlu0 %4360, %v5853_v58   ;;  %v6088_v35 = vpop.f32.mrb[3].mxu0 }
 0x370   : > { %v2398_v6 = vpop.permute.xlu1 %2397  ;;  %v2836_v20 = vld [vmem:[#allocation3 + $0x138] sm:$0xff] }
 0x371   : > { %v2396_v7 = vpop.permute.xlu0 %2395  ;;  %2501 = vst.msk [vmem:[#allocation3 + $0x148] sm:$0xff] %vm2459_vm8, %v2398_v6  ;;  %v2835_v28 = vld [vmem:[#allocation3 + $0x130] sm:$0xff] }
 0x372   : > { %2500 = vst.msk [vmem:[#allocation3 + $0x140] sm:$0xff] %vm2459_vm8, %v2396_v7  ;;  %4280 = vmatprep.mubr.msk.f32.mxu1 %vm2850_vm10, %v2835_v28 }
 0x373   : > { %3590 = vperm.xlu0 %4360, %v5864_v12   ;;  %4281 = vmatmul.mubr.msk.f32.gmra.mrb[14].mxu1 %vm2850_vm10, %v2836_v20 }
 0x374   : > { %v2687_v45 = vpop.permute.xlu1 %2686 }
 0x375   : > { %v2685_v32 = vpop.permute.xlu0 %2684  ;;  %2790 = vst.msk [vmem:[#allocation3 + $0x148] sm:$0xff] %vm2748_vm9, %v2687_v45 }
 0x376   : > { %2789 = vst.msk [vmem:[#allocation3 + $0x140] sm:$0xff] %vm2748_vm9, %v2685_v32 }
 0x377   : > { %3595 = vperm.xlu0 %4360, %v5873_v37   ;;  %3575 = vperm.xlu1 %4361, %v5835_v5  }
 0x378   : > { %v2113_v58 = vpop.permute.xlu1 %2112 }
 0x379   : > { %v2111_v40 = vpop.permute.xlu0 %2110  ;;  %2214 = vst.msk [vmem:[#allocation3 + $0x158] sm:$0xff] %vm2170_vm7, %v2113_v58 }
 0x37a   : > { %2213 = vst.msk [vmem:[#allocation3 + $0x150] sm:$0xff] %vm2170_vm7, %v2111_v40  ;;  %v6101_v8 = vpop.f32.mrb[4].mxu0 }
 0x37b   : > { %3605 = vperm.xlu0 %4360, %v5893_v30   ;;  %v6104_v12 = vpop.f32.mrb[5].mxu0  ;;  %3600 = vperm.xlu1 %4361, %v5882_v48  }
 0x37c   : > { %v2402_v38 = vpop.permute.xlu1 %2401  ;;  %v2838_v14 = vld [vmem:[#allocation3 + $0x148] sm:$0xff] }
 0x37d   : > { %v2400_v19 = vpop.permute.xlu0 %2399  ;;  %2503 = vst.msk [vmem:[#allocation3 + $0x158] sm:$0xff] %vm2459_vm8, %v2402_v38  ;;  %v2837_v5 = vld [vmem:[#allocation3 + $0x140] sm:$0xff] }
 0x37e   : > { %2502 = vst.msk [vmem:[#allocation3 + $0x150] sm:$0xff] %vm2459_vm8, %v2400_v19  ;;  %4283 = vmatprep.mubr.msk.f32.mxu1 %vm2850_vm10, %v2837_v5 }
 0x37f   : > { %3615 = vperm.xlu0 %4360, %v5911_v10   ;;  %4284 = vmatmul.mubr.msk.f32.gmra.mrb[16].mxu1 %vm2850_vm10, %v2838_v14 }
 0x380   : > { %3610 = vperm.xlu1 %4361, %v5902_v54   ;;  %v2691_v37 = vpop.permute.xlu1 %2690 }
 0x381   : > { %v2689_v30 = vpop.permute.xlu0 %2688  ;;  %2792 = vst.msk [vmem:[#allocation3 + $0x158] sm:$0xff] %vm2748_vm9, %v2691_v37 }
 0x382   : > { %2791 = vst.msk [vmem:[#allocation3 + $0x150] sm:$0xff] %vm2748_vm9, %v2689_v30 }
 0x383   : > { %3625 = vperm.xlu0 %4360, %v5931_v15  }
 0x384   : > { %3620 = vperm.xlu1 %4361, %v5922_v49   ;;  %v2117_v48 = vpop.permute.xlu1 %2116 }
 0x385   : > { %v2115_v29 = vpop.permute.xlu0 %2114  ;;  %2216 = vst.msk [vmem:[#allocation3 + $0x168] sm:$0xff] %vm2170_vm7, %v2117_v48 }
 0x386   : > { %2215 = vst.msk [vmem:[#allocation3 + $0x160] sm:$0xff] %vm2170_vm7, %v2115_v29  ;;  %v6119_v10 = vpop.f32.mrb[6].mxu0 }
 0x387   : > { %3635 = vperm.xlu0 %4360, %v5951_v0   ;;  %v6122_v54 = vpop.f32.mrb[7].mxu0 }
 0x388   : > { %3630 = vperm.xlu1 %4361, %v5940_v34   ;;  %v2406_v46 = vpop.permute.xlu1 %2405  ;;  %v2840_v4 = vld [vmem:[#allocation3 + $0x158] sm:$0xff] }
 0x389   : > { %v2404_v33 = vpop.permute.xlu0 %2403  ;;  %2505 = vst.msk [vmem:[#allocation3 + $0x168] sm:$0xff] %vm2459_vm8, %v2406_v46  ;;  %v2839_v49 = vld [vmem:[#allocation3 + $0x150] sm:$0xff] }
 0x38a   : > { %2504 = vst.msk [vmem:[#allocation3 + $0x160] sm:$0xff] %vm2459_vm8, %v2404_v33  ;;  %4286 = vmatprep.mubr.msk.f32.mxu1 %vm2850_vm10, %v2839_v49 }
 0x38b   : > { %3645 = vperm.xlu0 %4360, %v5969_v22   ;;  %4287 = vmatmul.mubr.msk.f32.gmra.mrb[18].mxu1 %vm2850_vm10, %v2840_v4 }
 0x38c   : > { %3640 = vperm.xlu1 %4361, %v5960_v27   ;;  %v2695_v15 = vpop.permute.xlu1 %2694 }
 0x38d   : > { %v2693_v0 = vpop.permute.xlu0 %2692  ;;  %2794 = vst.msk [vmem:[#allocation3 + $0x168] sm:$0xff] %vm2748_vm9, %v2695_v15 }
 0x38e   : > { %2793 = vst.msk [vmem:[#allocation3 + $0x160] sm:$0xff] %vm2748_vm9, %v2693_v0 }
 0x38f   : > { %3655 = vperm.xlu0 %4360, %v5989_v57  }
 0x390   : > { %3650 = vperm.xlu1 %4361, %v5980_v59   ;;  %v2121_v34 = vpop.permute.xlu1 %2120 }
 0x391   : > { %v2119_v1 = vpop.permute.xlu0 %2118  ;;  %2218 = vst.msk [vmem:[#allocation3 + $0x178] sm:$0xff] %vm2170_vm7, %v2121_v34 }
 0x392   : > { %2217 = vst.msk [vmem:[#allocation3 + $0x170] sm:$0xff] %vm2170_vm7, %v2119_v1  ;;  %v6137_v22 = vpop.f32.mrb[8].mxu0 }
 0x393   : > { %3665 = vperm.xlu0 %4360, %v6009_v25   ;;  %v6140_v27 = vpop.f32.mrb[9].mxu0 }
 0x394   : > { %3660 = vperm.xlu1 %4361, %v5998_v43   ;;  %v2410_v47 = vpop.permute.xlu1 %2409  ;;  %v2842_v26 = vld [vmem:[#allocation3 + $0x168] sm:$0xff] }
 0x395   : > { %v2408_v39 = vpop.permute.xlu0 %2407  ;;  %2507 = vst.msk [vmem:[#allocation3 + $0x178] sm:$0xff] %vm2459_vm8, %v2410_v47  ;;  %v2841_v59 = vld [vmem:[#allocation3 + $0x160] sm:$0xff] }
 0x396   : > { %2506 = vst.msk [vmem:[#allocation3 + $0x170] sm:$0xff] %vm2459_vm8, %v2408_v39  ;;  %4289 = vmatprep.mubr.msk.f32.mxu1 %vm2850_vm10, %v2841_v59 }
 0x397   : > { %3675 = vperm.xlu0 %4360, %v6025_v3   ;;  %4290 = vmatmul.mubr.msk.f32.gmra.mrb[20].mxu1 %vm2850_vm10, %v2842_v26 }
 0x398   : > { %3670 = vperm.xlu1 %4361, %v6017_v60   ;;  %v2699_v57 = vpop.permute.xlu1 %2698 }
 0x399   : > { %v2697_v25 = vpop.permute.xlu0 %2696  ;;  %2796 = vst.msk [vmem:[#allocation3 + $0x178] sm:$0xff] %vm2748_vm9, %v2699_v57 }
 0x39a   : > { %2795 = vst.msk [vmem:[#allocation3 + $0x170] sm:$0xff] %vm2748_vm9, %v2697_v25 }
 0x39b   : > { %3685 = vperm.xlu0 %4360, %v6043_v36  }
 0x39c   : > { %3680 = vperm.xlu1 %4361, %v6035_v56  }
 0x39e   : > { %v6153_v43 = vpop.f32.mrb[10].mxu0 }
 0x39f   : > { %3695 = vperm.xlu0 %4360, %v6061_v41   ;;  %v6156_v61 = vpop.f32.mrb[11].mxu0 }
 0x3a0   : > { %3690 = vperm.xlu1 %4361, %v6051_v16   ;;  %v2844_v3 = vld [vmem:[#allocation3 + $0x178] sm:$0xff] }
 0x3a1   : > { %v2843_v60 = vld [vmem:[#allocation3 + $0x170] sm:$0xff] }
 0x3a2   : > { %4292 = vmatprep.mubr.msk.f32.mxu1 %vm2850_vm10, %v2843_v60 }
 0x3a3   : > { %4293 = vmatmul.mubr.msk.f32.gmra.mrb[22].mxu1 %vm2850_vm10, %v2844_v3 }
 0x3a9   : > { %v6161_v55 = vpop.permute.xlu1 %3465 }
 0x3aa   : > { %6800 = vst [vmem:[#allocation7_spill] sm:$0xff] %v6161_v55  ;;  %v3699_v36 = vmul.f32 %v6073_v31, %v6161_v55  ;;  %v6165_v56 = vpop.permute.xlu0 %3460  ;;  %v6167_v21 = vpop.f32.mrb[12].mxu0 }
 0x3ab   : > { %6801 = vst [vmem:[#allocation8_spill] sm:$0xff] %v6165_v56  ;;  %v3698_v41 = vmul.f32 %v6165_v56, %v6077_v63  ;;  %v6171_v44 = vpop.f32.mrb[13].mxu0 }
 0x3ad   : > { %v3746_v16 = vadd.f32 %v3699_v36, %v3698_v41  ;;  %v6173_v11 = vpop.permute.xlu1 %3470 }
 0x3ae   : > { %6802 = vst [vmem:[#allocation9_spill] sm:$0xff] %v6173_v11  ;;  %v3700_v52 = vmul.f32 %v6173_v11, %v6088_v35  ;;  %v6177_v50 = vpop.permute.xlu0 %3475 }
 0x3af   : > { %6803 = vst [vmem:[#allocation10_spill] sm:$0xff] %v6177_v50  ;;  %v3701_v9 = vmul.f32 %v6085_v2, %v6177_v50 }
 0x3b0   : > { %v3747_v18 = vadd.f32 %v3746_v16, %v3700_v52 }
 0x3b1   : > { %v6181_v51 = vpop.permute.xlu1 %3480 }
 0x3b2   : > { %6804 = vst [vmem:[#allocation11_spill] sm:$0xff] %v6181_v51  ;;  %v3748_v23 = vadd.f32 %v3747_v18, %v3701_v9  ;;  %v3702_v53 = vmul.f32 %v6181_v51, %v6104_v12  ;;  %v6185_v13 = vpop.permute.xlu0 %3485 }
 0x3b3   : > { %6805 = vst [vmem:[#allocation12_spill] sm:$0xff] %v6185_v13  ;;  %v3703_v62 = vmul.f32 %v6101_v8, %v6185_v13 }
 0x3b4   : > { %v3749_v24 = vadd.f32 %v3748_v23, %v3702_v53 }
 0x3b5   : > { %v6189_v17 = vpop.permute.xlu1 %3490 }
 0x3b6   : > { %6806 = vst [vmem:[#allocation13_spill] sm:$0xff] %v6189_v17  ;;  %v3750_v42 = vadd.f32 %v3749_v24, %v3703_v62  ;;  %v3704_v6 = vmul.f32 %v6189_v17, %v6122_v54  ;;  %v6193_v20 = vpop.permute.xlu0 %3495  ;;  %v6195_v7 = vpop.f32.mrb[14].mxu0 }
 0x3b7   : > { %6807 = vst [vmem:[#allocation14_spill] sm:$0xff] %v6193_v20  ;;  %v6197_v28 = vpop.f32.mrb[15].mxu0  ;;  %v3705_v32 = vmul.f32 %v6119_v10, %v6193_v20 }
 0x3b8   : > { %v3751_v45 = vadd.f32 %v3750_v42, %v3704_v6 }
 0x3b9   : > { %v6201_v58 = vpop.permute.xlu1 %3500 }
 0x3ba   : > { %6808 = vst [vmem:[#allocation15_spill] sm:$0xff] %v6201_v58  ;;  %v3752_v40 = vadd.f32 %v3751_v45, %v3705_v32  ;;  %v3706_v38 = vmul.f32 %v6201_v58, %v6140_v27  ;;  %v6205_v14 = vpop.permute.xlu0 %3505 }
 0x3bb   : > { %6809 = vst [vmem:[#allocation16_spill] sm:$0xff] %v6205_v14  ;;  %v3707_v5 = vmul.f32 %v6137_v22, %v6205_v14 }
 0x3bc   : > { %v3753_v19 = vadd.f32 %v3752_v40, %v3706_v38 }
 0x3bd   : > { %v6209_v37 = vpop.permute.xlu1 %3510 }
 0x3be   : > { %6810 = vst [vmem:[#allocation17_spill] sm:$0xff] %v6209_v37  ;;  %v3754_v30 = vadd.f32 %v3753_v19, %v3707_v5  ;;  %v3708_v48 = vmul.f32 %v6209_v37, %v6156_v61  ;;  %v6213_v29 = vpop.permute.xlu0 %3515 }
 0x3bf   : > { %6811 = vst [vmem:[#allocation18_spill] sm:$0xff] %v6213_v29  ;;  %v3709_v4 = vmul.f32 %v6153_v43, %v6213_v29 }
 0x3c0   : > { %v3755_v46 = vadd.f32 %v3754_v30, %v3708_v48 }
 0x3c1   : > { %v6217_v33 = vpop.permute.xlu1 %3520 }
 0x3c2   : > { %6812 = vst [vmem:[#allocation19_spill] sm:$0xff] %v6217_v33  ;;  %v3756_v49 = vadd.f32 %v3755_v46, %v3709_v4  ;;  %v3710_v15 = vmul.f32 %v6217_v33, %v6171_v44  ;;  %v6221_v0 = vpop.permute.xlu0 %3525  ;;  %v6223_v34 = vpop.f32.mrb[16].mxu0 }
 0x3c3   : > { %6813 = vst [vmem:[#allocation20_spill] sm:$0xff] %v6221_v0  ;;  %v6225_v1 = vpop.f32.mrb[17].mxu0  ;;  %v3711_v26 = vmul.f32 %v6167_v21, %v6221_v0 }
 0x3c4   : > { %v3757_v47 = vadd.f32 %v3756_v49, %v3710_v15 }
 0x3c6   : > { %v3758_v39 = vadd.f32 %v3757_v47, %v3711_v26  ;;  %v6229_v59 = vpop.permute.xlu0 %3530 }
 0x3c7   : > { %6814 = vst [vmem:[#allocation21_spill] sm:$0xff] %v6229_v59  ;;  %v3712_v57 = vmul.f32 %v6229_v59, %v6197_v28 }
 0x3c9   : > { %v3759_v25 = vadd.f32 %v3758_v39, %v3712_v57 }
 0x3ca   : > { %v6233_v3 = vpop.permute.xlu0 %3535 }
 0x3cb   : > { %6815 = vst [vmem:[#allocation22_spill] sm:$0xff] %v6233_v3  ;;  %v3713_v60 = vmul.f32 %v6195_v7, %v6233_v3 }
 0x3cd   : > { %v3760_v36 = vadd.f32 %v3759_v25, %v3713_v60 }
 0x3ce   : > { %v6237_v41 = vpop.permute.xlu0 %3540  ;;  %v6239_v16 = vpop.f32.mrb[18].mxu0 }
 0x3cf   : > { %6816 = vst [vmem:[#allocation23_spill] sm:$0xff] %v6237_v41  ;;  %v3714_v52 = vmul.f32 %v6237_v41, %v6225_v1  ;;  %v6243_v18 = vpop.f32.mrb[19].mxu0 }
 0x3d1   : > { %v3761_v9 = vadd.f32 %v3760_v36, %v3714_v52 }
 0x3d2   : > { %v6245_v23 = vpop.permute.xlu0 %3545 }
 0x3d3   : > { %6817 = vst [vmem:[#allocation24_spill] sm:$0xff] %v6245_v23  ;;  %v3715_v53 = vmul.f32 %v6223_v34, %v6245_v23 }
 0x3d5   : > { %v3762_v24 = vadd.f32 %v3761_v9, %v3715_v53 }
 0x3d6   : > { %v6249_v62 = vpop.permute.xlu0 %3550 }
 0x3d7   : > { %6818 = vst [vmem:[#allocation25_spill] sm:$0xff] %v6249_v62  ;;  %v3716_v42 = vmul.f32 %v6249_v62, %v6243_v18 }
 0x3d9   : > { %v3763_v6 = vadd.f32 %v3762_v24, %v3716_v42 }
 0x3da   : > { %v6253_v45 = vpop.permute.xlu0 %3555  ;;  %v6255_v32 = vpop.f32.mrb[20].mxu0 }
 0x3db   : > { %6819 = vst [vmem:[#allocation26_spill] sm:$0xff] %v6253_v45  ;;  %v3717_v40 = vmul.f32 %v6239_v16, %v6253_v45  ;;  %v6259_v38 = vpop.f32.mrb[21].mxu0 }
 0x3dd   : > { %v3764_v19 = vadd.f32 %v3763_v6, %v3717_v40 }
 0x3de   : > { %v6261_v5 = vpop.permute.xlu0 %3560 }
 0x3df   : > { %6820 = vst [vmem:[#allocation27_spill] sm:$0xff] %v6261_v5  ;;  %v3718_v30 = vmul.f32 %v6261_v5, %v6259_v38 }
 0x3e1   : > { %v3765_v48 = vadd.f32 %v3764_v19, %v3718_v30 }
 0x3e2   : > { %v6265_v46 = vpop.permute.xlu0 %3565 }
 0x3e3   : > { %6821 = vst [vmem:[#allocation28_spill] sm:$0xff] %v6265_v46  ;;  %v3719_v4 = vmul.f32 %v6255_v32, %v6265_v46 }
 0x3e5   : > { %v3766_v49 = vadd.f32 %v3765_v48, %v3719_v4 }
 0x3e6   : > { %v6269_v15 = vpop.permute.xlu0 %3570  ;;  %v6271_v47 = vpop.f32.mrb[22].mxu0 }
 0x3e7   : > { %6822 = vst [vmem:[#allocation29_spill] sm:$0xff] %v6269_v15  ;;  %v6273_v26 = vpop.f32.mrb[23].mxu0 }
 0x3e8   : > { %v3720_v39 = vmul.f32 %v6269_v15, %v6273_v26 }
 0x3ea   : > { %v3767_v57 = vadd.f32 %v3766_v49, %v3720_v39  ;;  %v6277_v25 = vpop.permute.xlu0 %3580 }
 0x3eb   : > { %6823 = vst [vmem:[#allocation30_spill] sm:$0xff] %v6277_v25 }
 0x3ee   : > { %v6283_v53 = vpop.permute.xlu0 %3585 }
 0x3ef   : > { %6824 = vst [vmem:[#allocation31_spill] sm:$0xff] %v6283_v53 }
 0x3f2   : > { %v6279_v60 = vpop.f32.mrb[0].mxu1  ;;  %v6291_v4 = vpop.permute.xlu0 %3590 }
 0x3f3   : > { %v6281_v36 = vpop.f32.mrb[1].mxu1  ;;  %v3449_v52 = vpop.xlane.xlu1 %3448  ;;  %6826 = vst [vmem:[#allocation33_spill] sm:$0xff] %v6291_v4  ;;  %v3723_v49 = vmul.f32 %v6279_v60, %v6283_v53 }
 0x3f4   : > { %v3450_v9 = vrot.slane %v3449_v52, 4  ;;  %v3722_v19 = vmul.f32 %v6277_v25, %v6281_v36 }
 0x3f6   : > { %v3451_v24 = vadd.f32 %v3450_v9, %v3449_v52  ;;  %v6301_v25 = vpop.permute.xlu0 %3595 }
 0x3f7   : > { %v6285_v42 = vpop.permute.xlu1 %3575  ;;  %6827 = vst [vmem:[#allocation34_spill] sm:$0xff] %v6301_v25 }
 0x3f8   : > { %6825 = vst [vmem:[#allocation32_spill] sm:$0xff] %v6285_v42  ;;  %v3452_v6 = vrot.slane %v3451_v24, 2  ;;  %v3721_v40 = vmul.f32 %v6271_v47, %v6285_v42 }
 0x3fa   : > { %v3768_v30 = vadd.f32 %v3767_v57, %v3721_v40  ;;  %v3453_v48 = vadd.f32 %v3452_v6, %v3451_v24 }
 0x3fc   : > { %v3769_v39 = vadd.f32 %v3768_v30, %v3722_v19  ;;  %v3454_v15 = vrot.slane %v3453_v48, 1  ;;  %v6307_v19 = vpop.permute.xlu1 %3600 }
 0x3fd   : > { %6828 = vst [vmem:[#allocation35_spill] sm:$0xff] %v6307_v19 }
 0x3fe   : > { %v6295_v46 = vpop.f32.mrb[2].mxu1  ;;  %v3770_v52 = vadd.f32 %v3769_v39, %v3723_v49  ;;  %v3455_v9 = vadd.f32 %v3454_v15, %v3453_v48  ;;  %v6313_v48 = vpop.permute.xlu0 %3605 }
 0x3ff   : > { %v6297_v5 = vpop.f32.mrb[3].mxu1  ;;  %v3725_v57 = vmul.f32 %v6295_v46, %v6301_v25  ;;  %6829 = vst [vmem:[#allocation36_spill] sm:$0xff] %v6313_v48 }
 0x400   : > { %v3724_v42 = vmul.f32 %v6291_v4, %v6297_v5  ;;  %4309 = vpush %v3455_v9 }
 0x402   : > { %v3771_v24 = vadd.f32 %v3770_v52, %v3724_v42  ;;  %v6319_v42 = vpop.permute.xlu1 %3610 }
 0x403   : > { %6830 = vst [vmem:[#allocation37_spill] sm:$0xff] %v6319_v42 }
 0x404   : > { %v3772_v6 = vadd.f32 %v3771_v24, %v3725_v57  ;;  %v6325_v24 = vpop.permute.xlu0 %3615 }
 0x405   : > { %6831 = vst [vmem:[#allocation38_spill] sm:$0xff] %v6325_v24 }
 0x40a   : > { %v6305_v40 = vpop.f32.mrb[4].mxu1 }
 0x40b   : > { %v6309_v30 = vpop.f32.mrb[5].mxu1  ;;  %v3727_v49 = vmul.f32 %v6305_v40, %v6313_v48 }
 0x40c   : > { %v3726_v15 = vmul.f32 %v6307_v19, %v6309_v30 }
 0x40e   : > { %v3773_v39 = vadd.f32 %v3772_v6, %v3726_v15  ;;  %v6331_v6 = vpop.permute.xlu1 %3620 }
 0x40f   : > { %6832 = vst [vmem:[#allocation39_spill] sm:$0xff] %v6331_v6 }
 0x410   : > { %v3774_v9 = vadd.f32 %v3773_v39, %v3727_v49  ;;  %v6337_v39 = vpop.permute.xlu0 %3625 }
 0x411   : > { %6833 = vst [vmem:[#allocation40_spill] sm:$0xff] %v6337_v39 }
 0x416   : > { %v6317_v4 = vpop.f32.mrb[6].mxu1 }
 0x417   : > { %v6321_v52 = vpop.f32.mrb[7].mxu1  ;;  %v3729_v19 = vmul.f32 %v6317_v4, %v6325_v24 }
 0x418   : > { %v3728_v57 = vmul.f32 %v6319_v42, %v6321_v52 }
 0x41a   : > { %v3775_v25 = vadd.f32 %v3774_v9, %v3728_v57  ;;  %v6343_v9 = vpop.permute.xlu1 %3630  ;;  %v6349_v57 = vpop.permute.xlu0 %3635 }
 0x41b   : > { %6834 = vst [vmem:[#allocation41_spill] sm:$0xff] %v6343_v9  ;;  %6835 = vst [vmem:[#allocation42_spill] sm:$0xff] %v6349_v57 }
 0x41c   : > { %v3776_v53 = vadd.f32 %v3775_v25, %v3729_v19 }
 0x422   : > { %v6329_v45 = vpop.f32.mrb[8].mxu1 }
 0x423   : > { %v6333_v15 = vpop.f32.mrb[9].mxu1  ;;  %v3731_v42 = vmul.f32 %v6329_v45, %v6337_v39 }
 0x424   : > { %v3730_v49 = vmul.f32 %v6331_v6, %v6333_v15 }
 0x426   : > { %v3777_v48 = vadd.f32 %v3776_v53, %v3730_v49  ;;  %v6355_v53 = vpop.permute.xlu1 %3640  ;;  %v6361_v49 = vpop.permute.xlu0 %3645 }
 0x427   : > { %6836 = vst [vmem:[#allocation43_spill] sm:$0xff] %v6355_v53  ;;  %6837 = vst [vmem:[#allocation44_spill] sm:$0xff] %v6361_v49 }
 0x428   : > { %v3778_v62 = vadd.f32 %v3777_v48, %v3731_v42 }
 0x42e   : > { %v6341_v23 = vpop.f32.mrb[10].mxu1 }
 0x42f   : > { %v6345_v25 = vpop.f32.mrb[11].mxu1  ;;  %v3733_v6 = vmul.f32 %v6341_v23, %v6349_v57 }
 0x430   : > { %v3732_v19 = vmul.f32 %v6343_v9, %v6345_v25 }
 0x431   : > { %s4310_s27 = spop %4309 }
 0x432   : > { %v3779_v24 = vadd.f32 %v3778_v62, %v3732_v19  ;;  %v6367_v62 = vpop.permute.xlu1 %3650  ;;  %v6373_v19 = vpop.permute.xlu0 %3655  ;;  %s3457_s30 = smax.f32 %s4439_s29, %s4310_s27 }
 0x433   : > { %6838 = vst [vmem:[#allocation45_spill] sm:$0xff] %v6367_v62  ;;  %6839 = vst [vmem:[#allocation46_spill] sm:$0xff] %v6373_v19 }
 0x434   : > { %v3780_v41 = vadd.f32 %v3779_v24, %v3733_v6 }
 0x43a   : > { %v6353_v3 = vpop.f32.mrb[12].mxu1 }
 0x43b   : > { %v6357_v48 = vpop.f32.mrb[13].mxu1  ;;  %v3735_v9 = vmul.f32 %v6353_v3, %v6361_v49 }
 0x43c   : > { %v3734_v42 = vmul.f32 %v6355_v53, %v6357_v48 }
 0x43e   : > { %v3781_v39 = vadd.f32 %v3780_v41, %v3734_v42  ;;  %v6379_v41 = vpop.permute.xlu1 %3660  ;;  %v6385_v42 = vpop.permute.xlu0 %3665 }
 0x43f   : > { %6840 = vst [vmem:[#allocation47_spill] sm:$0xff] %v6379_v41  ;;  %6841 = vst [vmem:[#allocation48_spill] sm:$0xff] %v6385_v42 }
 0x440   : > { %v3782_v59 = vadd.f32 %v3781_v39, %v3735_v9 }
 0x446   : > { %v6365_v0 = vpop.f32.mrb[14].mxu1 }
 0x447   : > { %v6369_v24 = vpop.f32.mrb[15].mxu1  ;;  %v3737_v53 = vmul.f32 %v6365_v0, %v6373_v19 }
 0x448   : > { %v3736_v6 = vmul.f32 %v6367_v62, %v6369_v24 }
 0x44a   : > { %v3783_v57 = vadd.f32 %v3782_v59, %v3736_v6  ;;  %v6391_v59 = vpop.permute.xlu1 %3670  ;;  %v6397_v6 = vpop.permute.xlu0 %3675 }
 0x44b   : > { %6843 = vst [vmem:[#allocation50_spill] sm:$0xff] %v6391_v59  ;;  %6845 = vst [vmem:[#allocation52_spill] sm:$0xff] %v6397_v6 }
 0x44c   : > { %v3784_v33 = vadd.f32 %v3783_v57, %v3737_v53 }
 0x452   : > { %v6377_v29 = vpop.f32.mrb[16].mxu1 }
 0x453   : > { %v6381_v39 = vpop.f32.mrb[17].mxu1  ;;  %v3739_v62 = vmul.f32 %v6377_v29, %v6385_v42 }
 0x454   : > { %v3738_v9 = vmul.f32 %v6379_v41, %v6381_v39 }
 0x456   : > { %v3785_v49 = vadd.f32 %v3784_v33, %v3738_v9  ;;  %v6403_v33 = vpop.permute.xlu1 %3680  ;;  %v6409_v9 = vpop.permute.xlu0 %3685 }
 0x457   : > { %6847 = vst [vmem:[#allocation54_spill] sm:$0xff] %v6403_v33  ;;  %6849 = vst [vmem:[#allocation56_spill] sm:$0xff] %v6409_v9 }
 0x458   : > { %v3786_v37 = vadd.f32 %v3785_v49, %v3739_v62 }
 0x45e   : > { %v6389_v14 = vpop.f32.mrb[18].mxu1 }
 0x45f   : > { %6842 = vst [vmem:[#allocation49_spill] sm:$0xff] %v6389_v14  ;;  %v6393_v57 = vpop.f32.mrb[19].mxu1  ;;  %v3741_v41 = vmul.f32 %v6389_v14, %v6397_v6 }
 0x460   : > { %6844 = vst [vmem:[#allocation51_spill] sm:$0xff] %v6393_v57  ;;  %v3740_v53 = vmul.f32 %v6391_v59, %v6393_v57  ;;  %v6857_v57 = vld [vmem:[#allocation12_spill] sm:$0xff] }
 0x462   : > { %v3787_v19 = vadd.f32 %v3786_v37, %v3740_v53  ;;  %v6415_v37 = vpop.permute.xlu1 %3690  ;;  %v6421_v53 = vpop.permute.xlu0 %3695 }
 0x464   : > { %v3788_v58 = vadd.f32 %v3787_v19, %v3741_v41 }
 0x46a   : > { %v6401_v20 = vpop.f32.mrb[20].mxu1 }
 0x46b   : > { %6846 = vst [vmem:[#allocation53_spill] sm:$0xff] %v6401_v20  ;;  %v6405_v49 = vpop.f32.mrb[21].mxu1  ;;  %v3743_v59 = vmul.f32 %v6401_v20, %v6409_v9 }
 0x46c   : > { %6848 = vst [vmem:[#allocation55_spill] sm:$0xff] %v6405_v49  ;;  %v3742_v62 = vmul.f32 %v6403_v33, %v6405_v49 }
 0x46e   : > { %v3789_v42 = vadd.f32 %v3788_v58, %v3742_v62 }
 0x470   : > { %v3790_v17 = vadd.f32 %v3789_v42, %v3743_v59  ;;  %v3799_v59 = vstv %s3457_s30 }
 0x471   : > { %4362 = vrcp.f32 %v3799_v59 }
 0x476   : > { %v6413_v6 = vpop.f32.mrb[22].mxu1 }
 0x477   : > { %v6417_v19 = vpop.f32.mrb[23].mxu1  ;;  %v3745_v58 = vmul.f32 %v6413_v6, %v6421_v53 }
 0x478   : > { %v3744_v41 = vmul.f32 %v6415_v37, %v6417_v19 }
 0x47a   : > { %v3791_v42 = vadd.f32 %v3790_v17, %v3744_v41 }
 0x47b   : > { %v4363_v55 = vpop.eup %4362 }
 0x47c   : > { %v3792_v62 = vadd.f32 %v3791_v42, %v3745_v58 }
 0x47e   : > { %v3793_v9 = vrot.slane %v3792_v62, 4 }
 0x480   : > { %v3794_v33 = vadd.f32 %v3793_v9, %v3792_v62 }
 0x482   : > { %v3795_v13 = vrot.slane %v3794_v33, 2 }
 0x484   : > { %v3796_v51 = vadd.f32 %v3795_v13, %v3794_v33 }
 0x486   : > { %v3797_v50 = vrot.slane %v3796_v51, 1 }
 0x488   : > { %v3798_v11 = vadd.f32 %v3797_v50, %v3796_v51 }
 0x48a   : > { %v6428_v56 = vmul.f32 %v4363_v55, %v3798_v11  ;;  %3898 = vst [vmem:[%s6430_s7] sm:$0x1] %v3798_v11 }
 0x48c   : > { %v3802_v17 = vsub.f32 %v6077_v63, %v6428_v56  ;;  %v3803_v9 = vsub.f32 %v6073_v31, %v6428_v56  ;;  %v3804_v13 = vsub.f32 %v6088_v35, %v6428_v56  ;;  %v3805_v33 = vsub.f32 %v6085_v2, %v6428_v56  ;;  %v6855_v2 = vld [vmem:[#allocation10_spill] sm:$0xff] }
 0x48d   : > { %v3806_v55 = vsub.f32 %v6104_v12, %v6428_v56  ;;  %v3807_v50 = vsub.f32 %v6101_v8, %v6428_v56  ;;  %v3808_v11 = vsub.f32 %v6122_v54, %v6428_v56  ;;  %v3809_v63 = vsub.f32 %v6119_v10, %v6428_v56  ;;  %v6853_v10 = vld [vmem:[#allocation7_spill] sm:$0xff] }
 0x48e   : > { %v3810_v31 = vsub.f32 %v6140_v27, %v6428_v56  ;;  %v3811_v35 = vsub.f32 %v6137_v22, %v6428_v56  ;;  %v3848_v41 = vsub.f32 %v6417_v19, %v6428_v56  ;;  %v3849_v58 = vsub.f32 %v6413_v6, %v6428_v56  ;;  %v6852_v27 = vld [vmem:[#allocation8_spill] sm:$0xff]  ;;  %v6854_v22 = vld [vmem:[#allocation9_spill] sm:$0xff]  ;;  %v6856_v19 = vld [vmem:[#allocation11_spill] sm:$0xff] }
 0x48f   : > { %v3850_v62 = vmul.f32 %v3802_v17, %v6852_v27  ;;  %v3851_v54 = vmul.f32 %v3803_v9, %v6853_v10  ;;  %v3852_v8 = vmul.f32 %v3804_v13, %v6854_v22  ;;  %v3853_v20 = vmul.f32 %v3805_v33, %v6855_v2  ;;  %v6859_v27 = vld [vmem:[#allocation14_spill] sm:$0xff]  ;;  %v6860_v22 = vld [vmem:[#allocation15_spill] sm:$0xff]  ;;  %v6861_v2 = vld [vmem:[#allocation16_spill] sm:$0xff] }
 0x490   : > { %v6530_v42 = vmul.f32 %v3848_v41, %v6415_v37  ;;  %v6533_v59 = vmul.f32 %v3849_v58, %v6421_v53  ;;  %v3854_v49 = vmul.f32 %v3806_v55, %v6856_v19  ;;  %v3855_v37 = vmul.f32 %v3807_v50, %v6857_v57  ;;  %v6858_v53 = vld [vmem:[#allocation13_spill] sm:$0xff]  ;;  %v6864_v50 = vld [vmem:[#allocation18_spill] sm:$0xff] }
 0x491   : > { %v3899_v12 = vmul.f32 %v3850_v62, %v3850_v62  ;;  %v3900_v51 = vmul.f32 %v3851_v54, %v3851_v54  ;;  %v3901_v14 = vmul.f32 %v3852_v8, %v3852_v8  ;;  %v3902_v41 = vmul.f32 %v3853_v20, %v3853_v20 }
 0x492   : > { %6850 = vst [vmem:[#allocation57_spill] sm:$0xff] %v6530_v42  ;;  %6851 = vst [vmem:[#allocation58_spill] sm:$0xff] %v6533_v59  ;;  %v3856_v58 = vmul.f32 %v3808_v11, %v6858_v53  ;;  %v3903_v59 = vmul.f32 %v3854_v49, %v3854_v49  ;;  %v3857_v9 = vmul.f32 %v3809_v63, %v6859_v27  ;;  %v6870_v27 = vld [vmem:[#allocation21_spill] sm:$0xff] }
 0x493   : > { %v3947_v6 = vadd.f32 %v3900_v51, %v3899_v12  ;;  %v3904_v10 = vmul.f32 %v3855_v37, %v3855_v37  ;;  %v3858_v54 = vmul.f32 %v3810_v31, %v6860_v22  ;;  %v3859_v55 = vmul.f32 %v3811_v35, %v6861_v2  ;;  %v6862_v51 = vld [vmem:[#allocation17_spill] sm:$0xff]  ;;  %v6872_v22 = vld [vmem:[#allocation22_spill] sm:$0xff]  ;;  %v6874_v2 = vld [vmem:[#allocation23_spill] sm:$0xff] }
 0x494   : > { %v3905_v62 = vmul.f32 %v3856_v58, %v3856_v58  ;;  %v3906_v8 = vmul.f32 %v3857_v9, %v3857_v9  ;;  %v6863_v20 = vsub.f32 %v6156_v61, %v6428_v56  ;;  %v6865_v11 = vsub.f32 %v6153_v43, %v6428_v56 }
 0x495   : > { %v3948_v42 = vadd.f32 %v3947_v6, %v3901_v14  ;;  %v3907_v57 = vmul.f32 %v3858_v54, %v3858_v54  ;;  %v6867_v35 = vsub.f32 %v6171_v44, %v6428_v56  ;;  %v6869_v61 = vsub.f32 %v6167_v21, %v6428_v56 }
 0x496   : > { %v3860_v14 = vmul.f32 %v6863_v20, %v6862_v51  ;;  %v3861_v63 = vmul.f32 %v6865_v11, %v6864_v50  ;;  %v6871_v43 = vsub.f32 %v6197_v28, %v6428_v56  ;;  %v6873_v44 = vsub.f32 %v6195_v7, %v6428_v56  ;;  %v6876_v51 = vld [vmem:[#allocation24_spill] sm:$0xff] }
 0x497   : > { %v3949_v17 = vadd.f32 %v3948_v42, %v3902_v41  ;;  %v3908_v42 = vmul.f32 %v3859_v55, %v3859_v55  ;;  %v6868_v41 = vld [vmem:[#allocation20_spill] sm:$0xff]  ;;  %v6875_v21 = vsub.f32 %v6225_v1, %v6428_v56  ;;  %v6877_v28 = vsub.f32 %v6223_v34, %v6428_v56 }
 0x498   : > { %v3909_v6 = vmul.f32 %v3860_v14, %v3860_v14  ;;  %v3863_v53 = vmul.f32 %v6869_v61, %v6868_v41  ;;  %v3910_v58 = vmul.f32 %v3861_v63, %v3861_v63  ;;  %v3864_v9 = vmul.f32 %v6871_v43, %v6870_v27  ;;  %v6884_v61 = vld [vmem:[#allocation28_spill] sm:$0xff]  ;;  %v6886_v27 = vld [vmem:[#allocation29_spill] sm:$0xff] }
 0x499   : > { %v3950_v13 = vadd.f32 %v3949_v17, %v3903_v59  ;;  %v6866_v59 = vld [vmem:[#allocation19_spill] sm:$0xff]  ;;  %v3865_v54 = vmul.f32 %v6873_v44, %v6872_v22  ;;  %v3866_v55 = vmul.f32 %v6875_v21, %v6874_v2  ;;  %v3867_v20 = vmul.f32 %v6877_v28, %v6876_v51  ;;  %v6894_v28 = vld [vmem:[#allocation33_spill] sm:$0xff] }
 0x49a   : > { %v3862_v19 = vmul.f32 %v6867_v35, %v6866_v59  ;;  %v6879_v7 = vsub.f32 %v6243_v18, %v6428_v56  ;;  %v6881_v1 = vsub.f32 %v6239_v16, %v6428_v56  ;;  %v6883_v34 = vsub.f32 %v6259_v38, %v6428_v56 }
 0x49b   : > { %v3951_v33 = vadd.f32 %v3950_v13, %v3904_v10  ;;  %v3914_v14 = vmul.f32 %v3865_v54, %v3865_v54  ;;  %v3915_v11 = vmul.f32 %v3866_v55, %v3866_v55  ;;  %v3916_v59 = vmul.f32 %v3867_v20, %v3867_v20  ;;  %v6892_v55 = vld [vmem:[#allocation31_spill] sm:$0xff] }
 0x49c   : > { %v3911_v10 = vmul.f32 %v3862_v19, %v3862_v19  ;;  %v6882_v19 = vld [vmem:[#allocation27_spill] sm:$0xff]  ;;  %v6885_v18 = vsub.f32 %v6255_v32, %v6428_v56  ;;  %v6887_v16 = vsub.f32 %v6273_v26, %v6428_v56  ;;  %v6889_v38 = vsub.f32 %v6271_v47, %v6428_v56 }
 0x49d   : > { %v3952_v12 = vadd.f32 %v3951_v33, %v3905_v62  ;;  %v3912_v62 = vmul.f32 %v3863_v53, %v3863_v53  ;;  %v6891_v32 = vsub.f32 %v6281_v36, %v6428_v56  ;;  %v6893_v26 = vsub.f32 %v6279_v60, %v6428_v56 }
 0x49e   : > { %v3871_v53 = vmul.f32 %v6885_v18, %v6884_v61  ;;  %v3872_v43 = vmul.f32 %v6887_v16, %v6886_v27  ;;  %v6895_v47 = vsub.f32 %v6297_v5, %v6428_v56  ;;  %v6897_v36 = vsub.f32 %v6295_v46, %v6428_v56  ;;  %v6904_v18 = vld [vmem:[#allocation38_spill] sm:$0xff]  ;;  %v6906_v27 = vld [vmem:[#allocation39_spill] sm:$0xff] }
 0x49f   : > { %v3953_v49 = vadd.f32 %v3952_v12, %v3906_v8  ;;  %v3913_v8 = vmul.f32 %v3864_v9, %v3864_v9  ;;  %v6899_v60 = vsub.f32 %v6309_v30, %v6428_v56  ;;  %v6901_v5 = vsub.f32 %v6305_v40, %v6428_v56 }
 0x4a0   : > { %v3920_v44 = vmul.f32 %v3871_v53, %v3871_v53  ;;  %v3921_v2 = vmul.f32 %v3872_v43, %v3872_v43  ;;  %v3876_v20 = vmul.f32 %v6895_v47, %v6894_v28  ;;  %v6903_v46 = vsub.f32 %v6321_v52, %v6428_v56  ;;  %v6916_v28 = vld [vmem:[#allocation44_spill] sm:$0xff] }
 0x4a1   : > { %v3954_v31 = vadd.f32 %v3953_v49, %v3907_v57  ;;  %v6878_v49 = vld [vmem:[#allocation25_spill] sm:$0xff]  ;;  %v6905_v30 = vsub.f32 %v6317_v4, %v6428_v56  ;;  %v6907_v40 = vsub.f32 %v6333_v15, %v6428_v56  ;;  %v6909_v52 = vsub.f32 %v6329_v45, %v6428_v56 }
 0x4a2   : > { %v3868_v50 = vmul.f32 %v6879_v7, %v6878_v49  ;;  %v6896_v49 = vld [vmem:[#allocation34_spill] sm:$0xff]  ;;  %v6911_v4 = vsub.f32 %v6345_v25, %v6428_v56  ;;  %v6913_v15 = vsub.f32 %v6341_v23, %v6428_v56  ;;  %v6915_v45 = vsub.f32 %v6357_v48, %v6428_v56 }
 0x4a3   : > { %v3955_v37 = vadd.f32 %v3954_v31, %v3908_v42  ;;  %v6880_v42 = vld [vmem:[#allocation26_spill] sm:$0xff]  ;;  %v3877_v7 = vmul.f32 %v6897_v36, %v6896_v49  ;;  %v3881_v53 = vmul.f32 %v6905_v30, %v6904_v18  ;;  %v3882_v16 = vmul.f32 %v6907_v40, %v6906_v27  ;;  %v6929_v18 = vld [vmem:[#allocation52_spill] sm:$0xff]  ;;  %v6930_v30 = vld [vmem:[#allocation49_spill] sm:$0xff] }
 0x4a4   : > { %v3869_v31 = vmul.f32 %v6881_v1, %v6880_v42  ;;  %v3925_v1 = vmul.f32 %v3876_v20, %v3876_v20  ;;  %v6917_v25 = vsub.f32 %v6353_v3, %v6428_v56  ;;  %v6919_v23 = vsub.f32 %v6369_v24, %v6428_v56  ;;  %v6932_v27 = vld [vmem:[#allocation54_spill] sm:$0xff]  ;;  %v6933_v40 = vld [vmem:[#allocation55_spill] sm:$0xff] }
 0x4a5   : > { %v3956_v17 = vadd.f32 %v3955_v37, %v3909_v6  ;;  %v3870_v6 = vmul.f32 %v6883_v34, %v6882_v19  ;;  %v3917_v37 = vmul.f32 %v3868_v50, %v3868_v50  ;;  %v3926_v19 = vmul.f32 %v3877_v7, %v3877_v7 }
 0x4a6   : > { %v3887_v47 = vmul.f32 %v6917_v25, %v6916_v28  ;;  %v6921_v48 = vsub.f32 %v6365_v0, %v6428_v56  ;;  %v6923_v3 = vsub.f32 %v6381_v39, %v6428_v56  ;;  %v6925_v24 = vsub.f32 %v6377_v29, %v6428_v56 }
 0x4a7   : > { %v3957_v13 = vadd.f32 %v3956_v17, %v3910_v58  ;;  %v3918_v58 = vmul.f32 %v3869_v31, %v3869_v31  ;;  %v3919_v9 = vmul.f32 %v3870_v6, %v3870_v6  ;;  %v6902_v6 = vld [vmem:[#allocation37_spill] sm:$0xff]  ;;  %v6931_v39 = vsub.f32 %v6930_v30, %v6428_v56 }
 0x4a8   : > { %v6934_v29 = vsub.f32 %v6933_v40, %v6428_v56 }
 0x4a9   : > { %v3958_v33 = vadd.f32 %v3957_v13, %v3911_v10  ;;  %v6888_v13 = vld [vmem:[#allocation32_spill] sm:$0xff] }
 0x4aa   : > { %v3873_v22 = vmul.f32 %v6889_v38, %v6888_v13  ;;  %v3930_v38 = vmul.f32 %v3881_v53, %v3881_v53  ;;  %v3893_v53 = vmul.f32 %v6931_v39, %v6929_v18 }
 0x4ab   : > { %v3959_v12 = vadd.f32 %v3958_v33, %v3912_v62  ;;  %v6890_v62 = vld [vmem:[#allocation30_spill] sm:$0xff] }
 0x4ac   : > { %v3874_v33 = vmul.f32 %v6891_v32, %v6890_v62  ;;  %v3931_v62 = vmul.f32 %v3882_v16, %v3882_v16  ;;  %v3894_v16 = vmul.f32 %v6934_v29, %v6932_v27 }
 0x4ad   : > { %v3960_v57 = vadd.f32 %v3959_v12, %v3913_v8  ;;  %v3875_v8 = vmul.f32 %v6893_v26, %v6892_v55  ;;  %v3922_v12 = vmul.f32 %v3873_v22, %v3873_v22  ;;  %v6914_v26 = vld [vmem:[#allocation43_spill] sm:$0xff] }
 0x4af   : > { %v3961_v63 = vadd.f32 %v3960_v57, %v3914_v14  ;;  %v3923_v14 = vmul.f32 %v3874_v33, %v3874_v33  ;;  %v3924_v50 = vmul.f32 %v3875_v8, %v3875_v8  ;;  %v6912_v33 = vld [vmem:[#allocation42_spill] sm:$0xff]  ;;  %v3886_v8 = vmul.f32 %v6915_v45, %v6914_v26 }
 0x4b1   : > { %v3962_v35 = vadd.f32 %v3961_v63, %v3915_v11  ;;  %v6898_v63 = vld [vmem:[#allocation35_spill] sm:$0xff]  ;;  %v3935_v36 = vmul.f32 %v3886_v8, %v3886_v8 }
 0x4b2   : > { %v3878_v42 = vmul.f32 %v6899_v60, %v6898_v63  ;;  %v3936_v63 = vmul.f32 %v3887_v47, %v3887_v47 }
 0x4b3   : > { %v3963_v41 = vadd.f32 %v3962_v35, %v3916_v59  ;;  %v6900_v59 = vld [vmem:[#allocation36_spill] sm:$0xff] }
 0x4b4   : > { %v3879_v35 = vmul.f32 %v6901_v5, %v6900_v59  ;;  %v6924_v5 = vld [vmem:[#allocation48_spill] sm:$0xff] }
 0x4b5   : > { %v3964_v17 = vadd.f32 %v3963_v41, %v3917_v37  ;;  %v3880_v37 = vmul.f32 %v6903_v46, %v6902_v6  ;;  %v3927_v41 = vmul.f32 %v3878_v42, %v3878_v42  ;;  %v6922_v42 = vld [vmem:[#allocation47_spill] sm:$0xff]  ;;  %v6926_v6 = vld [vmem:[#allocation50_spill] sm:$0xff] }
 0x4b6   : > { %v6927_v46 = vld [vmem:[#allocation51_spill] sm:$0xff] }
 0x4b7   : > { %v3965_v10 = vadd.f32 %v3964_v17, %v3918_v58  ;;  %v3928_v58 = vmul.f32 %v3879_v35, %v3879_v35  ;;  %v3929_v43 = vmul.f32 %v3880_v37, %v3880_v37  ;;  %v3891_v35 = vmul.f32 %v6925_v24, %v6924_v5 }
 0x4b8   : > { %v6928_v0 = vsub.f32 %v6927_v46, %v6428_v56 }
 0x4b9   : > { %v3966_v54 = vadd.f32 %v3965_v10, %v3919_v9  ;;  %v6908_v10 = vld [vmem:[#allocation40_spill] sm:$0xff] }
 0x4ba   : > { %v3883_v13 = vmul.f32 %v6909_v52, %v6908_v10  ;;  %v3892_v37 = vmul.f32 %v6928_v0, %v6926_v6  ;;  %v6935_v10 = vld [vmem:[#allocation56_spill] sm:$0xff]  ;;  %v6936_v52 = vld [vmem:[#allocation53_spill] sm:$0xff] }
 0x4bb   : > { %v3967_v21 = vadd.f32 %v3966_v54, %v3920_v44  ;;  %v6910_v44 = vld [vmem:[#allocation41_spill] sm:$0xff] }
 0x4bc   : > { %v3884_v54 = vmul.f32 %v6911_v4, %v6910_v44  ;;  %v3943_v4 = vmul.f32 %v3894_v16, %v3894_v16 }
 0x4bd   : > { %v3968_v51 = vadd.f32 %v3967_v21, %v3921_v2  ;;  %v3885_v2 = vmul.f32 %v6913_v15, %v6912_v33  ;;  %v3932_v21 = vmul.f32 %v3883_v13, %v3883_v13  ;;  %v6937_v13 = vsub.f32 %v6936_v52, %v6428_v56  ;;  %v6938_v33 = vld [vmem:[#allocation57_spill] sm:$0xff] }
 0x4be   : > { %v3945_v15 = vmul.f32 %v6938_v33, %v6938_v33 }
 0x4bf   : > { %v3969_v57 = vadd.f32 %v3968_v51, %v3922_v12  ;;  %v3933_v12 = vmul.f32 %v3884_v54, %v3884_v54  ;;  %v3934_v20 = vmul.f32 %v3885_v2, %v3885_v2 }
 0x4c1   : > { %v3970_v11 = vadd.f32 %v3969_v57, %v3923_v14  ;;  %v6918_v57 = vld [vmem:[#allocation45_spill] sm:$0xff] }
 0x4c2   : > { %v3888_v49 = vmul.f32 %v6919_v23, %v6918_v57 }
 0x4c3   : > { %v3971_v31 = vadd.f32 %v3970_v11, %v3924_v50  ;;  %v6920_v50 = vld [vmem:[#allocation46_spill] sm:$0xff] }
 0x4c4   : > { %v3889_v11 = vmul.f32 %v6921_v48, %v6920_v50 }
 0x4c5   : > { %v3972_v34 = vadd.f32 %v3971_v31, %v3925_v1  ;;  %v3890_v1 = vmul.f32 %v6923_v3, %v6922_v42  ;;  %v3937_v31 = vmul.f32 %v3888_v49, %v3888_v49 }
 0x4c7   : > { %v3973_v61 = vadd.f32 %v3972_v34, %v3926_v19  ;;  %v3938_v19 = vmul.f32 %v3889_v11, %v3889_v11 }
 0x4c9   : > { %v3974_v17 = vadd.f32 %v3973_v61, %v3927_v41  ;;  %v3939_v41 = vmul.f32 %v3890_v1, %v3890_v1 }
 0x4cb   : > { %v3975_v9 = vadd.f32 %v3974_v17, %v3928_v58  ;;  %v3940_v58 = vmul.f32 %v3891_v35, %v3891_v35 }
 0x4cd   : > { %v3976_v22 = vadd.f32 %v3975_v9, %v3929_v43  ;;  %v3941_v43 = vmul.f32 %v3892_v37, %v3892_v37 }
 0x4cf   : > { %v3977_v32 = vadd.f32 %v3976_v22, %v3930_v38  ;;  %v3895_v38 = vmul.f32 %v6937_v13, %v6935_v10  ;;  %v3942_v22 = vmul.f32 %v3893_v53, %v3893_v53 }
 0x4d1   : > { %v3978_v55 = vadd.f32 %v3977_v32, %v3931_v62  ;;  %v3944_v62 = vmul.f32 %v3895_v38, %v3895_v38 }
 0x4d3   : > { %v3979_v51 = vadd.f32 %v3978_v55, %v3932_v21  ;;  %v6939_v21 = vld [vmem:[#allocation58_spill] sm:$0xff] }
 0x4d4   : > { %v3946_v55 = vmul.f32 %v6939_v21, %v6939_v21 }
 0x4d5   : > { %v3980_v14 = vadd.f32 %v3979_v51, %v3933_v12 }
 0x4d7   : > { %v3981_v7 = vadd.f32 %v3980_v14, %v3934_v20 }
 0x4d9   : > { %v3982_v60 = vadd.f32 %v3981_v7, %v3935_v36 }
 0x4db   : > { %v3983_v59 = vadd.f32 %v3982_v60, %v3936_v63 }
 0x4dd   : > { %v3984_v34 = vadd.f32 %v3983_v59, %v3937_v31 }
 0x4df   : > { %v3985_v61 = vadd.f32 %v3984_v34, %v3938_v19 }
 0x4e1   : > { %v3986_v17 = vadd.f32 %v3985_v61, %v3939_v41 }
 0x4e3   : > { %v3987_v9 = vadd.f32 %v3986_v17, %v3940_v58 }
 0x4e5   : > { %v3988_v44 = vadd.f32 %v3987_v9, %v3941_v43 }
 0x4e7   : > { %v3989_v54 = vadd.f32 %v3988_v44, %v3942_v22 }
 0x4e9   : > { %v3990_v32 = vadd.f32 %v3989_v54, %v3943_v4 }
 0x4eb   : > { %v3991_v2 = vadd.f32 %v3990_v32, %v3944_v62 }
 0x4ed   : > { %v3992_v26 = vadd.f32 %v3991_v2, %v3945_v15 }
 0x4ef   : > { %v3993_v56 = vadd.f32 %v3992_v26, %v3946_v55 }
 0x4f1   : > { %v3994_v45 = vrot.slane %v3993_v56, 4 }
 0x4f3   : > { %v3995_v8 = vadd.f32 %v3994_v45, %v3993_v56 }
 0x4f5   : > { %v3996_v12 = vrot.slane %v3995_v8, 2 }
 0x4f7   : > { %v3997_v51 = vadd.f32 %v3996_v12, %v3995_v8 }
 0x4f9   : > { %v3998_v28 = vrot.slane %v3997_v51, 1 }
 0x4fb   : > { %v3999_v25 = vadd.f32 %v3998_v28, %v3997_v51 }
 0x4fd   : > { %4000 = vst [vmem:[%s6430_s7 + $0x1] sm:$0x1] %v3999_v25 }
 0x4fe   : > { %4379 = shalt.err (!%p4376_p7)
}
 0x4ff   : > { %s4380_s23 = scalar_lea.hbm %s6698_s12, 128  ;;  %s4384_s29 = scalar_lea.hbm %s6747_s4, 256 }
 0x500   : > { %p4381_p8 = scmp.ne.s32.totalorder %s6698_s12, %s4380_s23  ;;  %p4385_p11 = scmp.lt.u32.totalorder %s6698_s12, %s6747_s4 }
 0x501   : > { %p4386_p12 = scmp.lt.u32.totalorder %s4384_s29, %s4380_s23  ;;  %p4388_p0 = scmp.lt.u32.totalorder %s4380_s23, %s6698_s12 }
 0x502   : > { %p4382_p9 = pnand %p4381_p8, %p4504_p5 }
 0x503   : > { %p4387_p13 = por %p4386_p12, %p4385_p11 }
 0x504   : > { %p4383_p10 = pneg %p4382_p9 }
 0x505   : > { %p4389_p1 = por %p4388_p0, %p4387_p13 }
 0x507   : > { %p4390_p2 = pnand %p4389_p1, %p4383_p10 }
 0x509   : > { %4393 = shalt.err (!%p4390_p2)
}
 0x50a   : > { %4311 = dma.vmem_to_hbm [thread:$0]  (%p4504_p5), %s6700_s9, 128, %s6698_s12, %s4002_s14  }
 0x50b PF: > { %p4317_p3 = scmp.ge.s32.totalorder %s4428_s18, 2  ;;  %s4027_s6 = sand.u32 1, %s4416_s15  }
 0x50c   : > { %s4028_s7 = scalar_lea.sflag [#allocation5], %s4027_s6 }
 0x50d   : > { %p4314_p4 = pnand %p4317_p3, %p4508_p6 }
 0x50f   : > { %4411 = dma.done.wait (!%p4314_p4), %s4028_s7, 128  }
 0x510   : > { %4413 = vsyncadd (!%p4314_p4), %s4028_s7, 4294967168  ;;  %p14_p7 = scmp.ge.s32.totalorder %s4491_s21, 4   ;;  %s6940_s15 = smov %s4420_s16 }
 0x511   : > { %s6941_s16 = smov %s4424_s17  ;;  %s6942_s17 = smov %s4502_s24 }
 0x512   : > { %s6943_s18 = smov %s4491_s21  ;;  %16 = sbr.rel (!%p14_p7) target bundleno = 3 (0x3), region = 77 }
 0x519   :  { %4033 = vsyncpa [#allocation5], 1 }
 0x51a   :  { %4035 = vsyncpa [#allocation5 + $0x1], 1 }

</bundles_post_ra>
